<compile_context>
chip_gen: v6e
topology: v6e:2x2x1
jax: 0.10.0
libtpu: 0.0.40
codegen_flags: <defaults>
</compile_context>

<pallas_src>
import numpy as np
import jax
import jax.numpy as jnp
from jax.experimental import pallas as pl
from jax.experimental.pallas import tpu as pltpu

NUM_LAYERS = 6
NHEAD = 8
LN_EPS = 1e-5


def _layernorm(x, gamma, beta):
    # x: (M, D) f32; gamma/beta: (1, D) f32. PyTorch LayerNorm (biased variance).
    mu = jnp.mean(x, axis=-1, keepdims=True)
    var = jnp.mean((x - mu) ** 2, axis=-1, keepdims=True)
    return (x - mu) * jax.lax.rsqrt(var + LN_EPS) * gamma + beta


def _mm(a, w_t):
    # bf16 x bf16 MXU matmul with f32 accumulation; w_t is already bf16 (W^T layout).
    return jnp.dot(a.astype(jnp.bfloat16), w_t, preferred_element_type=jnp.float32)


def qformer_layer_kernel(x_ref, wqkv_ref, bqkv_ref, wo_ref, bo_ref,
                         g1_ref, be1_ref, g2_ref, be2_ref,
                         w1_ref, b1f_ref, w2_ref, b2f_ref,
                         o_ref, xs_ref):
    # x_ref:  (TB, S, D) f32   block of batch elements (resident across the layer axis)
    # w*_ref: per-layer weight slices, leading dim 1 (matmul weights bf16, W^T layout,
    #         1/sqrt(hd) pre-folded into the Q slice of wqkv/bqkv)
    # o_ref:  (TB, NQ, D) f32
    # xs_ref: (TB*S, D) f32 scratch -- activations carried across the layer grid axis
    l = pl.program_id(1)
    TB, S, D = x_ref.shape
    NQ = o_ref.shape[1]
    M = TB * S
    hd = D // NHEAD

    @pl.when(l == 0)
    def _():
        xs_ref[...] = x_ref[...].reshape(M, D)

    x = xs_ref[...]                                                      # (M, D) f32

    # ---------------- multi-head self attention ----------------
    # Fused QKV projection; cast to bf16 immediately (all consumers take bf16).
    qkv = (_mm(x, wqkv_ref[0]) + bqkv_ref[0]).astype(jnp.bfloat16)       # (M, 3D) bf16

    # Build head-major batched operands (NHEAD*TB, S, hd) from static column slices,
    # then run a single batched QK^T / softmax / PV instead of 8 unrolled regions.
    q_heads, k_heads, v_heads = [], [], []
    for h in range(NHEAD):
        lo = h * hd
        q_heads.append(qkv[:, lo:lo + hd].reshape(TB, S, hd))
        k_heads.append(qkv[:, D + lo:D + lo + hd].reshape(TB, S, hd))
        v_heads.append(qkv[:, 2 * D + lo:2 * D + lo + hd].reshape(TB, S, hd))
    qh = jnp.stack(q_heads, axis=0).reshape(NHEAD * TB, S, hd)
    kh = jnp.stack(k_heads, axis=0).reshape(NHEAD * TB, S, hd)
    vh = jnp.stack(v_heads, axis=0).reshape(NHEAD * TB, S, hd)

    s = jnp.einsum('bqd,bkd->bqk', qh, kh,
                   preferred_element_type=jnp.float32)                   # (H*TB, S, S)
    s = s - jnp.max(s, axis=-1, keepdims=True)
    p = jnp.exp(s)
    p = p * pl.reciprocal(jnp.sum(p, axis=-1, keepdims=True), approx=True)
    oh = jnp.einsum('bqk,bkd->bqd', p.astype(jnp.bfloat16), vh,
                    preferred_element_type=jnp.float32).astype(jnp.bfloat16)  # (H*TB, S, hd)

    # Reassemble heads into (M, D) in registers (no scratch round-trip).
    attn_heads = jnp.concatenate(
        [oh[h * TB:(h + 1) * TB].reshape(M, hd) for h in range(NHEAD)], axis=-1)

    # Single full-K output projection on the concatenated heads.
    attn = jnp.dot(attn_heads, wo_ref[0],
                   preferred_element_type=jnp.float32) + bo_ref[0]        # (M, D) f32
    x = _layernorm(x + attn, g1_ref[0], be1_ref[0])

    # ---------------------- feed forward ------------------------
    h1 = jnp.maximum(_mm(x, w1_ref[0]) + b1f_ref[0], 0.0).astype(jnp.bfloat16)  # (M, 4D)
    ff = jnp.dot(h1, w2_ref[0], preferred_element_type=jnp.float32) + b2f_ref[0]
    x = _layernorm(x + ff, g2_ref[0], be2_ref[0])

    xs_ref[...] = x

    @pl.when(l == pl.num_programs(1) - 1)
    def _():
        o_ref[...] = x.reshape(TB, S, D)[:, :NQ, :]


# --------------------------- host-side preparation ---------------------------
def _prepare_inputs(multimodal_features, params, num_query_tokens):
    B = multimodal_features[0].shape[0]
    D = params["query_tokens"].shape[-1]
    qt = jnp.broadcast_to(params["query_tokens"], (B, num_query_tokens, D))
    return jnp.concatenate([qt] + list(multimodal_features), axis=1).astype(jnp.float32)


def _prepare_weights(params):
    # Pre-transpose matmul weights (store W^T), fold 1/sqrt(hd) into the Q slice of
    # wqkv/bqkv, cast matmul weights to bf16; keep biases / LayerNorm params in f32.
    bf16 = jnp.bfloat16
    f32 = jnp.float32
    D = params["wqkv"].shape[2]
    hd = D // NHEAD
    qkv_scale = jnp.concatenate([
        jnp.full((D,), 1.0 / float(np.sqrt(hd)), f32),
        jnp.ones((2 * D,), f32),
    ])
    wqkv_t = jnp.transpose(params["wqkv"], (0, 2, 1)).astype(f32) * qkv_scale
    bqkv = params["bqkv"].astype(f32) * qkv_scale
    return dict(
        wqkv_t=wqkv_t.astype(bf16),                                    # (L, D, 3D)
        bqkv=bqkv,                                                     # (L, 1, 3D)
        wo_t=jnp.transpose(params["wo"], (0, 2, 1)).astype(bf16),      # (L, D, D)
        bo=params["bo"].astype(f32),
        g1=params["g1"].astype(f32), be1=params["be1"].astype(f32),
        g2=params["g2"].astype(f32), be2=params["be2"].astype(f32),
        w1_t=jnp.transpose(params["w1"], (0, 2, 1)).astype(bf16),      # (L, D, 4D)
        b1f=params["b1f"].astype(f32),
        w2_t=jnp.transpose(params["w2"], (0, 2, 1)).astype(bf16),      # (L, 4D, D)
        b2f=params["b2f"].astype(f32),
    )


def _pick_batch_block(B, S):
    # Target ~512 rows per step (fills v6e/v7x MXU M, amortizes weight streaming),
    # but keep >= 2 parallel batch steps when B allows so both v7x cores get work.
    ROW_TARGET = 512
    TB = max(1, min(B, ROW_TARGET // max(S, 1)))
    if B >= 2:
        TB = min(TB, max(1, B // 2))
    while B % TB != 0:
        TB -= 1
    return TB


def _vmem_estimate_bytes(TB, S, D, NQ):
    bf16, f32 = 2, 4
    w_layer = (D * 3 * D + D * D + D * 4 * D + 4 * D * D) * bf16
    small = (3 * D + D + 4 * D + D + 4 * D) * f32
    io = (TB * S * D + TB * NQ * D) * f32
    scratch = TB * S * D * f32
    return 2 * (w_layer + small + io) + scratch      # double-buffered in/out + scratch


def qformer_fusion(multimodal_features, params, num_query_tokens):
    """Pallas-backed QFormerFusion.forward (eval mode)."""
    x = _prepare_inputs(multimodal_features, params, num_query_tokens)
    B, S, D = x.shape
    NQ = num_query_tokens
    w = _prepare_weights(params)

    TB = _pick_batch_block(B, S)
    nb = B // TB

    weight_order = ["wqkv_t", "bqkv", "wo_t", "bo", "g1", "be1", "g2", "be2",
                    "w1_t", "b1f", "w2_t", "b2f"]
    weights = [w[name] for name in weight_order]

    def layer_spec(arr):
        return pl.BlockSpec((1,) + arr.shape[1:], lambda b, l: (l, 0, 0))

    in_specs = [pl.BlockSpec((TB, S, D), lambda b, l: (b, 0, 0))]
    in_specs += [layer_spec(a) for a in weights]

    cp_kwargs = dict(dimension_semantics=("parallel", "arbitrary"))
    est = _vmem_estimate_bytes(TB, S, D, NQ)
    if est > 24 * 1024 * 1024:     # only override when realistic widths need it
        cp_kwargs["vmem_limit_bytes"] = min(int(est * 2), 100 * 1024 * 1024)

    out = pl.pallas_call(
        qformer_layer_kernel,
        out_shape=jax.ShapeDtypeStruct((B, NQ, D), jnp.float32),
        grid=(nb, NUM_LAYERS),                      # layer axis innermost (carried state)
        in_specs=in_specs,
        out_specs=pl.BlockSpec((TB, NQ, D), lambda b, l: (b, 0, 0)),
        scratch_shapes=[pltpu.VMEM((TB * S, D), jnp.float32)],   # activations (carried)
        compiler_params=pltpu.CompilerParams(**cp_kwargs),
    )(x, *weights)
    return out


# ------------------------ deterministic parameter init ------------------------
def init_params(key, feature_dim, num_query_tokens):
    D, FF, L = feature_dim, 4 * feature_dim, NUM_LAYERS
    ks = jax.random.split(key, 8)
    return {
        "query_tokens": 0.02 * jax.random.normal(ks[0], (1, num_query_tokens, D), jnp.float32),
        "wqkv": 0.05 * jax.random.normal(ks[1], (L, 3 * D, D), jnp.float32),
        "bqkv": 0.01 * jax.random.normal(ks[2], (L, 1, 3 * D), jnp.float32),
        "wo":   0.05 * jax.random.normal(ks[3], (L, D, D), jnp.float32),
        "bo":   0.01 * jax.random.normal(ks[4], (L, 1, D), jnp.float32),
        "g1":   jnp.ones((L, 1, D), jnp.float32),
        "be1":  jnp.zeros((L, 1, D), jnp.float32),
        "g2":   jnp.ones((L, 1, D), jnp.float32),
        "be2":  jnp.zeros((L, 1, D), jnp.float32),
        "w1":   0.05 * jax.random.normal(ks[5], (L, FF, D), jnp.float32),
        "b1f":  0.01 * jax.random.normal(ks[6], (L, 1, FF), jnp.float32),
        "w2":   0.05 * jax.random.normal(ks[7], (L, D, FF), jnp.float32),
        "b2f":  jnp.zeros((L, 1, D), jnp.float32),
    }


# ----------------------------- pure-JAX reference -----------------------------
# Mirrors the kernel's mixed precision (bf16 matmul operands with the softmax scale
# folded into the Q weights, f32 accumulation, f32 LayerNorm/softmax).
def ref_forward(multimodal_features, params, num_query_tokens):
    x = _prepare_inputs(multimodal_features, params, num_query_tokens)
    B, S, D = x.shape
    hd = D // NHEAD
    w = _prepare_weights(params)

    def mm(a, w_t):
        return jnp.dot(a.astype(jnp.bfloat16), w_t, preferred_element_type=jnp.float32)

    def ln(y, g, b):
        mu = jnp.mean(y, axis=-1, keepdims=True)
        var = jnp.mean((y - mu) ** 2, axis=-1, keepdims=True)
        return (y - mu) * jax.lax.rsqrt(var + LN_EPS) * g + b

    x2 = x.reshape(B * S, D)
    for l in range(NUM_LAYERS):
        qkv = mm(x2, w["wqkv_t"][l]) + w["bqkv"][l]
        q = qkv[:, :D].reshape(B, S, NHEAD, hd).transpose(0, 2, 1, 3)
        k = qkv[:, D:2 * D].reshape(B, S, NHEAD, hd).transpose(0, 2, 1, 3)
        v = qkv[:, 2 * D:].reshape(B, S, NHEAD, hd).transpose(0, 2, 1, 3)
        s = jnp.einsum('bhqd,bhkd->bhqk', q.astype(jnp.bfloat16), k.astype(jnp.bfloat16),
                       preferred_element_type=jnp.float32)   # scale already folded into Q
        p = jax.nn.softmax(s, axis=-1)
        o = jnp.einsum('bhqk,bhkd->bhqd', p.astype(jnp.bfloat16), v.astype(jnp.bfloat16),
                       preferred_element_type=jnp.float32)
        o = o.transpose(0, 2, 1, 3).reshape(B * S, D)
        o = mm(o, w["wo_t"][l]) + w["bo"][l]
        x2 = ln(x2 + o, w["g1"][l], w["be1"][l])
        h1 = jnp.maximum(mm(x2, w["w1_t"][l]) + w["b1f"][l], 0.0)
        ff = mm(h1, w["w2_t"][l]) + w["b2f"][l]
        x2 = ln(x2 + ff, w["g2"][l], w["be2"][l])
    return x2.reshape(B, S, D)[:, :num_query_tokens]


if __name__ == "__main__":
    B = 2
    D = 128            # feature_dim -> head_dim = 16; output last dim lane-dense
    NQ = 32            # num_query_tokens (module default), multiple of 8

    key = jax.random.PRNGKey(0)
    kp, k1, k2 = jax.random.split(key, 3)
    params = init_params(kp, D, NQ)

    # Two "modalities"; total sequence = 32 (queries) + 16 + 16 = 64.
    feats = [
        jax.random.normal(k1, (B, 16, D), jnp.float32),
        jax.random.normal(k2, (B, 16, D), jnp.float32),
    ]

    out = qformer_fusion(feats, params, NQ)
    out = jax.block_until_ready(out)
    assert out.shape == (B, NQ, D), out.shape

    ref = jax.block_until_ready(ref_forward(feats, params, NQ))
    np.testing.assert_allclose(np.asarray(out), np.asarray(ref), atol=5e-2, rtol=0)

    print("KERNEL_OK")
</pallas_src>

<mosaic_0001>
module attributes {stable_mosaic.version = 11 : i64} {
  func.func @qformer_layer_kernel(%arg0: i32, %arg1: i32, %arg2: memref<1x64x128xf32, #tpu.memory_space<vmem>>, %arg3: memref<1x128x384xbf16, #tpu.memory_space<vmem>>, %arg4: memref<1x1x384xf32, #tpu.memory_space<vmem>>, %arg5: memref<1x128x128xbf16, #tpu.memory_space<vmem>>, %arg6: memref<1x1x128xf32, #tpu.memory_space<vmem>>, %arg7: memref<1x1x128xf32, #tpu.memory_space<vmem>>, %arg8: memref<1x1x128xf32, #tpu.memory_space<vmem>>, %arg9: memref<1x1x128xf32, #tpu.memory_space<vmem>>, %arg10: memref<1x1x128xf32, #tpu.memory_space<vmem>>, %arg11: memref<1x128x512xbf16, #tpu.memory_space<vmem>>, %arg12: memref<1x1x512xf32, #tpu.memory_space<vmem>>, %arg13: memref<1x512x128xbf16, #tpu.memory_space<vmem>>, %arg14: memref<1x1x128xf32, #tpu.memory_space<vmem>>, %arg15: memref<1x32x128xf32, #tpu.memory_space<vmem>>, %arg16: memref<64x128xf32, #tpu.memory_space<vmem>>) attributes {dimension_semantics = [#tpu.dimension_semantics<parallel>, #tpu.dimension_semantics<arbitrary>], iteration_bounds = array<i64: 2, 6>, scalar_prefetch = 0 : i64, scratch_operands = 1 : i64, tpu.core_type = #tpu.core_type<tc>, window_params = [{transform_indices = @transform_0, window_bounds = array<i64: 1, 64, 128>}, {transform_indices = @transform_1, window_bounds = array<i64: 1, 128, 384>}, {transform_indices = @transform_2, window_bounds = array<i64: 1, 1, 384>}, {transform_indices = @transform_3, window_bounds = array<i64: 1, 128, 128>}, {transform_indices = @transform_4, window_bounds = array<i64: 1, 1, 128>}, {transform_indices = @transform_5, window_bounds = array<i64: 1, 1, 128>}, {transform_indices = @transform_6, window_bounds = array<i64: 1, 1, 128>}, {transform_indices = @transform_7, window_bounds = array<i64: 1, 1, 128>}, {transform_indices = @transform_8, window_bounds = array<i64: 1, 1, 128>}, {transform_indices = @transform_9, window_bounds = array<i64: 1, 128, 512>}, {transform_indices = @transform_10, window_bounds = array<i64: 1, 1, 512>}, {transform_indices = @transform_11, window_bounds = array<i64: 1, 512, 128>}, {transform_indices = @transform_12, window_bounds = array<i64: 1, 1, 128>}, {transform_indices = @transform_13, window_bounds = array<i64: 1, 32, 128>}]} {
    %c0_i32 = arith.constant 0 : i32
    %0 = arith.cmpi eq, %arg1, %c0_i32 : i32
    %1 = arith.extui %0 : i1 to i32
    %c0_i32_0 = arith.constant 0 : i32
    %2 = arith.cmpi ne, %1, %c0_i32_0 : i32
    scf.if %2 {
      %c0_59 = arith.constant 0 : index
      %c0_60 = arith.constant 0 : index
      %c0_61 = arith.constant 0 : index
      %205 = vector.load %arg2[%c0_59, %c0_60, %c0_61] : memref<1x64x128xf32, #tpu.memory_space<vmem>>, vector<1x64x128xf32>
      %206 = vector.shape_cast %205 : vector<1x64x128xf32> to vector<64x128xf32>
      %c0_62 = arith.constant 0 : index
      %c0_63 = arith.constant 0 : index
      %207 = vector.load %arg16[%c0_62, %c0_63] : memref<64x128xf32, #tpu.memory_space<vmem>>, vector<64x128xf32>
      tpu.vector_store %arg16[%c0_62, %c0_63], %206 {strides = array<i32>} : memref<64x128xf32, #tpu.memory_space<vmem>>, vector<64x128xf32>,
    } else {
    }
    %c0 = arith.constant 0 : index
    %c0_1 = arith.constant 0 : index
    %3 = vector.load %arg16[%c0, %c0_1] : memref<64x128xf32, #tpu.memory_space<vmem>>, vector<64x128xf32>
    %c0_2 = arith.constant 0 : index
    %c0_3 = arith.constant 0 : index
    %c0_4 = arith.constant 0 : index
    %4 = vector.load %arg3[%c0_2, %c0_3, %c0_4] : memref<1x128x384xbf16, #tpu.memory_space<vmem>>, vector<1x128x384xbf16>
    %5 = vector.shape_cast %4 : vector<1x128x384xbf16> to vector<128x384xbf16>
    %6 = arith.truncf %3 : vector<64x128xf32> to vector<64x128xbf16>
    %cst = arith.constant dense<0.000000e+00> : vector<64x384xf32>
    %7 = tpu.matmul %6, %5, %cst {dimension_numbers = #tpu.dot_dimension_numbers<[1], [0], [0], [1], [0, 0, 1, 1], [], []>} : vector<64x128xbf16>, vector<128x384xbf16>, vector<64x384xf32> -> vector<64x384xf32>
    %c0_5 = arith.constant 0 : index
    %c0_6 = arith.constant 0 : index
    %c0_7 = arith.constant 0 : index
    %8 = vector.load %arg4[%c0_5, %c0_6, %c0_7] : memref<1x1x384xf32, #tpu.memory_space<vmem>>, vector<1x1x384xf32>
    %9 = vector.shape_cast %8 : vector<1x1x384xf32> to vector<1x384xf32>
    %10 = vector.broadcast %9 : vector<1x384xf32> to vector<64x384xf32>
    %11 = arith.addf %7, %10 : vector<64x384xf32>
    %12 = arith.truncf %11 : vector<64x384xf32> to vector<64x384xbf16>
    %13 = vector.extract_strided_slice %12 {offsets = [0, 0], sizes = [64, 16], strides = [1, 1]} : vector<64x384xbf16> to vector<64x16xbf16>
    %14 = vector.shape_cast %13 : vector<64x16xbf16> to vector<1x64x16xbf16>
    %15 = vector.extract_strided_slice %12 {offsets = [0, 128], sizes = [64, 16], strides = [1, 1]} : vector<64x384xbf16> to vector<64x16xbf16>
    %16 = vector.shape_cast %15 : vector<64x16xbf16> to vector<1x64x16xbf16>
    %17 = vector.extract_strided_slice %12 {offsets = [0, 256], sizes = [64, 16], strides = [1, 1]} : vector<64x384xbf16> to vector<64x16xbf16>
    %18 = vector.shape_cast %17 : vector<64x16xbf16> to vector<1x64x16xbf16>
    %19 = vector.extract_strided_slice %12 {offsets = [0, 16], sizes = [64, 16], strides = [1, 1]} : vector<64x384xbf16> to vector<64x16xbf16>
    %20 = vector.shape_cast %19 : vector<64x16xbf16> to vector<1x64x16xbf16>
    %21 = vector.extract_strided_slice %12 {offsets = [0, 144], sizes = [64, 16], strides = [1, 1]} : vector<64x384xbf16> to vector<64x16xbf16>
    %22 = vector.shape_cast %21 : vector<64x16xbf16> to vector<1x64x16xbf16>
    %23 = vector.extract_strided_slice %12 {offsets = [0, 272], sizes = [64, 16], strides = [1, 1]} : vector<64x384xbf16> to vector<64x16xbf16>
    %24 = vector.shape_cast %23 : vector<64x16xbf16> to vector<1x64x16xbf16>
    %25 = vector.extract_strided_slice %12 {offsets = [0, 32], sizes = [64, 16], strides = [1, 1]} : vector<64x384xbf16> to vector<64x16xbf16>
    %26 = vector.shape_cast %25 : vector<64x16xbf16> to vector<1x64x16xbf16>
    %27 = vector.extract_strided_slice %12 {offsets = [0, 160], sizes = [64, 16], strides = [1, 1]} : vector<64x384xbf16> to vector<64x16xbf16>
    %28 = vector.shape_cast %27 : vector<64x16xbf16> to vector<1x64x16xbf16>
    %29 = vector.extract_strided_slice %12 {offsets = [0, 288], sizes = [64, 16], strides = [1, 1]} : vector<64x384xbf16> to vector<64x16xbf16>
    %30 = vector.shape_cast %29 : vector<64x16xbf16> to vector<1x64x16xbf16>
    %31 = vector.extract_strided_slice %12 {offsets = [0, 48], sizes = [64, 16], strides = [1, 1]} : vector<64x384xbf16> to vector<64x16xbf16>
    %32 = vector.shape_cast %31 : vector<64x16xbf16> to vector<1x64x16xbf16>
    %33 = vector.extract_strided_slice %12 {offsets = [0, 176], sizes = [64, 16], strides = [1, 1]} : vector<64x384xbf16> to vector<64x16xbf16>
    %34 = vector.shape_cast %33 : vector<64x16xbf16> to vector<1x64x16xbf16>
    %35 = vector.extract_strided_slice %12 {offsets = [0, 304], sizes = [64, 16], strides = [1, 1]} : vector<64x384xbf16> to vector<64x16xbf16>
    %36 = vector.shape_cast %35 : vector<64x16xbf16> to vector<1x64x16xbf16>
    %37 = vector.extract_strided_slice %12 {offsets = [0, 64], sizes = [64, 16], strides = [1, 1]} : vector<64x384xbf16> to vector<64x16xbf16>
    %38 = vector.shape_cast %37 : vector<64x16xbf16> to vector<1x64x16xbf16>
    %39 = vector.extract_strided_slice %12 {offsets = [0, 192], sizes = [64, 16], strides = [1, 1]} : vector<64x384xbf16> to vector<64x16xbf16>
    %40 = vector.shape_cast %39 : vector<64x16xbf16> to vector<1x64x16xbf16>
    %41 = vector.extract_strided_slice %12 {offsets = [0, 320], sizes = [64, 16], strides = [1, 1]} : vector<64x384xbf16> to vector<64x16xbf16>
    %42 = vector.shape_cast %41 : vector<64x16xbf16> to vector<1x64x16xbf16>
    %43 = vector.extract_strided_slice %12 {offsets = [0, 80], sizes = [64, 16], strides = [1, 1]} : vector<64x384xbf16> to vector<64x16xbf16>
    %44 = vector.shape_cast %43 : vector<64x16xbf16> to vector<1x64x16xbf16>
    %45 = vector.extract_strided_slice %12 {offsets = [0, 208], sizes = [64, 16], strides = [1, 1]} : vector<64x384xbf16> to vector<64x16xbf16>
    %46 = vector.shape_cast %45 : vector<64x16xbf16> to vector<1x64x16xbf16>
    %47 = vector.extract_strided_slice %12 {offsets = [0, 336], sizes = [64, 16], strides = [1, 1]} : vector<64x384xbf16> to vector<64x16xbf16>
    %48 = vector.shape_cast %47 : vector<64x16xbf16> to vector<1x64x16xbf16>
    %49 = vector.extract_strided_slice %12 {offsets = [0, 96], sizes = [64, 16], strides = [1, 1]} : vector<64x384xbf16> to vector<64x16xbf16>
    %50 = vector.shape_cast %49 : vector<64x16xbf16> to vector<1x64x16xbf16>
    %51 = vector.extract_strided_slice %12 {offsets = [0, 224], sizes = [64, 16], strides = [1, 1]} : vector<64x384xbf16> to vector<64x16xbf16>
    %52 = vector.shape_cast %51 : vector<64x16xbf16> to vector<1x64x16xbf16>
    %53 = vector.extract_strided_slice %12 {offsets = [0, 352], sizes = [64, 16], strides = [1, 1]} : vector<64x384xbf16> to vector<64x16xbf16>
    %54 = vector.shape_cast %53 : vector<64x16xbf16> to vector<1x64x16xbf16>
    %55 = vector.extract_strided_slice %12 {offsets = [0, 112], sizes = [64, 16], strides = [1, 1]} : vector<64x384xbf16> to vector<64x16xbf16>
    %56 = vector.shape_cast %55 : vector<64x16xbf16> to vector<1x64x16xbf16>
    %57 = vector.extract_strided_slice %12 {offsets = [0, 240], sizes = [64, 16], strides = [1, 1]} : vector<64x384xbf16> to vector<64x16xbf16>
    %58 = vector.shape_cast %57 : vector<64x16xbf16> to vector<1x64x16xbf16>
    %59 = vector.extract_strided_slice %12 {offsets = [0, 368], sizes = [64, 16], strides = [1, 1]} : vector<64x384xbf16> to vector<64x16xbf16>
    %60 = vector.shape_cast %59 : vector<64x16xbf16> to vector<1x64x16xbf16>
    %61 = vector.shape_cast %14 : vector<1x64x16xbf16> to vector<1x1x64x16xbf16>
    %62 = vector.shape_cast %20 : vector<1x64x16xbf16> to vector<1x1x64x16xbf16>
    %63 = vector.shape_cast %26 : vector<1x64x16xbf16> to vector<1x1x64x16xbf16>
    %64 = vector.shape_cast %32 : vector<1x64x16xbf16> to vector<1x1x64x16xbf16>
    %65 = vector.shape_cast %38 : vector<1x64x16xbf16> to vector<1x1x64x16xbf16>
    %66 = vector.shape_cast %44 : vector<1x64x16xbf16> to vector<1x1x64x16xbf16>
    %67 = vector.shape_cast %50 : vector<1x64x16xbf16> to vector<1x1x64x16xbf16>
    %68 = vector.shape_cast %56 : vector<1x64x16xbf16> to vector<1x1x64x16xbf16>
    %69 = tpu.concatenate %61, %62, %63, %64, %65, %66, %67, %68 in 0 : vector<1x1x64x16xbf16>, vector<1x1x64x16xbf16>, vector<1x1x64x16xbf16>, vector<1x1x64x16xbf16>, vector<1x1x64x16xbf16>, vector<1x1x64x16xbf16>, vector<1x1x64x16xbf16>, vector<1x1x64x16xbf16> -> vector<8x1x64x16xbf16>
    %70 = vector.shape_cast %69 : vector<8x1x64x16xbf16> to vector<8x64x16xbf16>
    %71 = vector.shape_cast %16 : vector<1x64x16xbf16> to vector<1x1x64x16xbf16>
    %72 = vector.shape_cast %22 : vector<1x64x16xbf16> to vector<1x1x64x16xbf16>
    %73 = vector.shape_cast %28 : vector<1x64x16xbf16> to vector<1x1x64x16xbf16>
    %74 = vector.shape_cast %34 : vector<1x64x16xbf16> to vector<1x1x64x16xbf16>
    %75 = vector.shape_cast %40 : vector<1x64x16xbf16> to vector<1x1x64x16xbf16>
    %76 = vector.shape_cast %46 : vector<1x64x16xbf16> to vector<1x1x64x16xbf16>
    %77 = vector.shape_cast %52 : vector<1x64x16xbf16> to vector<1x1x64x16xbf16>
    %78 = vector.shape_cast %58 : vector<1x64x16xbf16> to vector<1x1x64x16xbf16>
    %79 = tpu.concatenate %71, %72, %73, %74, %75, %76, %77, %78 in 0 : vector<1x1x64x16xbf16>, vector<1x1x64x16xbf16>, vector<1x1x64x16xbf16>, vector<1x1x64x16xbf16>, vector<1x1x64x16xbf16>, vector<1x1x64x16xbf16>, vector<1x1x64x16xbf16>, vector<1x1x64x16xbf16> -> vector<8x1x64x16xbf16>
    %80 = vector.shape_cast %79 : vector<8x1x64x16xbf16> to vector<8x64x16xbf16>
    %81 = vector.shape_cast %18 : vector<1x64x16xbf16> to vector<1x1x64x16xbf16>
    %82 = vector.shape_cast %24 : vector<1x64x16xbf16> to vector<1x1x64x16xbf16>
    %83 = vector.shape_cast %30 : vector<1x64x16xbf16> to vector<1x1x64x16xbf16>
    %84 = vector.shape_cast %36 : vector<1x64x16xbf16> to vector<1x1x64x16xbf16>
    %85 = vector.shape_cast %42 : vector<1x64x16xbf16> to vector<1x1x64x16xbf16>
    %86 = vector.shape_cast %48 : vector<1x64x16xbf16> to vector<1x1x64x16xbf16>
    %87 = vector.shape_cast %54 : vector<1x64x16xbf16> to vector<1x1x64x16xbf16>
    %88 = vector.shape_cast %60 : vector<1x64x16xbf16> to vector<1x1x64x16xbf16>
    %89 = tpu.concatenate %81, %82, %83, %84, %85, %86, %87, %88 in 0 : vector<1x1x64x16xbf16>, vector<1x1x64x16xbf16>, vector<1x1x64x16xbf16>, vector<1x1x64x16xbf16>, vector<1x1x64x16xbf16>, vector<1x1x64x16xbf16>, vector<1x1x64x16xbf16>, vector<1x1x64x16xbf16> -> vector<8x1x64x16xbf16>
    %90 = vector.shape_cast %89 : vector<8x1x64x16xbf16> to vector<8x64x16xbf16>
    "tpu.trace_start"() <{level = 10 : i32, message = "bqd,bkd->bqk"}> : () -> ()
    %cst_8 = arith.constant dense<0.000000e+00> : vector<8x64x64xf32>
    %91 = tpu.matmul %70, %80, %cst_8 {dimension_numbers = #tpu.dot_dimension_numbers<[2], [2], [1], [1], [0, 0, 0, 1, 1, 1], [0], [0]>} : vector<8x64x16xbf16>, vector<8x64x16xbf16>, vector<8x64x64xf32> -> vector<8x64x64xf32>
    "tpu.trace_stop"() : () -> ()
    %cst_9 = arith.constant dense<0xFF800000> : vector<8x64xf32>
    %92 = vector.multi_reduction <maximumf>, %91, %cst_9 [2] : vector<8x64x64xf32> to vector<8x64xf32>
    %93 = vector.shape_cast %92 : vector<8x64xf32> to vector<8x64x1xf32>
    %94 = vector.broadcast %93 : vector<8x64x1xf32> to vector<8x64x64xf32>
    %95 = arith.subf %91, %94 : vector<8x64x64xf32>
    %96 = math.exp %95 : vector<8x64x64xf32>
    %cst_10 = arith.constant dense<0.000000e+00> : vector<8x64xf32>
    %97 = vector.multi_reduction <add>, %96, %cst_10 [2] : vector<8x64x64xf32> to vector<8x64xf32>
    %98 = vector.shape_cast %97 : vector<8x64xf32> to vector<8x64x1xf32>
    %99 = tpu.reciprocal %98 {approx = true} : vector<8x64x1xf32> -> vector<8x64x1xf32>
    %100 = vector.broadcast %99 : vector<8x64x1xf32> to vector<8x64x64xf32>
    %101 = arith.mulf %96, %100 : vector<8x64x64xf32>
    %102 = arith.truncf %101 : vector<8x64x64xf32> to vector<8x64x64xbf16>
    "tpu.trace_start"() <{level = 10 : i32, message = "bqk,bkd->bqd"}> : () -> ()
    %cst_11 = arith.constant dense<0.000000e+00> : vector<8x64x16xf32>
    %103 = tpu.matmul %102, %90, %cst_11 {dimension_numbers = #tpu.dot_dimension_numbers<[2], [1], [1], [2], [0, 0, 0, 1, 1, 2], [0], [0]>} : vector<8x64x64xbf16>, vector<8x64x16xbf16>, vector<8x64x16xf32> -> vector<8x64x16xf32>
    "tpu.trace_stop"() : () -> ()
    %104 = arith.truncf %103 : vector<8x64x16xf32> to vector<8x64x16xbf16>
    %105 = vector.extract_strided_slice %104 {offsets = [0, 0, 0], sizes = [1, 64, 16], strides = [1, 1, 1]} : vector<8x64x16xbf16> to vector<1x64x16xbf16>
    %106 = vector.shape_cast %105 : vector<1x64x16xbf16> to vector<64x16xbf16>
    %107 = vector.extract_strided_slice %104 {offsets = [1, 0, 0], sizes = [1, 64, 16], strides = [1, 1, 1]} : vector<8x64x16xbf16> to vector<1x64x16xbf16>
    %108 = vector.shape_cast %107 : vector<1x64x16xbf16> to vector<64x16xbf16>
    %109 = vector.extract_strided_slice %104 {offsets = [2, 0, 0], sizes = [1, 64, 16], strides = [1, 1, 1]} : vector<8x64x16xbf16> to vector<1x64x16xbf16>
    %110 = vector.shape_cast %109 : vector<1x64x16xbf16> to vector<64x16xbf16>
    %111 = vector.extract_strided_slice %104 {offsets = [3, 0, 0], sizes = [1, 64, 16], strides = [1, 1, 1]} : vector<8x64x16xbf16> to vector<1x64x16xbf16>
    %112 = vector.shape_cast %111 : vector<1x64x16xbf16> to vector<64x16xbf16>
    %113 = vector.extract_strided_slice %104 {offsets = [4, 0, 0], sizes = [1, 64, 16], strides = [1, 1, 1]} : vector<8x64x16xbf16> to vector<1x64x16xbf16>
    %114 = vector.shape_cast %113 : vector<1x64x16xbf16> to vector<64x16xbf16>
    %115 = vector.extract_strided_slice %104 {offsets = [5, 0, 0], sizes = [1, 64, 16], strides = [1, 1, 1]} : vector<8x64x16xbf16> to vector<1x64x16xbf16>
    %116 = vector.shape_cast %115 : vector<1x64x16xbf16> to vector<64x16xbf16>
    %117 = vector.extract_strided_slice %104 {offsets = [6, 0, 0], sizes = [1, 64, 16], strides = [1, 1, 1]} : vector<8x64x16xbf16> to vector<1x64x16xbf16>
    %118 = vector.shape_cast %117 : vector<1x64x16xbf16> to vector<64x16xbf16>
    %119 = vector.extract_strided_slice %104 {offsets = [7, 0, 0], sizes = [1, 64, 16], strides = [1, 1, 1]} : vector<8x64x16xbf16> to vector<1x64x16xbf16>
    %120 = vector.shape_cast %119 : vector<1x64x16xbf16> to vector<64x16xbf16>
    %121 = tpu.concatenate %106, %108, %110, %112, %114, %116, %118, %120 in 1 : vector<64x16xbf16>, vector<64x16xbf16>, vector<64x16xbf16>, vector<64x16xbf16>, vector<64x16xbf16>, vector<64x16xbf16>, vector<64x16xbf16>, vector<64x16xbf16> -> vector<64x128xbf16>
    %c0_12 = arith.constant 0 : index
    %c0_13 = arith.constant 0 : index
    %c0_14 = arith.constant 0 : index
    %122 = vector.load %arg5[%c0_12, %c0_13, %c0_14] : memref<1x128x128xbf16, #tpu.memory_space<vmem>>, vector<1x128x128xbf16>
    %123 = vector.shape_cast %122 : vector<1x128x128xbf16> to vector<128x128xbf16>
    %cst_15 = arith.constant dense<0.000000e+00> : vector<64x128xf32>
    %124 = tpu.matmul %121, %123, %cst_15 {dimension_numbers = #tpu.dot_dimension_numbers<[1], [0], [0], [1], [0, 0, 1, 1], [], []>} : vector<64x128xbf16>, vector<128x128xbf16>, vector<64x128xf32> -> vector<64x128xf32>
    %c0_16 = arith.constant 0 : index
    %c0_17 = arith.constant 0 : index
    %c0_18 = arith.constant 0 : index
    %125 = vector.load %arg6[%c0_16, %c0_17, %c0_18] : memref<1x1x128xf32, #tpu.memory_space<vmem>>, vector<1x1x128xf32>
    %126 = vector.shape_cast %125 : vector<1x1x128xf32> to vector<1x128xf32>
    %127 = vector.broadcast %126 : vector<1x128xf32> to vector<64x128xf32>
    %128 = arith.addf %124, %127 : vector<64x128xf32>
    %129 = arith.addf %3, %128 : vector<64x128xf32>
    %c0_19 = arith.constant 0 : index
    %c0_20 = arith.constant 0 : index
    %c0_21 = arith.constant 0 : index
    %130 = vector.load %arg7[%c0_19, %c0_20, %c0_21] : memref<1x1x128xf32, #tpu.memory_space<vmem>>, vector<1x1x128xf32>
    %131 = vector.shape_cast %130 : vector<1x1x128xf32> to vector<1x128xf32>
    %c0_22 = arith.constant 0 : index
    %c0_23 = arith.constant 0 : index
    %c0_24 = arith.constant 0 : index
    %132 = vector.load %arg8[%c0_22, %c0_23, %c0_24] : memref<1x1x128xf32, #tpu.memory_space<vmem>>, vector<1x1x128xf32>
    %133 = vector.shape_cast %132 : vector<1x1x128xf32> to vector<1x128xf32>
    %cst_25 = arith.constant dense<0.000000e+00> : vector<64xf32>
    %134 = vector.multi_reduction <add>, %129, %cst_25 [1] : vector<64x128xf32> to vector<64xf32>
    %135 = vector.shape_cast %134 : vector<64xf32> to vector<64x1xf32>
    %cst_26 = arith.constant 1.280000e+02 : f32
    %136 = vector.broadcast %cst_26 : f32 to vector<64x1xf32>
    %137 = arith.divf %135, %136 : vector<64x1xf32>
    %138 = vector.broadcast %137 : vector<64x1xf32> to vector<64x128xf32>
    %139 = arith.subf %129, %138 : vector<64x128xf32>
    %140 = arith.mulf %139, %139 : vector<64x128xf32>
    %cst_27 = arith.constant dense<0.000000e+00> : vector<64xf32>
    %141 = vector.multi_reduction <add>, %140, %cst_27 [1] : vector<64x128xf32> to vector<64xf32>
    %142 = vector.shape_cast %141 : vector<64xf32> to vector<64x1xf32>
    %cst_28 = arith.constant 1.280000e+02 : f32
    %143 = vector.broadcast %cst_28 : f32 to vector<64x1xf32>
    %144 = arith.divf %142, %143 : vector<64x1xf32>
    %145 = vector.broadcast %137 : vector<64x1xf32> to vector<64x128xf32>
    %146 = arith.subf %129, %145 : vector<64x128xf32>
    %cst_29 = arith.constant 9.99999974E-6 : f32
    %147 = vector.broadcast %cst_29 : f32 to vector<64x1xf32>
    %148 = arith.addf %144, %147 : vector<64x1xf32>
    %149 = math.rsqrt %148 : vector<64x1xf32>
    %150 = vector.broadcast %149 : vector<64x1xf32> to vector<64x128xf32>
    %151 = arith.mulf %146, %150 : vector<64x128xf32>
    %152 = vector.broadcast %131 : vector<1x128xf32> to vector<64x128xf32>
    %153 = arith.mulf %151, %152 : vector<64x128xf32>
    %154 = vector.broadcast %133 : vector<1x128xf32> to vector<64x128xf32>
    %155 = arith.addf %153, %154 : vector<64x128xf32>
    %c0_30 = arith.constant 0 : index
    %c0_31 = arith.constant 0 : index
    %c0_32 = arith.constant 0 : index
    %156 = vector.load %arg11[%c0_30, %c0_31, %c0_32] : memref<1x128x512xbf16, #tpu.memory_space<vmem>>, vector<1x128x512xbf16>
    %157 = vector.shape_cast %156 : vector<1x128x512xbf16> to vector<128x512xbf16>
    %158 = arith.truncf %155 : vector<64x128xf32> to vector<64x128xbf16>
    %cst_33 = arith.constant dense<0.000000e+00> : vector<64x512xf32>
    %159 = tpu.matmul %158, %157, %cst_33 {dimension_numbers = #tpu.dot_dimension_numbers<[1], [0], [0], [1], [0, 0, 1, 1], [], []>} : vector<64x128xbf16>, vector<128x512xbf16>, vector<64x512xf32> -> vector<64x512xf32>
    %c0_34 = arith.constant 0 : index
    %c0_35 = arith.constant 0 : index
    %c0_36 = arith.constant 0 : index
    %160 = vector.load %arg12[%c0_34, %c0_35, %c0_36] : memref<1x1x512xf32, #tpu.memory_space<vmem>>, vector<1x1x512xf32>
    %161 = vector.shape_cast %160 : vector<1x1x512xf32> to vector<1x512xf32>
    %162 = vector.broadcast %161 : vector<1x512xf32> to vector<64x512xf32>
    %163 = arith.addf %159, %162 : vector<64x512xf32>
    %cst_37 = arith.constant 0.000000e+00 : f32
    %164 = vector.broadcast %cst_37 : f32 to vector<64x512xf32>
    %165 = arith.maximumf %163, %164 : vector<64x512xf32>
    %166 = arith.truncf %165 : vector<64x512xf32> to vector<64x512xbf16>
    %c0_38 = arith.constant 0 : index
    %c0_39 = arith.constant 0 : index
    %c0_40 = arith.constant 0 : index
    %167 = vector.load %arg13[%c0_38, %c0_39, %c0_40] : memref<1x512x128xbf16, #tpu.memory_space<vmem>>, vector<1x512x128xbf16>
    %168 = vector.shape_cast %167 : vector<1x512x128xbf16> to vector<512x128xbf16>
    %cst_41 = arith.constant dense<0.000000e+00> : vector<64x128xf32>
    %169 = tpu.matmul %166, %168, %cst_41 {dimension_numbers = #tpu.dot_dimension_numbers<[1], [0], [0], [1], [0, 0, 1, 1], [], []>} : vector<64x512xbf16>, vector<512x128xbf16>, vector<64x128xf32> -> vector<64x128xf32>
    %c0_42 = arith.constant 0 : index
    %c0_43 = arith.constant 0 : index
    %c0_44 = arith.constant 0 : index
    %170 = vector.load %arg14[%c0_42, %c0_43, %c0_44] : memref<1x1x128xf32, #tpu.memory_space<vmem>>, vector<1x1x128xf32>
    %171 = vector.shape_cast %170 : vector<1x1x128xf32> to vector<1x128xf32>
    %172 = vector.broadcast %171 : vector<1x128xf32> to vector<64x128xf32>
    %173 = arith.addf %169, %172 : vector<64x128xf32>
    %174 = arith.addf %155, %173 : vector<64x128xf32>
    %c0_45 = arith.constant 0 : index
    %c0_46 = arith.constant 0 : index
    %c0_47 = arith.constant 0 : index
    %175 = vector.load %arg9[%c0_45, %c0_46, %c0_47] : memref<1x1x128xf32, #tpu.memory_space<vmem>>, vector<1x1x128xf32>
    %176 = vector.shape_cast %175 : vector<1x1x128xf32> to vector<1x128xf32>
    %c0_48 = arith.constant 0 : index
    %c0_49 = arith.constant 0 : index
    %c0_50 = arith.constant 0 : index
    %177 = vector.load %arg10[%c0_48, %c0_49, %c0_50] : memref<1x1x128xf32, #tpu.memory_space<vmem>>, vector<1x1x128xf32>
    %178 = vector.shape_cast %177 : vector<1x1x128xf32> to vector<1x128xf32>
    %cst_51 = arith.constant dense<0.000000e+00> : vector<64xf32>
    %179 = vector.multi_reduction <add>, %174, %cst_51 [1] : vector<64x128xf32> to vector<64xf32>
    %180 = vector.shape_cast %179 : vector<64xf32> to vector<64x1xf32>
    %cst_52 = arith.constant 1.280000e+02 : f32
    %181 = vector.broadcast %cst_52 : f32 to vector<64x1xf32>
    %182 = arith.divf %180, %181 : vector<64x1xf32>
    %183 = vector.broadcast %182 : vector<64x1xf32> to vector<64x128xf32>
    %184 = arith.subf %174, %183 : vector<64x128xf32>
    %185 = arith.mulf %184, %184 : vector<64x128xf32>
    %cst_53 = arith.constant dense<0.000000e+00> : vector<64xf32>
    %186 = vector.multi_reduction <add>, %185, %cst_53 [1] : vector<64x128xf32> to vector<64xf32>
    %187 = vector.shape_cast %186 : vector<64xf32> to vector<64x1xf32>
    %cst_54 = arith.constant 1.280000e+02 : f32
    %188 = vector.broadcast %cst_54 : f32 to vector<64x1xf32>
    %189 = arith.divf %187, %188 : vector<64x1xf32>
    %190 = vector.broadcast %182 : vector<64x1xf32> to vector<64x128xf32>
    %191 = arith.subf %174, %190 : vector<64x128xf32>
    %cst_55 = arith.constant 9.99999974E-6 : f32
    %192 = vector.broadcast %cst_55 : f32 to vector<64x1xf32>
    %193 = arith.addf %189, %192 : vector<64x1xf32>
    %194 = math.rsqrt %193 : vector<64x1xf32>
    %195 = vector.broadcast %194 : vector<64x1xf32> to vector<64x128xf32>
    %196 = arith.mulf %191, %195 : vector<64x128xf32>
    %197 = vector.broadcast %176 : vector<1x128xf32> to vector<64x128xf32>
    %198 = arith.mulf %196, %197 : vector<64x128xf32>
    %199 = vector.broadcast %178 : vector<1x128xf32> to vector<64x128xf32>
    %200 = arith.addf %198, %199 : vector<64x128xf32>
    %c0_56 = arith.constant 0 : index
    %c0_57 = arith.constant 0 : index
    %201 = vector.load %arg16[%c0_56, %c0_57] : memref<64x128xf32, #tpu.memory_space<vmem>>, vector<64x128xf32>
    tpu.vector_store %arg16[%c0_56, %c0_57], %200 {strides = array<i32>} : memref<64x128xf32, #tpu.memory_space<vmem>>, vector<64x128xf32>,
    %c5_i32 = arith.constant 5 : i32
    %202 = arith.cmpi eq, %arg1, %c5_i32 : i32
    %203 = arith.extui %202 : i1 to i32
    %c0_i32_58 = arith.constant 0 : i32
    %204 = arith.cmpi ne, %203, %c0_i32_58 : i32
    scf.if %204 {
      %205 = vector.shape_cast %200 : vector<64x128xf32> to vector<1x64x128xf32>
      %206 = vector.extract_strided_slice %205 {offsets = [0, 0, 0], sizes = [1, 32, 128], strides = [1, 1, 1]} : vector<1x64x128xf32> to vector<1x32x128xf32>
      %c0_59 = arith.constant 0 : index
      %c0_60 = arith.constant 0 : index
      %c0_61 = arith.constant 0 : index
      %207 = vector.load %arg15[%c0_59, %c0_60, %c0_61] : memref<1x32x128xf32, #tpu.memory_space<vmem>>, vector<1x32x128xf32>
      tpu.vector_store %arg15[%c0_59, %c0_60, %c0_61], %206 {strides = array<i32>} : memref<1x32x128xf32, #tpu.memory_space<vmem>>, vector<1x32x128xf32>,
    } else {
    }
    return
  }
  func.func @transform_0(%arg0: i32, %arg1: i32) -> (i32, i32, i32) {
    %c0_i32 = arith.constant 0 : i32
    %c0_i32_0 = arith.constant 0 : i32
    %c0_i32_1 = arith.constant 0 : i32
    return %arg0, %c0_i32, %c0_i32_0 : i32, i32, i32
  }
  func.func @transform_1(%arg0: i32, %arg1: i32) -> (i32, i32, i32) {
    %c0_i32 = arith.constant 0 : i32
    %c0_i32_0 = arith.constant 0 : i32
    %c0_i32_1 = arith.constant 0 : i32
    return %arg1, %c0_i32, %c0_i32_0 : i32, i32, i32
  }
  func.func @transform_2(%arg0: i32, %arg1: i32) -> (i32, i32, i32) {
    %c0_i32 = arith.constant 0 : i32
    %c0_i32_0 = arith.constant 0 : i32
    %c0_i32_1 = arith.constant 0 : i32
    return %arg1, %c0_i32, %c0_i32_0 : i32, i32, i32
  }
  func.func @transform_3(%arg0: i32, %arg1: i32) -> (i32, i32, i32) {
    %c0_i32 = arith.constant 0 : i32
    %c0_i32_0 = arith.constant 0 : i32
    %c0_i32_1 = arith.constant 0 : i32
    return %arg1, %c0_i32, %c0_i32_0 : i32, i32, i32
  }
  func.func @transform_4(%arg0: i32, %arg1: i32) -> (i32, i32, i32) {
    %c0_i32 = arith.constant 0 : i32
    %c0_i32_0 = arith.constant 0 : i32
    %c0_i32_1 = arith.constant 0 : i32
    return %arg1, %c0_i32, %c0_i32_0 : i32, i32, i32
  }
  func.func @transform_5(%arg0: i32, %arg1: i32) -> (i32, i32, i32) {
    %c0_i32 = arith.constant 0 : i32
    %c0_i32_0 = arith.constant 0 : i32
    %c0_i32_1 = arith.constant 0 : i32
    return %arg1, %c0_i32, %c0_i32_0 : i32, i32, i32
  }
  func.func @transform_6(%arg0: i32, %arg1: i32) -> (i32, i32, i32) {
    %c0_i32 = arith.constant 0 : i32
    %c0_i32_0 = arith.constant 0 : i32
    %c0_i32_1 = arith.constant 0 : i32
    return %arg1, %c0_i32, %c0_i32_0 : i32, i32, i32
  }
  func.func @transform_7(%arg0: i32, %arg1: i32) -> (i32, i32, i32) {
    %c0_i32 = arith.constant 0 : i32
    %c0_i32_0 = arith.constant 0 : i32
    %c0_i32_1 = arith.constant 0 : i32
    return %arg1, %c0_i32, %c0_i32_0 : i32, i32, i32
  }
  func.func @transform_8(%arg0: i32, %arg1: i32) -> (i32, i32, i32) {
    %c0_i32 = arith.constant 0 : i32
    %c0_i32_0 = arith.constant 0 : i32
    %c0_i32_1 = arith.constant 0 : i32
    return %arg1, %c0_i32, %c0_i32_0 : i32, i32, i32
  }
  func.func @transform_9(%arg0: i32, %arg1: i32) -> (i32, i32, i32) {
    %c0_i32 = arith.constant 0 : i32
    %c0_i32_0 = arith.constant 0 : i32
    %c0_i32_1 = arith.constant 0 : i32
    return %arg1, %c0_i32, %c0_i32_0 : i32, i32, i32
  }
  func.func @transform_10(%arg0: i32, %arg1: i32) -> (i32, i32, i32) {
    %c0_i32 = arith.constant 0 : i32
    %c0_i32_0 = arith.constant 0 : i32
    %c0_i32_1 = arith.constant 0 : i32
    return %arg1, %c0_i32, %c0_i32_0 : i32, i32, i32
  }
  func.func @transform_11(%arg0: i32, %arg1: i32) -> (i32, i32, i32) {
    %c0_i32 = arith.constant 0 : i32
    %c0_i32_0 = arith.constant 0 : i32
    %c0_i32_1 = arith.constant 0 : i32
    return %arg1, %c0_i32, %c0_i32_0 : i32, i32, i32
  }
  func.func @transform_12(%arg0: i32, %arg1: i32) -> (i32, i32, i32) {
    %c0_i32 = arith.constant 0 : i32
    %c0_i32_0 = arith.constant 0 : i32
    %c0_i32_1 = arith.constant 0 : i32
    return %arg1, %c0_i32, %c0_i32_0 : i32, i32, i32
  }
  func.func @transform_13(%arg0: i32, %arg1: i32) -> (i32, i32, i32) {
    %c0_i32 = arith.constant 0 : i32
    %c0_i32_0 = arith.constant 0 : i32
    %c0_i32_1 = arith.constant 0 : i32
    return %arg0, %c0_i32, %c0_i32_0 : i32, i32, i32
  }
}

</mosaic_0001>

<bundles_post_ra>
// kernel: tpu_custom_call.1
= control target key start
LH: loop header
LB: loop body
LE: loop exit
PB: predicated region body
PF: predicated region fallthrough
CT: control target
= control target key end

     0   :  { %s9048_s0 = inlined_call_operand.hbm [shape: f32[2,64,128], index: 0, kind: input, shape index: {}]   ;;  %s9049_s1 = inlined_call_operand.hbm [shape: bf16[6,128,384], index: 1, kind: input, shape index: {}]   ;;  %s9050_s2 = inlined_call_operand.hbm [shape: f32[6,1,384], index: 2, kind: input, shape index: {}]   ;;  %s9051_s3 = inlined_call_operand.hbm [shape: bf16[6,128,128], index: 3, kind: input, shape index: {}]   ;;  %s9052_s4 = inlined_call_operand.vmem [shape: f32[6,1,128], index: 4, kind: input, shape index: {}]   ;;  %s9053_s5 = inlined_call_operand.hbm [shape: f32[6,1,128], index: 5, kind: input, shape index: {}]   ;;  %s9054_s6 = inlined_call_operand.hbm [shape: f32[6,1,128], index: 6, kind: input, shape index: {}]   ;;  %s9055_s7 = inlined_call_operand.vmem [shape: f32[6,1,128], index: 7, kind: input, shape index: {}]   ;;  %s9056_s8 = inlined_call_operand.hbm [shape: f32[6,1,128], index: 8, kind: input, shape index: {}]   ;;  %s9057_s9 = inlined_call_operand.hbm [shape: bf16[6,128,512], index: 9, kind: input, shape index: {}]   ;;  %s9058_s10 = inlined_call_operand.hbm [shape: f32[6,1,512], index: 10, kind: input, shape index: {}]   ;;  %s9059_s11 = inlined_call_operand.hbm [shape: bf16[6,512,128], index: 11, kind: input, shape index: {}]   ;;  %s9060_s12 = inlined_call_operand.vmem [shape: f32[6,1,128], index: 12, kind: input, shape index: {}]   ;;  %s9061_s13 = inlined_call_operand.hbm [shape: f32[2,32,128], index: 13, kind: output, shape index: {}]  }
   0x1   :  { %9150 = sst [smem:[#allocation85_spill]] %s9048_s0 }
   0x2   :  { %9151 = sst [smem:[#allocation86_spill]] %s9049_s1 }
   0x3   :  { %9152 = sst [smem:[#allocation87_spill]] %s9050_s2 }
   0x4   :  { %9153 = sst [smem:[#allocation88_spill]] %s9051_s3 }
   0x5   :  { %9154 = sst [smem:[#allocation89_spill]] %s9052_s4 }
   0x6   :  { %9155 = sst [smem:[#allocation90_spill]] %s9053_s5 }
   0x7   :  { %9156 = sst [smem:[#allocation91_spill]] %s9054_s6 }
   0x8   :  { %9157 = sst [smem:[#allocation92_spill]] %s9055_s7 }
   0x9   :  { %9158 = sst [smem:[#allocation93_spill]] %s9056_s8 }
   0xa   :  { %9159 = sst [smem:[#allocation94_spill]] %s9057_s9 }
   0xb   :  { %9160 = sst [smem:[#allocation95_spill]] %s9058_s10 }
   0xc   :  { %9161 = sst [smem:[#allocation96_spill]] %s9059_s11 }
   0xd   :  { %9162 = sst [smem:[#allocation97_spill]] %s9060_s12 }
   0xe   :  { %9163 = sst [smem:[#allocation98_spill]] %s9061_s13 }
   0xf   :  { %18 = vsyncpa [#allocation4], 0 }
  0x10   :  { %20 = vsyncpa [#allocation4 + $0x1], 0 }
  0x11   :  { %21 = vsyncpa [#allocation7], 0 }
  0x12   :  { %23 = vsyncpa [#allocation7 + $0x1], 0 }
  0x13   :  { %24 = vsyncpa [#allocation10], 0 }
  0x14   :  { %26 = vsyncpa [#allocation10 + $0x1], 0 }
  0x15   :  { %27 = vsyncpa [#allocation13], 0 }
  0x16   :  { %29 = vsyncpa [#allocation13 + $0x1], 0 }
  0x17   :  { %30 = vsyncpa [#allocation16], 0 }
  0x18   :  { %32 = vsyncpa [#allocation16 + $0x1], 0 }
  0x19   :  { %33 = vsyncpa [#allocation19], 0 }
  0x1a   :  { %35 = vsyncpa [#allocation19 + $0x1], 0 }
  0x1b   :  { %36 = vsyncpa [#allocation5], 0 }
  0x1c   :  { %38 = vsyncpa [#allocation5 + $0x1], 0  ;;  %s7065_s25 = smov 0   ;;  %s7067_s26 = smov 0  }
  0x1d   :  { %s7069_s27 = smov 0   ;;  %s7071_s28 = smov 0  }
  0x1e   :  { %s7073_s29 = smov 0   ;;  %s7075_s30 = smov 0  }
  0x1f   :  { %s7077_s14 = smov 0   ;;  %s7079_s15 = smov 0  }
  0x20   :  { %s7081_s16 = smov 0   ;;  %s7083_s17 = smov 0  }
  0x21   :  { %s7085_s18 = smov 0  }
  0x22 LB: > { %9164 = sst [smem:[#allocation28_spill]] %s6928_s26  ;;  %p71_p0 = scmp.eq.s32.totalorder %s6964_s18, 0  ;;  %s6964_s18 = sphi %s7085_s18, %s44_s18   ;;  %s6960_s17 = sphi %s7083_s17, %s9343_s17   ;;  %s6956_s16 = sphi %s7081_s16, %s9347_s16   ;;  %s6952_s15 = sphi %s7079_s15, %s9341_s15   ;;  %s6948_s14 = sphi %s7077_s14, %s9346_s14   ;;  %s6944_s30 = sphi %s7075_s30, %s9340_s30   ;;  %s6940_s29 = sphi %s7073_s29, %s9345_s29   ;;  %s6936_s28 = sphi %s7071_s28, %s9344_s28   ;;  %s6932_s27 = sphi %s7069_s27, %s9338_s27   ;;  %s6928_s26 = sphi %s7067_s26, %s9337_s26   ;;  %s6924_s25 = sphi %s7065_s25, %s9336_s25  }
  0x23   : > { %9165 = sst [smem:[#allocation29_spill]] %s6932_s27  ;;  %p96_p1 = scmp.ne.s32.totalorder %s6932_s27, %s6928_s26 }
  0x24   : > { %9166 = sst [smem:[#allocation30_spill]] %s6936_s28  ;;  %p9073_p2 = scmp.lt.s32.totalorder %s6964_s18, 12 }
  0x25   : > { %9167 = sst [smem:[#allocation31_spill]] %s6944_s30  ;;  %p98_p3 = por %p96_p1, %p71_p0 }
  0x26   : > { %9168 = sst [smem:[#allocation32_spill]] %s6948_s14  ;;  %s7127_s19 = sand.u32 1, %s6964_s18  }
  0x27   : > { %9169 = sst [smem:[#allocation33_spill]] %s6952_s15  ;;  %s7130_s20 = sand.u32 1, %s6932_s27  }
  0x28   : > { %9170 = sst [smem:[#allocation34_spill]] %s6960_s17  ;;  %s5957_s21 = smul.u32 192, %s7130_s20 }
  0x29   : > { %9171 = sst [smem:[#allocation35_spill]] %s6964_s18  ;;  %p7135_p4 = pnand %p9073_p2, %p98_p3 }
  0x2a   : > { %s5958_s23 = smul.u32 3072, %s6956_s16  ;;  %s9173_s1 = sld [smem:[#allocation86_spill]] }
  0x2b   : > { %s463_s12 = scalar_lea.vmem [#allocation6], %s5957_s21  ;;  %s9066_s4 = scalar_lea.sflag [#allocation7], %s7127_s19 }
  0x2c   : > { %s470_s7 = sshll.u32 %s463_s12, 4  ;;  %p7146_p5 = pneg %p7135_p4  ;;  %s471_s7 = int_to_ptr.vmem [resolvable:$true] %s470_s7 }
  0x2d   : > { %s6557_s11 = scalar_lea.vmem %s471_s7, 3072  ;;  %s6966_s10 = smov [#allocation6]  }
  0x2e   : > { %p6558_p6 = scmp.ne.s32.totalorder %s471_s7, %s6557_s11  ;;  %s6562_s8 = sshll.u32 %s6966_s10, 4  ;;  %s6563_s8 = int_to_ptr.vmem [resolvable:$false] %s6562_s8 }
  0x2f   : > { %s6564_s13 = scalar_lea.vmem %s6563_s8, 6144  ;;  %p6565_p9 = scmp.lt.s32.totalorder %s471_s7, %s6563_s8 }
  0x30   : > { %s469_s15 = scalar_lea.hbm %s9173_s1, %s5958_s23  ;;  %p6560_p7 = pnand %p6558_p6, %p7146_p5 }
  0x31   : > { %p6566_p10 = scmp.lt.s32.totalorder %s6564_s13, %s6557_s11 }
  0x32   : > { %p6561_p8 = pneg %p6560_p7 }
  0x33   : > { %p6567_p11 = por %p6566_p10, %p6565_p9 }
  0x35   : > { %p6568_p12 = pnand %p6567_p11, %p6561_p8 }
  0x37   : > { %6571 = shalt.err (!%p6568_p12)
}
  0x38   : > { %s6967_s12 = smov 192   ;;  %s6968_s21 = smov 12  }
  0x39   : > { %5991 = dma.hbm_to_vmem [thread:$0]  (!%p7135_p4), %s469_s15, 3072, %s471_s7, %s9066_s4, %s6967_s12, %s6967_s12, %s6968_s21  }
  0x3a   : > { %p5203_p13 = scmp.ge.s32.totalorder %s6964_s18, 1  ;;  %p648_p1 = scmp.lt.s32.totalorder %s6964_s18, 13 }
  0x3b   : > { %s5188_s8 = sshll.u32 %s7130_s20, 6  ;;  %s5384_s11 = sshll.u32 %s6956_s16, 10 }
  0x3c   : > { %p7159_p3 = pnand %p5203_p13, %p648_p1  ;;  %s503_s23 = scalar_lea.vmem [#allocation9], %s5188_s8 }
  0x3d   : > { %s510_s24 = sshll.u32 %s503_s23, 4  ;;  %s9177_s3 = sld [smem:[#allocation88_spill]]  ;;  %s511_s24 = int_to_ptr.vmem [resolvable:$true] %s510_s24 }
  0x3e   : > { %s9175_s10 = scalar_select %p7159_p3, 1, 0 }
  0x3f   : > { %s9077_s2 = scalar_lea.sflag [#allocation10], %s7127_s19  ;;  %s6585_s0 = scalar_lea.vmem %s511_s24, 1024 }
  0x40   : > { %9176 = sst [smem:[#allocation36_spill]] %s9175_s10  ;;  %p6586_p6 = scmp.ne.s32.totalorder %s511_s24, %s6585_s0 }
  0x41   : > { %s6969_s7 = smov [#allocation9]  }
  0x42   : > { %p6588_p7 = pnand %p6586_p6, %p7146_p5  ;;  %s6590_s15 = sshll.u32 %s6969_s7, 4  ;;  %s6591_s15 = int_to_ptr.vmem [resolvable:$false] %s6590_s15 }
  0x43   : > { %s509_s5 = scalar_lea.hbm %s9177_s3, %s5384_s11  ;;  %s6592_s12 = scalar_lea.vmem %s6591_s15, 2048 }
  0x44   : > { %p6589_p8 = pneg %p6588_p7  ;;  %p6593_p9 = scmp.lt.s32.totalorder %s511_s24, %s6591_s15 }
  0x45   : > { %p6594_p10 = scmp.lt.s32.totalorder %s6592_s12, %s6585_s0 }
  0x47   : > { %p6595_p11 = por %p6594_p10, %p6593_p9 }
  0x49   : > { %p6596_p12 = pnand %p6595_p11, %p6589_p8 }
  0x4b   : > { %6599 = shalt.err (!%p6596_p12)
}
  0x4c   : > { %s9068_s21 = smov 64   ;;  %s9069_s1 = smov 4  }
  0x4d   : > { %5997 = dma.hbm_to_vmem [thread:$0]  (!%p7135_p4), %s509_s5, 1024, %s511_s24, %s9077_s2, %s9068_s21, %s9068_s21, %s9069_s1  }
  0x4e   : > { %s7178_s8 = sshll.u32 %s6956_s16, 4  ;;  %s9178_s6 = sld [smem:[#allocation91_spill]] }
  0x4f   : > { %s546_s13 = scalar_lea.vmem [#allocation12], %s7130_s20  ;;  %s9070_s15 = sshll.u32 %s7130_s20, 8 }
  0x50   : > { %s553_s7 = sshll.u32 %s546_s13, 4  ;;  %s9074_s12 = scalar_lea.sflag [#allocation13], %s7127_s19  ;;  %s554_s7 = int_to_ptr.vmem [resolvable:$true] %s553_s7 }
  0x51   : > { %s6613_s4 = scalar_lea.vmem %s554_s7, 16  ;;  %s6972_s3 = smov [#allocation12]  }
  0x52   : > { %p6614_p13 = scmp.ne.s32.totalorder %s554_s7, %s6613_s4  ;;  %s6618_s10 = sshll.u32 %s6972_s3, 4  ;;  %s6619_s10 = int_to_ptr.vmem [resolvable:$false] %s6618_s10 }
  0x53   : > { %s6620_s5 = scalar_lea.vmem %s6619_s10, 32  ;;  %p6621_p7 = scmp.lt.s32.totalorder %s554_s7, %s6619_s10 }
  0x54   : > { %s551_s23 = scalar_lea.hbm %s9178_s6, %s7178_s8  ;;  %p6616_p1 = pnand %p6614_p13, %p7146_p5 }
  0x55   : > { %p6622_p8 = scmp.lt.s32.totalorder %s6620_s5, %s6613_s4 }
  0x56   : > { %p6617_p6 = pneg %p6616_p1 }
  0x57   : > { %p6623_p9 = por %p6622_p8, %p6621_p7 }
  0x59   : > { %p6624_p10 = pnand %p6623_p9, %p6617_p6 }
  0x5b   : > { %6627 = shalt.err (!%p6624_p10)
}
  0x5c   : > { %6003 = dma.hbm_to_vmem [thread:$0]  (!%p7135_p4), %s551_s23, 16, %s554_s7, %s9074_s12  }
  0x5d   : > { %s9071_s24 = sshll.u32 %s6956_s16, 12  ;;  %s9179_s9 = sld [smem:[#allocation94_spill]] }
  0x5e   : > { %s587_s4 = scalar_lea.vmem [#allocation15], %s9070_s15  ;;  %s9072_s13 = scalar_lea.sflag [#allocation16], %s7127_s19 }
  0x5f   : > { %s594_s11 = sshll.u32 %s587_s4, 4  ;;  %s6973_s21 = smov [#allocation15]   ;;  %s595_s11 = int_to_ptr.vmem [resolvable:$true] %s594_s11 }
  0x60   : > { %s6641_s5 = scalar_lea.vmem %s595_s11, 4096  ;;  %s6646_s1 = sshll.u32 %s6973_s21, 4  ;;  %s6647_s1 = int_to_ptr.vmem [resolvable:$false] %s6646_s1 }
  0x61   : > { %p6642_p11 = scmp.ne.s32.totalorder %s595_s11, %s6641_s5  ;;  %s6648_s23 = scalar_lea.vmem %s6647_s1, 8192 }
  0x62   : > { %p6649_p1 = scmp.lt.s32.totalorder %s595_s11, %s6647_s1  ;;  %p6650_p6 = scmp.lt.s32.totalorder %s6648_s23, %s6641_s5 }
  0x63   : > { %s593_s10 = scalar_lea.hbm %s9179_s9, %s9071_s24  ;;  %p6644_p12 = pnand %p6642_p11, %p7146_p5 }
  0x64   : > { %p6651_p7 = por %p6650_p6, %p6649_p1 }
  0x65   : > { %p6645_p13 = pneg %p6644_p12 }
  0x67   : > { %p6652_p8 = pnand %p6651_p7, %p6645_p13 }
  0x69   : > { %6655 = shalt.err (!%p6652_p8)
}
  0x6a   : > { %s6974_s7 = smov 256   ;;  %s6975_s21 = smov 16  }
  0x6b   : > { %6009 = dma.hbm_to_vmem [thread:$0]  (!%p7135_p4), %s593_s10, 4096, %s595_s11, %s9072_s13, %s6974_s7, %s6974_s7, %s6975_s21  }
  0x6c   : > { %s7209_s1 = sadd.s32 4294967295, %s6964_s18   ;;  %s5180_s3 = sadd.s32 4294967294, %s6964_s18  }
  0x6d   : > { %s53_s0 = sadd.s32 1, %s6956_s16  ;;  %s56_s4 = sadd.s32 1, %s6960_s17 }
  0x6e   : > { %p54_p9 = scmp.ge.s32.totalorder %s53_s0, 6  ;;  %s63_s5 = sadd.s32 1, %s6944_s30 }
  0x6f   : > { %p70_p10 = scmp.ne.s32.totalorder %s6944_s30, %s6940_s29  ;;  %p9075_p12 = scmp.ne.s32.totalorder %s6940_s29, %s6936_s28 }
  0x70   : > { %s9349_s0 = smov (%p54_p9, %s53_s0), 0  ;;  %s9351_s4 = smov (!%p54_p9, %s56_s4), %s6960_s17 }
  0x71   : > { %9180 = sst [smem:[#allocation37_spill]] %s9349_s0  ;;  %p7225_p11 = por %p71_p0, %p70_p10 }
  0x72   : > { %p58_p13 = scmp.ge.s32.totalorder %s9351_s4, 2  ;;  %p77_p1 = scmp.eq.s32.totalorder %s7209_s1, 0 }
  0x73   : > { %s86_s11 = ssub.s32 %s6956_s16, %s9349_s0  ;;  %s89_s23 = sadd.s32 1, %s6932_s27 }
  0x74   : > { %s9353_s4 = smov (%p58_p13, %s9351_s4), 0  ;;  %p7240_p6 = por %p77_p1, %p9075_p12 }
  0x75   : > { %9182 = sst [smem:[#allocation38_spill]] %s9353_s4  ;;  %p87_p0 = scmp.eq.s32.totalorder %s86_s11, 0 }
  0x76   : > { %s9183_s7 = scalar_select %p7240_p6, 1, 0 }
  0x77   : > { %s60_s21 = ssub.s32 %s6960_s17, %s9353_s4  ;;  %p102_p7 = scmp.ne.s32.totalorder %s6928_s26, %s6924_s25 }
  0x78   : > { %p61_p8 = scmp.eq.s32.totalorder %s60_s21, 0  ;;  %p412_p9 = scmp.eq.s32.totalorder %s7209_s1, 11 }
  0x79   : > { %s7250_s15 = scalar_select %p87_p0, %s6932_s27, %s89_s23  }
  0x7a   : > { %s7253_s24 = scalar_select %p61_p8, %s6944_s30, %s63_s5  }
  0x7b   : > { %9184 = sst [smem:[#allocation39_spill]] %s7250_s15  ;;  %p7255_p13 = por %p102_p7, %p77_p1 }
  0x7c   : > { %9185 = sst [smem:[#allocation40_spill]] %s7253_s24  ;;  %p7262_p2 = por %p412_p9, %p70_p10 }
  0x7d   : > { %s9186_s13 = scalar_select %p7255_p13, 1, 0 }
  0x7e   : > { %s9188_s12 = scalar_select %p7262_p2, 1, 0 }
  0x7f   : > { %9187 = sst [smem:[#allocation41_spill]] %s9186_s13  ;;  %p418_p12 = scmp.eq.s32.totalorder %s5180_s3, 11 }
  0x80   : > { %9189 = sst [smem:[#allocation42_spill]] %s9188_s12  ;;  %s438_s25 = sand.u32 1, %s6944_s30  }
  0x81   : > { %s5183_s11 = sshll.u32 %s438_s25, 6  ;;  %p9190_p6 = scmp.ne.s32.totalorder %s6940_s29, %s6936_s28 }
  0x82   : > { %s5383_s23 = sshll.u32 %s6960_s17, 10  ;;  %s442_s5 = scalar_lea.vmem [#allocation3], %s5183_s11 }
  0x83   : > { %p7270_p3 = por %p418_p12, %p9190_p6  ;;  %s449_s2 = sshll.u32 %s442_s5, 4  ;;  %s450_s2 = int_to_ptr.vmem [resolvable:$true] %s449_s2 }
  0x84   : > { %s9193_s4 = sld [smem:[#allocation85_spill]]  ;;  %p9194_p10 = scmp.lt.s32.totalorder %s6964_s18, 12 }
  0x85   : > { %s9191_s21 = scalar_select %p7270_p3, 1, 0 }
  0x86   : > { %p7282_p1 = pnand %p9194_p10, %p7225_p11  ;;  %s5959_s3 = smul.u32 3, %s7130_s20 }
  0x87   : > { %9192 = sst [smem:[#allocation43_spill]] %s9191_s21  ;;  %s5960_s30 = smul.u32 48, %s6956_s16 }
  0x88   : > { %s439_s15 = scalar_lea.sflag [#allocation4], %s438_s25  ;;  %p6658_p12 = pneg %p7282_p1 }
  0x89   : > { %s6669_s17 = scalar_lea.vmem %s450_s2, 1024  ;;  %s6976_s11 = smov [#allocation3]  }
  0x8a   : > { %s448_s0 = scalar_lea.hbm %s9193_s4, %s5383_s23  ;;  %p6670_p6 = scmp.ne.s32.totalorder %s450_s2, %s6669_s17 }
  0x8b   : > { %s6674_s6 = sshll.u32 %s6976_s11, 4  ;;  %s6675_s6 = int_to_ptr.vmem [resolvable:$false] %s6674_s6 }
  0x8c   : > { %p6672_p0 = pnand %p6670_p6, %p6658_p12  ;;  %s6676_s9 = scalar_lea.vmem %s6675_s6, 2048 }
  0x8d   : > { %p6677_p8 = scmp.lt.s32.totalorder %s450_s2, %s6675_s6  ;;  %p6678_p9 = scmp.lt.s32.totalorder %s6676_s9, %s6669_s17 }
  0x8e   : > { %p6673_p7 = pneg %p6672_p0 }
  0x8f   : > { %p6679_p11 = por %p6678_p9, %p6677_p8 }
  0x91   : > { %p6680_p10 = pnand %p6679_p11, %p6673_p7 }
  0x93   : > { %6683 = shalt.err (!%p6680_p10)
}
  0x94   : > { %s6977_s4 = smov 128   ;;  %s6978_s10 = smov 8  }
  0x95   : > { %5988 = dma.hbm_to_vmem [thread:$0]  (!%p7282_p1), %s448_s0, 1024, %s450_s2, %s439_s15, %s6977_s4, %s6977_s4, %s6978_s10  }
  0x96   : > { %s9196_s5 = sld [smem:[#allocation87_spill]]  ;;  %s484_s21 = scalar_lea.vmem [#allocation8], %s5959_s3 }
  0x97   : > { %s492_s11 = sshll.u32 %s484_s21, 4  ;;  %s9197_s17 = sld [smem:[#allocation90_spill]]  ;;  %s493_s11 = int_to_ptr.vmem [resolvable:$true] %s492_s11 }
  0x98   : > { %s6697_s12 = scalar_lea.vmem %s493_s11, 48  ;;  %s6979_s13 = smov [#allocation8]  }
  0x99   : > { %p6698_p12 = scmp.ne.s32.totalorder %s493_s11, %s6697_s12  ;;  %s6702_s26 = sshll.u32 %s6979_s13, 4  ;;  %s6703_s26 = int_to_ptr.vmem [resolvable:$false] %s6702_s26 }
  0x9a   : > { %s6704_s2 = scalar_lea.vmem %s6703_s26, 96  ;;  %p6705_p1 = scmp.lt.s32.totalorder %s493_s11, %s6703_s26 }
  0x9b   : > { %p6700_p6 = pnand %p6698_p12, %p7146_p5  ;;  %p6706_p7 = scmp.lt.s32.totalorder %s6704_s2, %s6697_s12 }
  0x9c   : > { %s490_s27 = scalar_lea.hbm %s9196_s5, %s5960_s30 }
  0x9d   : > { %s534_s18 = scalar_lea.hbm %s9197_s17, %s7178_s8  ;;  %p6701_p0 = pneg %p6700_p6 }
  0x9e   : > { %p6707_p8 = por %p6706_p7, %p6705_p1 }
  0xa0   : > { %p6708_p9 = pnand %p6707_p8, %p6701_p0 }
  0xa2   : > { %6711 = shalt.err (!%p6708_p9)
}
  0xa3   : > { %s9199_s30 = scalar_lea.sflag [#allocation7], %s7127_s19  ;;  %s529_s28 = scalar_lea.vmem [#allocation11], %s7130_s20 }
  0xa4   : > { %5994 = dma.hbm_to_vmem [thread:$0]  (!%p7135_p4), %s490_s27, 48, %s493_s11, %s9199_s30  }
  0xa5   : > { %s536_s15 = sshll.u32 %s529_s28, 4  ;;  %s9200_s0 = sld [smem:[#allocation93_spill]]  ;;  %s537_s15 = int_to_ptr.vmem [resolvable:$true] %s536_s15 }
  0xa6   : > { %s6725_s26 = scalar_lea.vmem %s537_s15, 16  ;;  %s6980_s12 = smov [#allocation11]  }
  0xa7   : > { %p6726_p11 = scmp.ne.s32.totalorder %s537_s15, %s6725_s26  ;;  %s6730_s3 = sshll.u32 %s6980_s12, 4  ;;  %s6731_s3 = int_to_ptr.vmem [resolvable:$false] %s6730_s3 }
  0xa8   : > { %s6732_s4 = scalar_lea.vmem %s6731_s3, 32  ;;  %p6733_p6 = scmp.lt.s32.totalorder %s537_s15, %s6731_s3 }
  0xa9   : > { %p6728_p10 = pnand %p6726_p11, %p7146_p5  ;;  %p6734_p0 = scmp.lt.s32.totalorder %s6732_s4, %s6725_s26 }
  0xab   : > { %s574_s21 = scalar_lea.hbm %s9200_s0, %s7178_s8  ;;  %p6729_p12 = pneg %p6728_p10 }
  0xac   : > { %p6735_p1 = por %p6734_p0, %p6733_p6 }
  0xae   : > { %p6736_p7 = pnand %p6735_p1, %p6729_p12 }
  0xb0   : > { %6739 = shalt.err (!%p6736_p7)
}
  0xb1   : > { %s9201_s27 = scalar_lea.sflag [#allocation10], %s7127_s19  ;;  %s569_s23 = scalar_lea.vmem [#allocation14], %s7130_s20 }
  0xb2   : > { %6000 = dma.hbm_to_vmem [thread:$0]  (!%p7135_p4), %s534_s18, 16, %s537_s15, %s9201_s27  }
  0xb3   : > { %s576_s5 = sshll.u32 %s569_s23, 4  ;;  %s5197_s11 = sshll.u32 %s7130_s20, 2  ;;  %s577_s5 = int_to_ptr.vmem [resolvable:$true] %s576_s5 }
  0xb4   : > { %s6753_s6 = scalar_lea.vmem %s577_s5, 16  ;;  %s6981_s17 = smov [#allocation14]  }
  0xb5   : > { %p6754_p8 = scmp.ne.s32.totalorder %s577_s5, %s6753_s6  ;;  %s6758_s2 = sshll.u32 %s6981_s17, 4  ;;  %s6759_s2 = int_to_ptr.vmem [resolvable:$false] %s6758_s2 }
  0xb6   : > { %s6760_s30 = scalar_lea.vmem %s6759_s2, 32  ;;  %p6761_p10 = scmp.lt.s32.totalorder %s577_s5, %s6759_s2 }
  0xb7   : > { %p6756_p9 = pnand %p6754_p8, %p7146_p5  ;;  %p6762_p12 = scmp.lt.s32.totalorder %s6760_s30, %s6753_s6 }
  0xb9   : > { %p6757_p11 = pneg %p6756_p9  ;;  %p6763_p6 = por %p6762_p12, %p6761_p10 }
  0xbb   : > { %p6764_p0 = pnand %p6763_p6, %p6757_p11 }
  0xbd   : > { %6767 = shalt.err (!%p6764_p0)
}
  0xbe   : > { %s9202_s18 = scalar_lea.sflag [#allocation13], %s7127_s19  ;;  %s5386_s24 = sshll.u32 %s6956_s16, 6 }
  0xbf   : > { %6006 = dma.hbm_to_vmem [thread:$0]  (!%p7135_p4), %s574_s21, 16, %s577_s5, %s9202_s18  }
  0xc0   : > { %s608_s13 = scalar_lea.vmem [#allocation17], %s5197_s11  ;;  %s9203_s4 = sld [smem:[#allocation95_spill]] }
  0xc1   : > { %s616_s26 = sshll.u32 %s608_s13, 4  ;;  %s6982_s25 = smov [#allocation17]   ;;  %s617_s26 = int_to_ptr.vmem [resolvable:$true] %s616_s26 }
  0xc2   : > { %s6781_s10 = scalar_lea.vmem %s617_s26, 64  ;;  %s6786_s23 = sshll.u32 %s6982_s25, 4  ;;  %s6787_s23 = int_to_ptr.vmem [resolvable:$false] %s6786_s23 }
  0xc3   : > { %p6782_p1 = scmp.ne.s32.totalorder %s617_s26, %s6781_s10  ;;  %s6788_s8 = scalar_lea.vmem %s6787_s23, 128 }
  0xc4   : > { %p6789_p9 = scmp.lt.s32.totalorder %s617_s26, %s6787_s23  ;;  %p6790_p11 = scmp.lt.s32.totalorder %s6788_s8, %s6781_s10 }
  0xc5   : > { %p6784_p7 = pnand %p6782_p1, %p7146_p5 }
  0xc6   : > { %s614_s27 = scalar_lea.hbm %s9203_s4, %s5386_s24  ;;  %p6791_p10 = por %p6790_p11, %p6789_p9 }
  0xc7   : > { %p6785_p8 = pneg %p6784_p7 }
  0xc9   : > { %p6792_p12 = pnand %p6791_p10, %p6785_p8 }
  0xcb   : > { %6795 = shalt.err (!%p6792_p12)
}
  0xcc   : > { %s9204_s21 = scalar_lea.sflag [#allocation16], %s7127_s19  ;;  %s9205_s5 = sshll.u32 %s6956_s16, 12 }
  0xcd   : > { %6012 = dma.hbm_to_vmem [thread:$0]  (!%p7135_p4), %s614_s27, 64, %s617_s26, %s9204_s21  }
  0xce   : > { %s9206_s17 = sld [smem:[#allocation96_spill]]  ;;  %s9207_s30 = sshll.u32 %s7130_s20, 8 }
  0xcf   : > { %s627_s18 = scalar_lea.vmem [#allocation18], %s9207_s30  ;;  %s624_s15 = scalar_lea.sflag [#allocation19], %s7130_s20 }
  0xd0   : > { %s634_s28 = sshll.u32 %s627_s18, 4  ;;  %s6983_s19 = smov [#allocation18]   ;;  %s635_s28 = int_to_ptr.vmem [resolvable:$true] %s634_s28 }
  0xd1   : > { %s6809_s24 = scalar_lea.vmem %s635_s28, 4096  ;;  %s6814_s13 = sshll.u32 %s6983_s19, 4  ;;  %s6815_s13 = int_to_ptr.vmem [resolvable:$false] %s6814_s13 }
  0xd2   : > { %p6810_p6 = scmp.ne.s32.totalorder %s635_s28, %s6809_s24  ;;  %s6816_s12 = scalar_lea.vmem %s6815_s13, 8192 }
  0xd3   : > { %p6817_p7 = scmp.lt.s32.totalorder %s635_s28, %s6815_s13  ;;  %p6818_p8 = scmp.lt.s32.totalorder %s6816_s12, %s6809_s24 }
  0xd4   : > { %s633_s2 = scalar_lea.hbm %s9206_s17, %s9205_s5  ;;  %p6812_p0 = pnand %p6810_p6, %p7146_p5 }
  0xd5   : > { %p6819_p9 = por %p6818_p8, %p6817_p7 }
  0xd6   : > { %p6813_p1 = pneg %p6812_p0 }
  0xd8   : > { %p6820_p11 = pnand %p6819_p9, %p6813_p1 }
  0xda   : > { %6823 = shalt.err (!%p6820_p11)
}
  0xdb   : > { %s9208_s26 = smov 4   ;;  %s9209_s3 = smov 64  }
  0xdc   : > { %6015 = dma.hbm_to_vmem [thread:$0]  (!%p7135_p4), %s633_s2, 4096, %s635_s28, %s624_s15, %s9209_s3, %s9209_s3, %s9208_s26  }
  0xdd   : > { %s9210_s20 = sld [smem:[#allocation36_spill]] }
  0xe3   : > { %p9211_p10 = scmp.ne.s32.totalorder %s9210_s20, 0 }
  0xe5   : > { %652 = sbr.rel (%p9211_p10) target bundleno = 2934 (0xb76), region = 72 }
  0xea   : > { %s7362_s14 = sand.u32 1, %s6940_s29   ;;  %p9212_p5 = scmp.ne.s32.totalorder %s9183_s7, 0 }
  0xeb   : > { %s5204_s4 = sshll.u32 %s7362_s14, 6  ;;  %s655_s27 = scalar_lea.sflag [#allocation4], %s7362_s14 }
  0xec   : > { %s7366_s10 = scalar_lea.vmem [#allocation3], %s5204_s4 }
  0xed   : > { %6895 = dma.done.wait (%p9212_p5), %s655_s27, 1024  }
  0xee   : > { %6897 = vsyncadd (%p9212_p5), %s655_s27, 4294966272  ;;  %s9213_s22 = sld [smem:[#allocation28_spill]]  ;;  %s663_s23 = sand.u32 1, %s7209_s1  }
  0xef   : > { %s664_s5 = scalar_lea.sflag [#allocation7], %s663_s23 }
  0xf4   : > { %s7374_s8 = sand.u32 1, %s9213_s22  }
  0xf5   : > { %s5961_s21 = smul.u32 192, %s7374_s8 }
  0xf7   : > { %s7377_s11 = scalar_lea.vmem [#allocation6], %s5961_s21 }
  0xf8   : > { %6899 = dma.done.wait (%p7255_p13), %s664_s5, 3120  }
  0xf9   : > { %6901 = vsyncadd (%p7255_p13), %s664_s5, 4294964176  ;;  %s5962_s7 = smul.u32 3, %s7374_s8  ;;  %s5205_s6 = sshll.u32 %s7374_s8, 6 }
  0xfa   : > { %s682_s1 = scalar_lea.sflag [#allocation10], %s663_s23  ;;  %s7387_s2 = scalar_lea.vmem [#allocation9], %s5205_s6 }
  0xfb   : > { %s7385_s17 = scalar_lea.vmem [#allocation8], %s5962_s7 }
  0xfc   : > { %6903 = dma.done.wait (%p7255_p13), %s682_s1, 1040  }
  0xfd   : > { %6905 = vsyncadd (%p7255_p13), %s682_s1, 4294966256  ;;  %s693_s30 = scalar_lea.vmem [#allocation11], %s7374_s8  ;;  %s699_s18 = scalar_lea.sflag [#allocation13], %s663_s23 }
  0xfe   : > { %s701_s28 = scalar_lea.vmem [#allocation12], %s7374_s8 }
  0xff   : > { %6907 = dma.done.wait (%p7255_p13), %s699_s18, 32  }
 0x100   : > { %6909 = vsyncadd (%p7255_p13), %s699_s18, 4294967264  ;;  %s5206_s15 = sshll.u32 %s7374_s8, 8  ;;  %s715_s19 = scalar_lea.sflag [#allocation16], %s663_s23 }
 0x101   : > { %s7401_s13 = scalar_lea.vmem [#allocation15], %s5206_s15 }
 0x102   : > { %6911 = dma.done.wait (%p7255_p13), %s715_s19, 4160  }
 0x103   : > { %6913 = vsyncadd (%p7255_p13), %s715_s19, 4294963136  ;;  %s5207_s12 = sshll.u32 %s7374_s8, 2  ;;  %s733_s3 = scalar_lea.sflag [#allocation19], %s7374_s8 }
 0x104   : > { %s7408_s26 = scalar_lea.vmem [#allocation17], %s5207_s12  ;;  %s7411_s20 = scalar_lea.vmem [#allocation18], %s5206_s15 }
 0x105   : > { %6915 = dma.done.wait (%p7255_p13), %s733_s3, 4096  }
 0x106   : > { %6917 = vsyncadd (%p7255_p13), %s733_s3, 4294963200  ;;  %s9215_s4 = sld [smem:[#allocation32_spill]]  ;;  %s5209_s27 = sshll.u32 %s7362_s14, 5 }
 0x107   : > { %s9216_s5 = sld [smem:[#allocation89_spill]]  ;;  %s7434_s24 = scalar_lea.vmem [#allocation20], %s5209_s27 }
 0x108   : > { %s9217_s18 = sld [smem:[#allocation92_spill]] }
 0x109   : > { %s9218_s12 = sld [smem:[#allocation97_spill]] }
 0x10c   : > { %p830_p4 = scmp.lt.s32.totalorder %s9215_s4, 5  ;;  %p5210_p13 = scmp.ne.s32.totalorder %s9215_s4, 0 }
 0x10e   : > { %s7420_s22 = scalar_select %p830_p4, %s9215_s4, 5 }
 0x10f   : > { %843 = sbr.rel (%p5210_p13) target bundleno = 281 (0x119), region = 116 }
 0x110   : > { %s832_s7 = scalar_lea.vmem %s9216_s5, %s7420_s22  ;;  %s835_s15 = scalar_lea.vmem %s9217_s18, %s7420_s22 }
 0x111   : > { %s838_s3 = scalar_lea.vmem %s9218_s12, %s7420_s22 }
 0x114   : > { %v844_v0 = vld [vmem:[%s7366_s10] sm:$0xff]  ;;  %v845_v1 = vld [vmem:[%s7366_s10 + $0x8] sm:$0xff]  ;;  %v846_v2 = vld [vmem:[%s7366_s10 + $0x10] sm:$0xff] }
 0x115   : > { %852 = vst [vmem:[#allocation2 + $0x30] sm:$0xff] %v844_v0  ;;  %853 = vst [vmem:[#allocation2] sm:$0xff] %v845_v1  ;;  %v847_v3 = vld [vmem:[%s7366_s10 + $0x18] sm:$0xff]  ;;  %v848_v4 = vld [vmem:[%s7366_s10 + $0x20] sm:$0xff] }
 0x116   : > { %854 = vst [vmem:[#allocation2 + $0x18] sm:$0xff] %v846_v2  ;;  %v849_v5 = vld [vmem:[%s7366_s10 + $0x28] sm:$0xff]  ;;  %855 = vst [vmem:[#allocation2 + $0x10] sm:$0xff] %v847_v3  ;;  %v850_v6 = vld [vmem:[%s7366_s10 + $0x30] sm:$0xff] }
 0x117   : > { %856 = vst [vmem:[#allocation2 + $0x8] sm:$0xff] %v848_v4  ;;  %857 = vst [vmem:[#allocation2 + $0x20] sm:$0xff] %v849_v5  ;;  %v851_v7 = vld [vmem:[%s7366_s10 + $0x38] sm:$0xff] }
 0x118   : > { %858 = vst [vmem:[#allocation2 + $0x28] sm:$0xff] %v850_v6  ;;  %859 = vst [vmem:[#allocation2 + $0x38] sm:$0xff] %v851_v7 }
 0x119 PF: > { %v6128_v8 = vld [vmem:[%s7377_s11 + $0xac] ss:$12 sps:$4 sm:$0xff]   ;;  %v6130_v9 = vld [vmem:[%s7377_s11 + $0xa8] ss:$12 sps:$4 sm:$0xff]   ;;  %v9095_v10 = vmov 0   ;;  %v906_v45 = vlaneseq  ;;  %vm1407_vm0 = vcmask 130048  }
 0x11a   : > { %1081 = vmatprep.mubr.bf16.mxu0 %v9095_v10  ;;  %1049 = vmatprep.subr.bf16.mxu0 %v6128_v8  ;;  %v6131_v11 = vld [vmem:[%s7377_s11 + $0x94] ss:$12 sps:$4 sm:$0xff]   ;;  %v6133_v12 = vld [vmem:[%s7377_s11 + $0x90] ss:$12 sps:$4 sm:$0xff]   ;;  %v6136_v14 = vld [vmem:[%s7377_s11 + $0x78] ss:$12 sps:$4 sm:$0xff]  }
 0x11b   : > { %1050 = vmatpush1.bf16.msra.mxu0 %v6130_v9  ;;  %v6134_v13 = vld [vmem:[%s7377_s11 + $0x7c] ss:$12 sps:$4 sm:$0xff]   ;;  %v6137_v15 = vld [vmem:[%s7377_s11 + $0x64] ss:$12 sps:$4 sm:$0xff]   ;;  %v6139_v17 = vld [vmem:[%s7377_s11 + $0x60] ss:$12 sps:$4 sm:$0xff]  }
 0x11c   : > { %1051 = vmatprep.subr.bf16.mxu0 %v6131_v11  ;;  %v860_v16 = vld [vmem:[#allocation2 + $0x30] sm:$0xff]  ;;  %v861_v18 = vld [vmem:[#allocation2] sm:$0xff]  ;;  %v6140_v19 = vld [vmem:[%s7377_s11 + $0x4c] ss:$12 sps:$4 sm:$0xff]   ;;  %v7473_v46 = vshrl.u32 %v906_v45, 7  ;;  %s6985_s10 = smov 112  }
 0x11d   : > { %v900_v20 = vpack.c.bf16 %v861_v18, %v860_v16  ;;  %v6142_v21 = vld [vmem:[%s7377_s11 + $0x48] ss:$12 sps:$4 sm:$0xff]   ;;  %v6152_v22 = vld [vmem:[%s7377_s11 + $0xb0] ss:$12 sps:$4 sm:$0xff]   ;;  %v6153_v23 = vld [vmem:[%s7377_s11 + $0x98] ss:$12 sps:$4 sm:$0xff]  }
 0x11e   : > { %v6143_v24 = vld [vmem:[%s7377_s11 + $0x34] ss:$12 sps:$4 sm:$0xff]   ;;  %5621 = vmatprep.subr.bf16.mxu1 %v6152_v22  ;;  %v6145_v26 = vld [vmem:[%s7377_s11 + $0x30] ss:$12 sps:$4 sm:$0xff]   ;;  %v6148_v28 = vld [vmem:[%s7377_s11 + $0x18] ss:$12 sps:$4 sm:$0xff]  }
 0x11f   : > { %1052 = vmatpush1.bf16.msra.mxu0 %v6133_v12  ;;  %5637 = vmatprep.mubr.bf16.mxu1 %v900_v20  ;;  %v6154_v25 = vld [vmem:[%s7377_s11 + $0x80] ss:$12 sps:$4 sm:$0xff]   ;;  %v6146_v27 = vld [vmem:[%s7377_s11 + $0x1c] ss:$12 sps:$4 sm:$0xff]   ;;  %v6149_v30 = vld [vmem:[%s7377_s11 + $0x4] ss:$12 sps:$4 sm:$0xff]  }
 0x120   : > { %1053 = vmatprep.subr.bf16.mxu0 %v6134_v13  ;;  %5622 = vmatpush3.bf16.msra.mxu1 %v6152_v22  ;;  %v6155_v29 = vld [vmem:[%s7377_s11 + $0x68] ss:$12 sps:$4 sm:$0xff]   ;;  %v6156_v31 = vld [vmem:[%s7377_s11 + $0x50] ss:$12 sps:$4 sm:$0xff]   ;;  %v6151_v32 = vld [vmem:[%s7377_s11] ss:$12 sps:$4 sm:$0xff]  }
 0x121   : > { %5623 = vmatprep.subr.bf16.mxu1 %v6153_v23  ;;  %v6157_v33 = vld [vmem:[%s7377_s11 + $0x38] ss:$12 sps:$4 sm:$0xff]   ;;  %v6158_v34 = vld [vmem:[%s7377_s11 + $0x20] ss:$12 sps:$4 sm:$0xff]   ;;  %v863_v36 = vld [vmem:[#allocation2 + $0x10] sm:$0xff]  ;;  %9219 = vst [vmem:[#allocation44_spill] sm:$0xff] %v7473_v46 }
 0x122   : > { %v862_v35 = vld [vmem:[#allocation2 + $0x18] sm:$0xff]  ;;  %v6159_v37 = vld [vmem:[%s7377_s11 + $0x8] ss:$12 sps:$4 sm:$0xff]   ;;  %v865_v40 = vld [vmem:[#allocation2 + $0x20] sm:$0xff]  ;;  %v9093_v47 = vsub.s32 0, %v7473_v46  ;;  %v9094_v58 = vsub.s32 1, %v7473_v46 }
 0x123   : > { %1054 = vmatpush1.bf16.msra.mxu0 %v6136_v14  ;;  %v901_v38 = vpack.c.bf16 %v863_v36, %v862_v35  ;;  %v864_v39 = vld [vmem:[#allocation2 + $0x8] sm:$0xff]  ;;  %v867_v43 = vld [vmem:[#allocation2 + $0x38] sm:$0xff]  ;;  %v7477_v48 = vld [vmem:[%s7385_s17] sm:$0x7]  ;;  %s6986_s11 = smov 80   ;;  %s6987_s17 = smov 96  }
 0x124   : > { %1055 = vmatprep.subr.bf16.mxu0 %v6137_v15  ;;  %5624 = vmatpush3.bf16.msra.mxu1 %v6153_v23  ;;  %v902_v41 = vpack.c.bf16 %v865_v40, %v864_v39  ;;  %v866_v42 = vld [vmem:[#allocation2 + $0x28] sm:$0xff]  ;;  %v909_v50 = vrot.slane %v7477_v48, %v9093_v47  ;;  %v913_v61 = vrot.slane %v7477_v48, %v9094_v58  ;;  %s6988_s4 = smov 64   ;;  %s6989_s27 = smov 48   ;;  %vm2120_vm1 = vcmask 523264  }
 0x125   : > { %5625 = vmatprep.subr.bf16.mxu1 %v6154_v25  ;;  %v903_v44 = vpack.c.bf16 %v867_v43, %v866_v42  ;;  %s6990_s23 = smov 32   ;;  %s6991_s21 = smov 16   ;;  %vm3601_vm2 = vcmask 261120   ;;  %vm3610_vm3 = vcmask 392192   ;;  %vm3627_vm4 = vcmask 654336  }
 0x126   : > { %vm3636_vm5 = vcmask 785408   ;;  %vm3645_vm6 = vcmask 916480   ;;  %s9328_s1 = scalar_lea.vmem [#allocation14], %s7374_s8  ;;  %s9329_s8 = sld [smem:[#allocation32_spill]] }
 0x127   : > { %1056 = vmatpush1.bf16.msra.mxu0 %v6139_v17 }
 0x128   : > { %1057 = vmatprep.subr.bf16.mxu0 %v6140_v19  ;;  %5626 = vmatpush3.bf16.msra.mxu1 %v6154_v25 }
 0x129   : > { %5627 = vmatprep.subr.bf16.mxu1 %v6155_v29 }
 0x12b   : > { %1058 = vmatpush1.bf16.msra.mxu0 %v6142_v21 }
 0x12c   : > { %1059 = vmatprep.subr.bf16.mxu0 %v6143_v24  ;;  %5628 = vmatpush3.bf16.msra.mxu1 %v6155_v29  ;;  %p5377_p12 = scmp.ne.s32.totalorder %s9329_s8, 5 }
 0x12d   : > { %5629 = vmatprep.subr.bf16.mxu1 %v6156_v31 }
 0x12f   : > { %1060 = vmatpush1.bf16.msra.mxu0 %v6145_v26 }
 0x130   : > { %1061 = vmatprep.subr.bf16.mxu0 %v6146_v27  ;;  %5630 = vmatpush3.bf16.msra.mxu1 %v6156_v31 }
 0x131   : > { %5631 = vmatprep.subr.bf16.mxu1 %v6157_v33 }
 0x133   : > { %1062 = vmatpush1.bf16.msra.mxu0 %v6148_v28 }
 0x134   : > { %1063 = vmatprep.subr.bf16.mxu0 %v6149_v30  ;;  %5632 = vmatpush3.bf16.msra.mxu1 %v6157_v33 }
 0x135   : > { %5633 = vmatprep.subr.bf16.mxu1 %v6158_v34 }
 0x137   : > { %1064 = vmatpush1.bf16.msra.mxu0 %v6151_v32 }
 0x138   : > { %5634 = vmatpush3.bf16.msra.mxu1 %v6158_v34 }
 0x139   : > { %5635 = vmatprep.subr.bf16.mxu1 %v6159_v37 }
 0x13a   : > { %1082 = vmatmul.mubr.bf16.vlgmr.msra.gmra.mxu0 %v900_v20 }
 0x13b   : > { %1091 = vmatprep.mubr.bf16.mxu0 %v9095_v10 }
 0x13c   : > { %5636 = vmatpush3.bf16.msra.mxu1 %v6159_v37 }
 0x13f   : > { %5638 = vmatmul.mubr.bf16.vlgmr.msra.gmra.mxu1 %v901_v38 }
 0x140   : > { %5641 = vmatprep.mubr.bf16.mxu1 %v902_v41 }
 0x142   : > { %1092 = vmatmul.mubr.bf16.gmra.mxu0 %v901_v38  ;;  %v9092_v38 = vsub.s32 2, %v7473_v46 }
 0x143   : > { %1101 = vmatprep.mubr.bf16.mxu0 %v9095_v10 }
 0x144   : > { %v917_v40 = vrot.slane %v7477_v48, %v9092_v38 }
 0x147   : > { %5642 = vmatmul.mubr.bf16.gmra.mxu1 %v903_v44 }
 0x14a   : > { %1102 = vmatmul.mubr.bf16.gmra.mxu0 %v902_v41 }
 0x14b   : > { %1111 = vmatprep.mubr.bf16.mxu0 %v9095_v10 }
 0x152   : > { %1112 = vmatmul.mubr.bf16.gmra.mxu0 %v903_v44 }
 0x1fa   : > { %v1083_v49 = vpop.f32.mrf.mxu0 }
 0x1fb   : > { %v1084_v53 = vadd.f32 %v1083_v49, %v909_v50 }
 0x1fc   : > { %v1085_v51 = vpop.f32.mrf.mxu0 }
 0x1fd   : > { %v1086_v5 = vadd.f32 %v1085_v51, %v913_v61 }
 0x1fe   : > { %v1087_v52 = vpop.f32.mrf.mxu0 }
 0x1ff   : > { %v1088_v54 = vadd.f32 %v1087_v52, %v909_v50  ;;  %v5639_v33 = vpop.f32.mrf.mxu1 }
 0x200   : > { %v1089_v55 = vpop.f32.mrf.mxu0 }
 0x201   : > { %v7482_v56 = vpack.c.bf16 %v1088_v54, %v1084_v53  ;;  %v1090_v2 = vadd.f32 %v1089_v55, %v913_v61  ;;  %v1156_v34 = vpop.f32.mrf.mxu1  ;;  %v1165_v55 = vadd.f32 %v5639_v33, %v917_v40 }
 0x202   : > { %v1093_v57 = vpop.f32.mrf.mxu0  ;;  %v1157_v44 = vadd.f32 %v1156_v34, %v917_v40 }
 0x203   : > { %5653 = vmatprep.mubr.msk.bf16.mxu0 %vm1407_vm0, %v7482_v56  ;;  %v7494_v7 = vpack.c.bf16 %v1090_v2, %v1086_v5  ;;  %v1094_v13 = vadd.f32 %v1093_v57, %v909_v50  ;;  %v5640_v35 = vpop.f32.mrf.mxu1 }
 0x204   : > { %v1095_v59 = vpop.f32.mrf.mxu0  ;;  %v1168_v57 = vadd.f32 %v5640_v35, %v917_v40 }
 0x205   : > { %v1096_v63 = vadd.f32 %v1095_v59, %v913_v61  ;;  %v1421_v32 = vsel %vm1407_vm0, %v7494_v7, 0  ;;  %v1159_v36 = vpop.f32.mrf.mxu1 }
 0x206   : > { %v1097_v60 = vpop.f32.mrf.mxu0  ;;  %v1160_v45 = vadd.f32 %v1159_v36, %v917_v40 }
 0x207   : > { %v1098_v11 = vadd.f32 %v1097_v60, %v909_v50  ;;  %v5643_v37 = vpop.f32.mrf.mxu1 }
 0x208   : > { %v1099_v62 = vpop.f32.mrf.mxu0  ;;  %v1181_v42 = vadd.f32 %v5643_v37, %v917_v40  ;;  %v7638_v48 = vpack.c.bf16 %v1160_v45, %v1157_v44 }
 0x209   : > { %v1100_v0 = vadd.f32 %v1099_v62, %v913_v61  ;;  %v7500_v15 = vpack.c.bf16 %v1098_v11, %v1094_v13  ;;  %v1172_v39 = vpop.f32.mrf.mxu1 }
 0x20a   : > { %v1103_v1 = vpop.f32.mrf.mxu0  ;;  %9220 = vst [vmem:[#allocation45_spill] sm:$0xff] %v7638_v48  ;;  %v1173_v52 = vadd.f32 %v1172_v39, %v917_v40 }
 0x20b   : > { %v7490_v3 = vpack.c.bf16 %v1100_v0, %v1096_v63  ;;  %v1104_v25 = vadd.f32 %v1103_v1, %v909_v50  ;;  %v5644_v41 = vpop.f32.mrf.mxu1 }
 0x20c   : > { %v1105_v4 = vpop.f32.mrf.mxu0  ;;  %v1184_v43 = vadd.f32 %v5644_v41, %v917_v40 }
 0x20d   : > { %1265 = vrot.lane.b32.xlu1 %v7490_v3, %s6985_s10  ;;  %v1106_v20 = vadd.f32 %v1105_v4, %v913_v61  ;;  %v1424_v31 = vsel %vm1407_vm0, %v7490_v3, 0  ;;  %v1175_v51 = vpop.f32.mrf.mxu1 }
 0x20e   : > { %v1107_v6 = vpop.f32.mrf.mxu0  ;;  %v7632_v49 = vpack.c.bf16 %v1184_v43, %v1181_v42  ;;  %v1176_v53 = vadd.f32 %v1175_v51, %v917_v40 }
 0x20f   : > { %v1108_v24 = vadd.f32 %v1107_v6, %v909_v50 }
 0x210   : > { %v1109_v8 = vpop.f32.mrf.mxu0  ;;  %v7648_v59 = vpack.c.bf16 %v1176_v53, %v1173_v52 }
 0x211   : > { %1263 = vrot.lane.b32.xlu1 %v7494_v7, %s6985_s10  ;;  %v1110_v16 = vadd.f32 %v1109_v8, %v913_v61  ;;  %v7522_v26 = vpack.c.bf16 %v1108_v24, %v1104_v25 }
 0x212   : > { %v1113_v9 = vpop.f32.mrf.mxu0 }
 0x213   : > { %v7506_v22 = vpack.c.bf16 %v1110_v16, %v1106_v20  ;;  %v1114_v29 = vadd.f32 %v1113_v9, %v909_v50 }
 0x214   : > { %v1115_v12 = vpop.f32.mrf.mxu0 }
 0x215   : > { %1203 = vrot.lane.b32.xlu1 %v7482_v56, %s6985_s10  ;;  %v1116_v18 = vadd.f32 %v1115_v12, %v913_v61  ;;  %v1427_v28 = vsel %vm1407_vm0, %v7506_v22, 0 }
 0x216   : > { %v1117_v14 = vpop.f32.mrf.mxu0 }
 0x217   : > { %v1118_v27 = vadd.f32 %v1117_v14, %v909_v50 }
 0x218   : > { %v1119_v17 = vpop.f32.mrf.mxu0 }
 0x219   : > { %v1120_v19 = vadd.f32 %v1119_v17, %v913_v61  ;;  %1205 = vrot.lane.b32.xlu1 %v7500_v15, %s6985_s10  ;;  %v7532_v30 = vpack.c.bf16 %v1118_v27, %v1114_v29 }
 0x21b   : > { %v7504_v21 = vpack.c.bf16 %v1120_v19, %v1116_v18 }
 0x21d   : > { %1269 = vrot.lane.b32.xlu0 %v7504_v21, %s6985_s10  ;;  %5925 = vmatprep.subr.msk.bf16.mxu0 %vm1407_vm0, %v7504_v21  ;;  %v1430_v23 = vsel %vm1407_vm0, %v7504_v21, 0 }
 0x21e   : > { %1283 = vrot.lane.b32.xlu1 %v7506_v22, %s6986_s11  ;;  %5646 = vmatpush3.bf16.xpose.msra.mxu0 %v1430_v23 }
 0x21f   : > { %5926 = vmatprep.subr.msk.bf16.mxu0 %vm1407_vm0, %v7506_v22 }
 0x221   : > { %1267 = vrot.lane.b32.xlu0 %v7506_v22, %s6985_s10 }
 0x222   : > { %1281 = vrot.lane.b32.xlu1 %v7490_v3, %s6986_s11 }
 0x225   : > { %1277 = vrot.lane.b32.xlu0 %v7504_v21, %s6987_s17 }
 0x226   : > { %1207 = vrot.lane.b32.xlu1 %v7522_v26, %s6985_s10  ;;  %5648 = vmatpush3.bf16.xpose.msra.mxu0 %v1427_v28 }
 0x227   : > { %5927 = vmatprep.subr.msk.bf16.mxu0 %vm1407_vm0, %v7490_v3 }
 0x229   : > { %1285 = vrot.lane.b32.xlu0 %v7504_v21, %s6986_s11 }
 0x22a   : > { %1209 = vrot.lane.b32.xlu1 %v7532_v30, %s6985_s10 }
 0x22d   : > { %1275 = vrot.lane.b32.xlu0 %v7506_v22, %s6987_s17 }
 0x22e   : > { %1219 = vrot.lane.b32.xlu1 %v7482_v56, %s6986_s11  ;;  %5650 = vmatpush3.bf16.xpose.msra.mxu0 %v1424_v31 }
 0x22f   : > { %5928 = vmatprep.subr.msk.bf16.mxu0 %vm1407_vm0, %v7494_v7 }
 0x231   : > { %1273 = vrot.lane.b32.xlu0 %v7490_v3, %s6987_s17 }
 0x232   : > { %1293 = vrot.lane.b32.xlu1 %v7504_v21, %s6988_s4 }
 0x235   : > { %1271 = vrot.lane.b32.xlu0 %v7494_v7, %s6987_s17 }
 0x236   : > { %1221 = vrot.lane.b32.xlu1 %v7500_v15, %s6986_s11  ;;  %5652 = vmatpush3.bf16.xpose.msra.mxu0 %v1421_v32 }
 0x239   : > { %1279 = vrot.lane.b32.xlu0 %v7494_v7, %s6986_s11 }
 0x23a   : > { %1299 = vrot.lane.b32.xlu1 %v7506_v22, %s6989_s27 }
 0x23d   : > { %1211 = vrot.lane.b32.xlu0 %v7482_v56, %s6987_s17  ;;  %5654 = vmatmul.mubr.msk.bf16.vlgmr.msra.gmra.mxu0 %vm1407_vm0, %v7500_v15 }
 0x23e   : > { %1297 = vrot.lane.b32.xlu1 %v7490_v3, %s6989_s27  ;;  %5657 = vmatprep.mubr.msk.bf16.mxu0 %vm1407_vm0, %v7522_v26 }
 0x241   : > { %1213 = vrot.lane.b32.xlu0 %v7500_v15, %s6987_s17 }
 0x242   : > { %1287 = vrot.lane.b32.xlu1 %v7494_v7, %s6988_s4 }
 0x245   : > { %1301 = vrot.lane.b32.xlu0 %v7504_v21, %s6989_s27  ;;  %5658 = vmatmul.mubr.msk.bf16.gmra.mxu0 %vm1407_vm0, %v7532_v30 }
 0x246   : > { %1223 = vrot.lane.b32.xlu1 %v7522_v26, %s6986_s11 }
 0x249   : > { %1291 = vrot.lane.b32.xlu0 %v7506_v22, %s6988_s4 }
 0x24a   : > { %1225 = vrot.lane.b32.xlu1 %v7532_v30, %s6986_s11 }
 0x24d   : > { %1289 = vrot.lane.b32.xlu0 %v7490_v3, %s6988_s4 }
 0x24e   : > { %1235 = vrot.lane.b32.xlu1 %v7482_v56, %s6989_s27 }
 0x251   : > { %1215 = vrot.lane.b32.xlu0 %v7522_v26, %s6987_s17 }
 0x252   : > { %1309 = vrot.lane.b32.xlu1 %v7504_v21, %s6990_s23 }
 0x255   : > { %1217 = vrot.lane.b32.xlu0 %v7532_v30, %s6987_s17 }
 0x256   : > { %1237 = vrot.lane.b32.xlu1 %v7500_v15, %s6989_s27 }
 0x259   : > { %1295 = vrot.lane.b32.xlu0 %v7494_v7, %s6989_s27 }
 0x25a   : > { %1315 = vrot.lane.b32.xlu1 %v7506_v22, %s6991_s21 }
 0x25d   : > { %1227 = vrot.lane.b32.xlu0 %v7482_v56, %s6988_s4 }
 0x25e   : > { %1313 = vrot.lane.b32.xlu1 %v7490_v3, %s6991_s21 }
 0x261   : > { %1229 = vrot.lane.b32.xlu0 %v7500_v15, %s6988_s4 }
 0x262   : > { %1233 = vrot.lane.b32.xlu1 %v7532_v30, %s6988_s4 }
 0x265   : > { %1317 = vrot.lane.b32.xlu0 %v7504_v21, %s6991_s21 }
 0x266   : > { %1303 = vrot.lane.b32.xlu1 %v7494_v7, %s6990_s23 }
 0x269   : > { %1307 = vrot.lane.b32.xlu0 %v7506_v22, %s6990_s23 }
 0x26a   : > { %1311 = vrot.lane.b32.xlu1 %v7494_v7, %s6991_s21 }
 0x26d   : > { %1305 = vrot.lane.b32.xlu0 %v7490_v3, %s6990_s23 }
 0x26e   : > { %1245 = vrot.lane.b32.xlu1 %v7500_v15, %s6990_s23 }
 0x271   : > { %1231 = vrot.lane.b32.xlu0 %v7522_v26, %s6988_s4 }
 0x272   : > { %1253 = vrot.lane.b32.xlu1 %v7500_v15, %s6991_s21 }
 0x275   : > { %1239 = vrot.lane.b32.xlu0 %v7522_v26, %s6989_s27 }
 0x276   : > { %1249 = vrot.lane.b32.xlu1 %v7532_v30, %s6990_s23 }
 0x279   : > { %1241 = vrot.lane.b32.xlu0 %v7532_v30, %s6989_s27 }
 0x27a   : > { %1257 = vrot.lane.b32.xlu1 %v7532_v30, %s6991_s21 }
 0x27d   : > { %1243 = vrot.lane.b32.xlu0 %v7482_v56, %s6990_s23 }
 0x27e   : > { %1329 = vrot.lane.b32.xlu1 %v7632_v49, %s6985_s10 }
 0x27f   : > { %v1266_v50 = vpop.permute.xlu1 %1265 }
 0x280   : > { %v1513_v12 = vsel %vm1407_vm0, %v1266_v50, 0 }
 0x281   : > { %1251 = vrot.lane.b32.xlu0 %v7482_v56, %s6991_s21  ;;  %v7655_v56 = vpack.c.bf16 %v1168_v57, %v1165_v55 }
 0x282   : > { %1323 = vrot.lane.b32.xlu1 %v7638_v48, %s6985_s10 }
 0x283   : > { %v1264_v54 = vpop.permute.xlu1 %1263 }
 0x284   : > { %v1510_v18 = vsel %vm1407_vm0, %v1264_v54, 0 }
 0x285   : > { %1247 = vrot.lane.b32.xlu0 %v7522_v26, %s6990_s23 }
 0x286   : > { %1353 = vrot.lane.b32.xlu1 %v7632_v49, %s6986_s11 }
 0x287   : > { %v1204_v60 = vpop.permute.xlu1 %1203 }
 0x288   : > { %5669 = vmatprep.mubr.msk.bf16.mxu1 %vm1407_vm0, %v1204_v60 }
 0x289   : > { %1255 = vrot.lane.b32.xlu0 %v7522_v26, %s6991_s21 }
 0x28a   : > { %1339 = vrot.lane.b32.xlu1 %v7648_v59, %s6987_s17 }
 0x28b   : > { %v1206_v61 = vpop.permute.xlu1 %1205 }
 0x28d   : > { %1327 = vrot.lane.b32.xlu0 %v7648_v59, %s6985_s10 }
 0x28e   : > { %1337 = vrot.lane.b32.xlu1 %v7655_v56, %s6987_s17 }
 0x28f   : > { %v1270_v62 = vpop.permute.xlu0 %1269 }
 0x290   : > { %v7663_v63 = vpop.permute.xlu1 %1283  ;;  %5929 = vmatprep.subr.msk.bf16.mxu1 %vm1407_vm0, %v1270_v62  ;;  %v1519_v0 = vsel %vm1407_vm0, %v1270_v62, 0 }
 0x291   : > { %5662 = vmatpush3.bf16.xpose.msra.mxu1 %v1519_v0  ;;  %1325 = vrot.lane.b32.xlu0 %v7655_v56, %s6985_s10  ;;  %v1694_v31 = vsel %vm1407_vm0, %v7663_v63, 0 }
 0x292   : > { %1349 = vrot.lane.b32.xlu1 %v7655_v56, %s6986_s11 }
 0x293   : > { %v1268_v1 = vpop.permute.xlu0 %1267 }
 0x294   : > { %v7671_v2 = vpop.permute.xlu1 %1281  ;;  %5930 = vmatprep.subr.msk.bf16.mxu1 %vm1407_vm0, %v1268_v1  ;;  %v1516_v5 = vsel %vm1407_vm0, %v1268_v1, 0 }
 0x295   : > { %1341 = vrot.lane.b32.xlu0 %v7632_v49, %s6987_s17  ;;  %v1691_v37 = vsel %vm1407_vm0, %v7671_v2, 0 }
 0x296   : > { %1335 = vrot.lane.b32.xlu1 %v7638_v48, %s6987_s17 }
 0x297   : > { %v1278_v3 = vpop.permute.xlu0 %1277 }
 0x298   : > { %v1208_v4 = vpop.permute.xlu1 %1207  ;;  %5933 = vmatprep.subr.msk.bf16.mxu0 %vm1407_vm0, %v1278_v3  ;;  %v1608_v6 = vsel %vm1407_vm0, %v1278_v3, 0 }
 0x299   : > { %5664 = vmatpush3.bf16.xpose.msra.mxu1 %v1516_v5  ;;  %5678 = vmatpush3.bf16.xpose.msra.mxu0 %v1608_v6 }
 0x29a   : > { %1365 = vrot.lane.b32.xlu1 %v7632_v49, %s6988_s4  ;;  %5931 = vmatprep.subr.msk.bf16.mxu1 %vm1407_vm0, %v1266_v50 }
 0x29b   : > { %v1286_v7 = vpop.permute.xlu0 %1285  ;;  %1351 = vrot.lane.b32.xlu0 %v7648_v59, %s6986_s11 }
 0x29c   : > { %v1210_v8 = vpop.permute.xlu1 %1209  ;;  %v1697_v25 = vsel %vm1407_vm0, %v1286_v7, 0 }
 0x29e   : > { %1377 = vrot.lane.b32.xlu1 %v7632_v49, %s6989_s27 }
 0x29f   : > { %v1276_v9 = vpop.permute.xlu0 %1275  ;;  %1347 = vrot.lane.b32.xlu0 %v7638_v48, %s6986_s11 }
 0x2a0   : > { %v1220_v11 = vpop.permute.xlu1 %1219  ;;  %5934 = vmatprep.subr.msk.bf16.mxu0 %vm1407_vm0, %v1276_v9  ;;  %v1605_v13 = vsel %vm1407_vm0, %v1276_v9, 0 }
 0x2a1   : > { %5666 = vmatpush3.bf16.xpose.msra.mxu1 %v1513_v12  ;;  %5680 = vmatpush3.bf16.xpose.msra.mxu0 %v1605_v13 }
 0x2a2   : > { %1363 = vrot.lane.b32.xlu1 %v7648_v59, %s6988_s4  ;;  %5932 = vmatprep.subr.msk.bf16.mxu1 %vm1407_vm0, %v1264_v54 }
 0x2a3   : > { %v1274_v14 = vpop.permute.xlu0 %1273  ;;  %1375 = vrot.lane.b32.xlu0 %v7648_v59, %s6989_s27 }
 0x2a4   : > { %v1294_v15 = vpop.permute.xlu1 %1293  ;;  %5935 = vmatprep.subr.msk.bf16.mxu0 %vm1407_vm0, %v1274_v14  ;;  %v1602_v19 = vsel %vm1407_vm0, %v1274_v14, 0 }
 0x2a5   : > { %v1786_v30 = vsel %vm1407_vm0, %v1294_v15, 0 }
 0x2a6   : > { %1361 = vrot.lane.b32.xlu1 %v7655_v56, %s6988_s4 }
 0x2a7   : > { %v1272_v16 = vpop.permute.xlu0 %1271  ;;  %1359 = vrot.lane.b32.xlu0 %v7638_v48, %s6988_s4 }
 0x2a8   : > { %v7703_v17 = vpop.permute.xlu1 %1221  ;;  %v1599_v24 = vsel %vm1407_vm0, %v1272_v16, 0 }
 0x2a9   : > { %5668 = vmatpush3.bf16.xpose.msra.mxu1 %v1510_v18  ;;  %5682 = vmatpush3.bf16.xpose.msra.mxu0 %v1602_v19 }
 0x2aa   : > { %1373 = vrot.lane.b32.xlu1 %v7655_v56, %s6989_s27  ;;  %5936 = vmatprep.subr.msk.bf16.mxu0 %vm1407_vm0, %v1272_v16 }
 0x2ab   : > { %5937 = vmatprep.subr.msk.bf16.mxu1 %vm1407_vm0, %v1286_v7  ;;  %v1280_v20 = vpop.permute.xlu0 %1279  ;;  %1389 = vrot.lane.b32.xlu0 %v7632_v49, %s6990_s23 }
 0x2ac   : > { %v7713_v21 = vpop.permute.xlu1 %1299  ;;  %v1688_v44 = vsel %vm1407_vm0, %v1280_v20, 0 }
 0x2ae   : > { %1371 = vrot.lane.b32.xlu1 %v7638_v48, %s6989_s27 }
 0x2af   : > { %v1212_v22 = vpop.permute.xlu0 %1211  ;;  %1399 = vrot.lane.b32.xlu0 %v7648_v59, %s6991_s21 }
 0x2b0   : > { %v7719_v23 = vpop.permute.xlu1 %1297  ;;  %5670 = vmatmul.mubr.msk.bf16.vlgmr.msra.gmra.mxu1 %vm1407_vm0, %v1206_v61  ;;  %5685 = vmatprep.mubr.msk.bf16.mxu0 %vm1407_vm0, %v1212_v22 }
 0x2b1   : > { %5673 = vmatprep.mubr.msk.bf16.mxu1 %vm1407_vm0, %v1208_v4  ;;  %5684 = vmatpush3.bf16.xpose.msra.mxu0 %v1599_v24  ;;  %v1869_v5 = vsel %vm1407_vm0, %v7719_v23, 0 }
 0x2b2   : > { %1401 = vrot.lane.b32.xlu1 %v7632_v49, %s6991_s21  ;;  %5694 = vmatpush3.bf16.xpose.msra.mxu1 %v1697_v25 }
 0x2b3   : > { %5938 = vmatprep.subr.msk.bf16.mxu1 %vm1407_vm0, %v7663_v63  ;;  %5941 = vmatprep.subr.msk.bf16.mxu0 %vm1407_vm0, %v1294_v15  ;;  %v1214_v26 = vpop.permute.xlu0 %1213  ;;  %v1872_v63 = vsel %vm1407_vm0, %v7713_v21, 0 }
 0x2b4   : > { %v1288_v27 = vpop.permute.xlu1 %1287 }
 0x2b5   : > { %v1777_v53 = vsel %vm1407_vm0, %v1288_v27, 0 }
 0x2b6   : > { %1387 = vrot.lane.b32.xlu1 %v7648_v59, %s6990_s23 }
 0x2b7   : > { %v1302_v28 = vpop.permute.xlu0 %1301 }
 0x2b8   : > { %v1224_v29 = vpop.permute.xlu1 %1223  ;;  %5674 = vmatmul.mubr.msk.bf16.gmra.mxu1 %vm1407_vm0, %v1210_v8  ;;  %5686 = vmatmul.mubr.msk.bf16.vlgmr.msra.gmra.mxu0 %vm1407_vm0, %v1214_v26  ;;  %v1875_v54 = vsel %vm1407_vm0, %v1302_v28, 0 }
 0x2b9   : > { %5701 = vmatprep.mubr.msk.bf16.mxu1 %vm1407_vm0, %v1220_v11  ;;  %5710 = vmatpush3.bf16.xpose.msra.mxu0 %v1786_v30 }
 0x2ba   : > { %1385 = vrot.lane.b32.xlu1 %v7655_v56, %s6990_s23  ;;  %5696 = vmatpush3.bf16.xpose.msra.mxu1 %v1694_v31 }
 0x2bb   : > { %5939 = vmatprep.subr.msk.bf16.mxu1 %vm1407_vm0, %v7671_v2  ;;  %v1292_v32 = vpop.permute.xlu0 %1291 }
 0x2bc   : > { %v1226_v33 = vpop.permute.xlu1 %1225  ;;  %5942 = vmatprep.subr.msk.bf16.mxu0 %vm1407_vm0, %v1292_v32  ;;  %v1783_v36 = vsel %vm1407_vm0, %v1292_v32, 0 }
 0x2be   : > { %1397 = vrot.lane.b32.xlu1 %v7655_v56, %s6991_s21 }
 0x2bf   : > { %v1290_v34 = vpop.permute.xlu0 %1289 }
 0x2c0   : > { %v1236_v35 = vpop.permute.xlu1 %1235  ;;  %v1780_v43 = vsel %vm1407_vm0, %v1290_v34, 0 }
 0x2c1   : > { %5712 = vmatpush3.bf16.xpose.msra.mxu0 %v1783_v36 }
 0x2c2   : > { %5698 = vmatpush3.bf16.xpose.msra.mxu1 %v1691_v37  ;;  %5943 = vmatprep.subr.msk.bf16.mxu0 %vm1407_vm0, %v1290_v34 }
 0x2c3   : > { %5940 = vmatprep.subr.msk.bf16.mxu1 %vm1407_vm0, %v1280_v20  ;;  %v1216_v39 = vpop.permute.xlu0 %1215 }
 0x2c4   : > { %v1310_v40 = vpop.permute.xlu1 %1309  ;;  %5689 = vmatprep.mubr.msk.bf16.mxu0 %vm1407_vm0, %v1216_v39 }
 0x2c5   : > { %v1964_v62 = vsel %vm1407_vm0, %v1310_v40, 0 }
 0x2c7   : > { %v1218_v41 = vpop.permute.xlu0 %1217 }
 0x2c8   : > { %v1238_v42 = vpop.permute.xlu1 %1237  ;;  %5690 = vmatmul.mubr.msk.bf16.gmra.mxu0 %vm1407_vm0, %v1218_v41 }
 0x2c9   : > { %5714 = vmatpush3.bf16.xpose.msra.mxu0 %v1780_v43 }
 0x2ca   : > { %5700 = vmatpush3.bf16.xpose.msra.mxu1 %v1688_v44  ;;  %5944 = vmatprep.subr.msk.bf16.mxu0 %vm1407_vm0, %v1288_v27 }
 0x2cb   : > { %5945 = vmatprep.subr.msk.bf16.mxu1 %vm1407_vm0, %v1302_v28  ;;  %v1296_v45 = vpop.permute.xlu0 %1295 }
 0x2cc   : > { %v7757_v50 = vpop.permute.xlu1 %1315  ;;  %v1866_v12 = vsel %vm1407_vm0, %v1296_v45, 0 }
 0x2cf   : > { %v1228_v51 = vpop.permute.xlu0 %1227 }
 0x2d0   : > { %v7759_v52 = vpop.permute.xlu1 %1313  ;;  %5717 = vmatprep.mubr.msk.bf16.mxu0 %vm1407_vm0, %v1228_v51 }
 0x2d1   : > { %5702 = vmatmul.mubr.msk.bf16.vlgmr.msra.gmra.mxu1 %vm1407_vm0, %v7703_v17  ;;  %5716 = vmatpush3.bf16.xpose.msra.mxu0 %v1777_v53  ;;  %v2047_v31 = vsel %vm1407_vm0, %v7759_v52, 0 }
 0x2d2   : > { %5705 = vmatprep.mubr.msk.bf16.mxu1 %vm1407_vm0, %v1224_v29  ;;  %5726 = vmatpush3.bf16.xpose.msra.mxu1 %v1875_v54 }
 0x2d3   : > { %5946 = vmatprep.subr.msk.bf16.mxu1 %vm1407_vm0, %v7713_v21  ;;  %5949 = vmatprep.subr.msk.bf16.mxu0 %vm1407_vm0, %v1310_v40  ;;  %v1230_v55 = vpop.permute.xlu0 %1229 }
 0x2d4   : > { %v1234_v57 = vpop.permute.xlu1 %1233 }
 0x2d7   : > { %v1318_v60 = vpop.permute.xlu0 %1317 }
 0x2d8   : > { %v1304_v61 = vpop.permute.xlu1 %1303  ;;  %5718 = vmatmul.mubr.msk.bf16.vlgmr.msra.gmra.mxu0 %vm1407_vm0, %v1230_v55  ;;  %v2053_v18 = vsel %vm1407_vm0, %v1318_v60, 0 }
 0x2d9   : > { %5706 = vmatmul.mubr.msk.bf16.gmra.mxu1 %vm1407_vm0, %v1226_v33  ;;  %5742 = vmatpush3.bf16.xpose.msra.mxu0 %v1964_v62  ;;  %v1955_v17 = vsel %vm1407_vm0, %v1304_v61, 0 }
 0x2da   : > { %5728 = vmatpush3.bf16.xpose.msra.mxu1 %v1872_v63  ;;  %5733 = vmatprep.mubr.msk.bf16.mxu1 %vm1407_vm0, %v1236_v35 }
 0x2db   : > { %5947 = vmatprep.subr.msk.bf16.mxu1 %vm1407_vm0, %v7719_v23  ;;  %v1308_v0 = vpop.permute.xlu0 %1307  ;;  %v2050_v23 = vsel %vm1407_vm0, %v7757_v50, 0 }
 0x2dc   : > { %v7778_v1 = vpop.permute.xlu1 %1311  ;;  %5950 = vmatprep.subr.msk.bf16.mxu0 %vm1407_vm0, %v1308_v0  ;;  %v1961_v4 = vsel %vm1407_vm0, %v1308_v0, 0 }
 0x2dd   : > { %v2044_v44 = vsel %vm1407_vm0, %v7778_v1, 0 }
 0x2df   : > { %v1306_v2 = vpop.permute.xlu0 %1305 }
 0x2e0   : > { %v1246_v3 = vpop.permute.xlu1 %1245  ;;  %v1958_v11 = vsel %vm1407_vm0, %v1306_v2, 0 }
 0x2e1   : > { %5744 = vmatpush3.bf16.xpose.msra.mxu0 %v1961_v4 }
 0x2e2   : > { %5730 = vmatpush3.bf16.xpose.msra.mxu1 %v1869_v5  ;;  %5951 = vmatprep.subr.msk.bf16.mxu0 %vm1407_vm0, %v1306_v2 }
 0x2e3   : > { %5948 = vmatprep.subr.msk.bf16.mxu1 %vm1407_vm0, %v1296_v45  ;;  %v1232_v6 = vpop.permute.xlu0 %1231 }
 0x2e4   : > { %v7786_v7 = vpop.permute.xlu1 %1253  ;;  %5721 = vmatprep.mubr.msk.bf16.mxu0 %vm1407_vm0, %v1232_v6 }
 0x2e5   : > { %5722 = vmatmul.mubr.msk.bf16.gmra.mxu0 %vm1407_vm0, %v1234_v57 }
 0x2e7   : > { %v1240_v8 = vpop.permute.xlu0 %1239 }
 0x2e8   : > { %v1250_v9 = vpop.permute.xlu1 %1249 }
 0x2e9   : > { %5746 = vmatpush3.bf16.xpose.msra.mxu0 %v1958_v11 }
 0x2ea   : > { %5732 = vmatpush3.bf16.xpose.msra.mxu1 %v1866_v12  ;;  %5952 = vmatprep.subr.msk.bf16.mxu0 %vm1407_vm0, %v1304_v61 }
 0x2eb   : > { %5953 = vmatprep.subr.msk.bf16.mxu1 %vm1407_vm0, %v1318_v60  ;;  %v1242_v13 = vpop.permute.xlu0 %1241 }
 0x2ec   : > { %v7794_v14 = vpop.permute.xlu1 %1257 }
 0x2ef   : > { %v1244_v15 = vpop.permute.xlu0 %1243 }
 0x2f0   : > { %v7796_v16 = vpop.permute.xlu1 %1329  ;;  %5749 = vmatprep.mubr.msk.bf16.mxu0 %vm1407_vm0, %v1244_v15 }
 0x2f1   : > { %5734 = vmatmul.mubr.msk.bf16.vlgmr.msra.gmra.mxu1 %vm1407_vm0, %v1238_v42  ;;  %5748 = vmatpush3.bf16.xpose.msra.mxu0 %v1955_v17 }
 0x2f2   : > { %5737 = vmatprep.mubr.msk.bf16.mxu1 %vm1407_vm0, %v1240_v8  ;;  %5758 = vmatpush3.bf16.xpose.msra.mxu1 %v2053_v18 }
 0x2f3   : > { %5954 = vmatprep.subr.msk.bf16.mxu1 %vm1407_vm0, %v7757_v50  ;;  %v1252_v19 = vpop.permute.xlu0 %1251 }
 0x2f4   : > { %v7805_v20 = vpop.permute.xlu1 %1323 }
 0x2f5   : > { %9221 = vst [vmem:[#allocation46_spill] sm:$0xff] %v7805_v20 }
 0x2f7   : > { %v1248_v21 = vpop.permute.xlu0 %1247 }
 0x2f8   : > { %v7807_v22 = vpop.permute.xlu1 %1353  ;;  %5750 = vmatmul.mubr.msk.bf16.vlgmr.msra.gmra.mxu0 %vm1407_vm0, %v1246_v3 }
 0x2f9   : > { %9222 = vst [vmem:[#allocation47_spill] sm:$0xff] %v7807_v22  ;;  %5738 = vmatmul.mubr.msk.bf16.gmra.mxu1 %vm1407_vm0, %v1242_v13  ;;  %5753 = vmatprep.mubr.msk.bf16.mxu0 %vm1407_vm0, %v1248_v21 }
 0x2fa   : > { %5760 = vmatpush3.bf16.xpose.msra.mxu1 %v2050_v23  ;;  %5765 = vmatprep.mubr.msk.bf16.mxu1 %vm1407_vm0, %v1252_v19 }
 0x2fb   : > { %5955 = vmatprep.subr.msk.bf16.mxu1 %vm1407_vm0, %v7759_v52  ;;  %v1256_v24 = vpop.permute.xlu0 %1255 }
 0x2fc   : > { %v1340_v25 = vpop.permute.xlu1 %1339 }
 0x2fd   : > { %v7817_v26 = vpop.f32.mrf.mxu0 }
 0x2fe   : > { %v2127_v27 = vsel %vm2120_vm1, %v7817_v26, -inf }
 0x2ff   : > { %2128 = vmax.xlane.f32.xlu0 %v2127_v27  ;;  %v7821_v28 = vpop.f32.mrf.mxu0  ;;  %v7823_v29 = vpop.permute.xlu0 %1327 }
 0x300   : > { %5754 = vmatmul.mubr.msk.bf16.gmra.mxu0 %vm1407_vm0, %v1250_v9  ;;  %v1338_v32 = vpop.permute.xlu1 %1337  ;;  %v2121_v33 = vsel %vm2120_vm1, %v7821_v28, -inf }
 0x301   : > { %v7826_v30 = vpop.f32.mrf.mxu0 }
 0x302   : > { %5762 = vmatpush3.bf16.xpose.msra.mxu1 %v2047_v31  ;;  %v2130_v39 = vsel %vm2120_vm1, %v7826_v30, -inf }
 0x303   : > { %5956 = vmatprep.subr.msk.bf16.mxu1 %vm1407_vm0, %v7778_v1  ;;  %2122 = vmax.xlane.f32.xlu0 %v2121_v33  ;;  %v7834_v34 = vpop.f32.mrf.mxu0  ;;  %v7836_v35 = vpop.permute.xlu0 %1325 }
 0x304   : > { %9223 = vst [vmem:[#allocation48_spill] sm:$0xff] %v7836_v35  ;;  %v2124_v36 = vsel %vm2120_vm1, %v7834_v34, -inf  ;;  %v7848_v43 = vpop.permute.xlu1 %1349 }
 0x305   : > { %2125 = vmax.xlane.f32.xlu1 %v2124_v36  ;;  %v7840_v37 = vpop.f32.mrf.mxu0  ;;  %9224 = vst [vmem:[#allocation49_spill] sm:$0xff] %v7848_v43 }
 0x306   : > { %v2139_v42 = vsel %vm2120_vm1, %v7840_v37, -inf }
 0x307   : > { %2131 = vmax.xlane.f32.xlu0 %v2130_v39  ;;  %v7844_v40 = vpop.f32.mrf.mxu0  ;;  %v1342_v41 = vpop.permute.xlu0 %1341 }
 0x308   : > { %5805 = vmatprep.subr.bf16.mxu0 %v1342_v41  ;;  %v2133_v52 = vsel %vm2120_vm1, %v7844_v40, -inf  ;;  %v1336_v54 = vpop.permute.xlu1 %1335 }
 0x309   : > { %2140 = vmax.xlane.f32.xlu1 %v2139_v42  ;;  %v7852_v45 = vpop.f32.mrf.mxu0  ;;  %5806 = vmatpush3.bf16.msra.mxu0 %v1342_v41 }
 0x30a   : > { %5764 = vmatpush3.bf16.xpose.msra.mxu1 %v2044_v44  ;;  %v2142_v50 = vsel %vm2120_vm1, %v7852_v45, -inf  ;;  %5807 = vmatprep.subr.bf16.mxu0 %v1340_v25 }
 0x30b   : > { %5773 = vmatprep.subr.bf16.mxu1 %v7632_v49  ;;  %2143 = vmax.xlane.f32.xlu0 %v2142_v50  ;;  %v7857_v51 = vpop.f32.mrf.mxu0 }
 0x30c   : > { %v2136_v53 = vsel %vm2120_vm1, %v7857_v51, -inf  ;;  %v7868_v55 = vpop.permute.xlu1 %1365 }
 0x30d   : > { %2134 = vmax.xlane.f32.xlu1 %v2133_v52  ;;  %5808 = vmatpush3.bf16.msra.mxu0 %v1340_v25  ;;  %9225 = vst [vmem:[#allocation50_spill] sm:$0xff] %v7868_v55 }
 0x30e   : > { %5809 = vmatprep.subr.bf16.mxu0 %v1338_v32 }
 0x30f   : > { %2137 = vmax.xlane.f32.xlu0 %v2136_v53 }
 0x311   : > { %5766 = vmatmul.mubr.msk.bf16.vlgmr.msra.gmra.mxu1 %vm1407_vm0, %v7786_v7  ;;  %5810 = vmatpush3.bf16.msra.mxu0 %v1338_v32 }
 0x312   : > { %5769 = vmatprep.mubr.msk.bf16.mxu1 %vm1407_vm0, %v1256_v24  ;;  %5774 = vmatpush3.bf16.msra.mxu1 %v7632_v49  ;;  %v7879_v49 = vpop.permute.xlu1 %1377 }
 0x313   : > { %5775 = vmatprep.subr.bf16.mxu1 %v7648_v59  ;;  %5811 = vmatprep.subr.bf16.mxu0 %v1336_v54  ;;  %9226 = vst [vmem:[#allocation51_spill] sm:$0xff] %v7879_v49 }
 0x315   : > { %5812 = vmatpush3.bf16.msra.mxu0 %v1336_v54 }
 0x316   : > { %5776 = vmatpush3.bf16.msra.mxu1 %v7648_v59  ;;  %5837 = vmatprep.subr.bf16.mxu0 %v7868_v55  ;;  %v7881_v57 = vpop.permute.xlu1 %1363  ;;  %v7883_v59 = vpop.permute.xlu0 %1351 }
 0x317   : > { %5777 = vmatprep.subr.bf16.mxu1 %v7655_v56  ;;  %9227 = vst [vmem:[#allocation52_spill] sm:$0xff] %v7881_v57  ;;  %9228 = vst [vmem:[#allocation53_spill] sm:$0xff] %v7883_v59 }
 0x319   : > { %5770 = vmatmul.mubr.msk.bf16.gmra.mxu1 %vm1407_vm0, %v7794_v14 }
 0x31a   : > { %5778 = vmatpush3.bf16.msra.mxu1 %v7655_v56  ;;  %v7887_v61 = vpop.permute.xlu1 %1361  ;;  %v7895_v0 = vpop.permute.xlu0 %1347 }
 0x31b   : > { %5779 = vmatprep.subr.bf16.mxu1 %v7638_v48  ;;  %9229 = vst [vmem:[#allocation54_spill] sm:$0xff] %v7887_v61  ;;  %9230 = vst [vmem:[#allocation55_spill] sm:$0xff] %v7895_v0 }
 0x31e   : > { %5780 = vmatpush3.bf16.msra.mxu1 %v7638_v48  ;;  %v7899_v2 = vpop.permute.xlu1 %1373  ;;  %v7909_v7 = vpop.permute.xlu0 %1375 }
 0x31f   : > { %5789 = vmatprep.subr.bf16.mxu1 %v7796_v16  ;;  %9231 = vst [vmem:[#allocation56_spill] sm:$0xff] %v7899_v2  ;;  %9232 = vst [vmem:[#allocation57_spill] sm:$0xff] %v7909_v7 }
 0x322   : > { %v7913_v9 = vpop.permute.xlu1 %1371  ;;  %v7921_v14 = vpop.permute.xlu0 %1359 }
 0x323   : > { %9233 = vst [vmem:[#allocation58_spill] sm:$0xff] %v7913_v9  ;;  %9234 = vst [vmem:[#allocation59_spill] sm:$0xff] %v7921_v14 }
 0x326   : > { %v7931_v21 = vpop.permute.xlu1 %1401  ;;  %v7939_v27 = vpop.permute.xlu0 %1389 }
 0x327   : > { %9235 = vst [vmem:[#allocation60_spill] sm:$0xff] %v7931_v21  ;;  %9236 = vst [vmem:[#allocation61_spill] sm:$0xff] %v7939_v27 }
 0x32a   : > { %v7943_v32 = vpop.permute.xlu1 %1387  ;;  %v7957_v50 = vpop.permute.xlu0 %1399 }
 0x32b   : > { %9237 = vst [vmem:[#allocation62_spill] sm:$0xff] %v7943_v32  ;;  %9238 = vst [vmem:[#allocation63_spill] sm:$0xff] %v7957_v50 }
 0x32e   : > { %v7961_v53 = vpop.permute.xlu1 %1385 }
 0x32f   : > { %9239 = vst [vmem:[#allocation64_spill] sm:$0xff] %v7961_v53 }
 0x370   : > { %v7885_v60 = vpop.f32.mrf.mxu1 }
 0x371   : > { %v2151_v62 = vsel %vm2120_vm1, %v7885_v60, -inf }
 0x372   : > { %v7891_v56 = vpop.f32.mrf.mxu1  ;;  %2152 = vmax.xlane.f32.xlu1 %v2151_v62 }
 0x373   : > { %v2145_v11 = vsel %vm2120_vm1, %v7891_v56, -inf }
 0x374   : > { %v7893_v63 = vpop.f32.mrf.mxu1 }
 0x375   : > { %v2154_v1 = vsel %vm2120_vm1, %v7893_v63, -inf }
 0x376   : > { %2155 = vmax.xlane.f32.xlu0 %v2154_v1  ;;  %v7905_v5 = vpop.f32.mrf.mxu1 }
 0x377   : > { %v2148_v17 = vsel %vm2120_vm1, %v7905_v5, -inf }
 0x378   : > { %v7901_v3 = vpop.f32.mrf.mxu0  ;;  %v7919_v13 = vpop.f32.mrf.mxu1 }
 0x379   : > { %v2175_v4 = vsel %vm2120_vm1, %v7901_v3, -inf  ;;  %v2163_v23 = vsel %vm2120_vm1, %v7919_v13, -inf }
 0x37a   : > { %2176 = vmax.xlane.f32.xlu1 %v2175_v4  ;;  %v7907_v6 = vpop.f32.mrf.mxu0  ;;  %v7927_v18 = vpop.f32.mrf.mxu1 }
 0x37b   : > { %v2169_v15 = vsel %vm2120_vm1, %v7907_v6, -inf  ;;  %v2157_v42 = vsel %vm2120_vm1, %v7927_v18, -inf }
 0x37c   : > { %v7911_v8 = vpop.f32.mrf.mxu0  ;;  %v7937_v25 = vpop.f32.mrf.mxu1 }
 0x37d   : > { %v2178_v12 = vsel %vm2120_vm1, %v7911_v8, -inf  ;;  %v2166_v33 = vsel %vm2120_vm1, %v7937_v25, -inf }
 0x37e   : > { %2146 = vmax.xlane.f32.xlu1 %v2145_v11  ;;  %2179 = vmax.xlane.f32.xlu0 %v2178_v12  ;;  %v7929_v19 = vpop.f32.mrf.mxu0  ;;  %v7959_v52 = vpop.f32.mrf.mxu1 }
 0x37f   : > { %v2172_v24 = vsel %vm2120_vm1, %v7929_v19, -inf  ;;  %v2160_v1 = vsel %vm2120_vm1, %v7959_v52, -inf }
 0x382   : > { %2170 = vmax.xlane.f32.xlu1 %v2169_v15  ;;  %2149 = vmax.xlane.f32.xlu0 %v2148_v17  ;;  %v7973_v15 = vpop.permute.xlu1 %1397 }
 0x383   : > { %9240 = vst [vmem:[#allocation65_spill] sm:$0xff] %v7973_v15 }
 0x386   : > { %2164 = vmax.xlane.f32.xlu1 %v2163_v23  ;;  %2173 = vmax.xlane.f32.xlu0 %v2172_v24 }
 0x388   : > { %v7941_v31 = vpop.f32.mrf.mxu0  ;;  %v2129_v4 = vpop.xlane.xlu0 %2128 }
 0x389   : > { %v2187_v36 = vsel %vm2120_vm1, %v7941_v31, -inf }
 0x38a   : > { %2167 = vmax.xlane.f32.xlu0 %v2166_v33  ;;  %2188 = vmax.xlane.f32.xlu1 %v2187_v36  ;;  %v7949_v39 = vpop.f32.mrf.mxu0 }
 0x38b   : > { %v2181_v62 = vsel %vm2120_vm1, %v7949_v39, -inf }
 0x38c   : > { %v7951_v41 = vpop.f32.mrf.mxu0  ;;  %v2123_v33 = vpop.xlane.xlu0 %2122 }
 0x38d   : > { %v2190_v44 = vsel %vm2120_vm1, %v7951_v41, -inf }
 0x38e   : > { %2158 = vmax.xlane.f32.xlu1 %v2157_v42  ;;  %2191 = vmax.xlane.f32.xlu0 %v2190_v44  ;;  %v7969_v11 = vpop.f32.mrf.mxu0  ;;  %v2126_v42 = vpop.xlane.xlu1 %2125 }
 0x38f   : > { %v2184_v23 = vsel %vm2120_vm1, %v7969_v11, -inf }
 0x390   : > { %v2132_v10 = vpop.xlane.xlu0 %2131 }
 0x391   : > { %v7963_v54 = vpop.f32.mrf.mxu1  ;;  %v2316_v50 = vsub.f32 %v7826_v30, %v2132_v10 }
 0x392   : > { %2182 = vmax.xlane.f32.xlu1 %v2181_v62  ;;  %2161 = vmax.xlane.f32.xlu0 %v2160_v1  ;;  %v2199_v17 = vsel %vm2120_vm1, %v7963_v54, -inf }
 0x393   : > { %v7971_v12 = vpop.f32.mrf.mxu1  ;;  %v2383_v10 = vmul.f32 1.442695, %v2316_v50 }
 0x395   : > { %v7979_v24 = vpop.f32.mrf.mxu1 }
 0x396   : > { %2200 = vmax.xlane.f32.xlu1 %v2199_v17  ;;  %2185 = vmax.xlane.f32.xlu0 %v2184_v23  ;;  %v2202_v44 = vsel %vm2120_vm1, %v7979_v24, -inf  ;;  %v2315_v17 = vsub.f32 %v7817_v26, %v2129_v4  ;;  %v2193_v23 = vsel %vm2120_vm1, %v7971_v12, -inf }
 0x397   : > { %v7987_v1 = vpop.f32.mrf.mxu1 }
 0x398   : > { %v7981_v36 = vpop.f32.mrf.mxu0  ;;  %v2381_v15 = vmul.f32 1.442695, %v2315_v17  ;;  %v2196_v4 = vsel %vm2120_vm1, %v7987_v1, -inf }
 0x399   : > { %v2223_v62 = vsel %vm2120_vm1, %v7981_v36, -inf  ;;  %v7998_v46 = vpop.f32.mrf.mxu1 }
 0x39a   : > { %2203 = vmax.xlane.f32.xlu0 %v2202_v44  ;;  %2224 = vmax.xlane.f32.xlu1 %v2223_v62  ;;  %v7989_v38 = vpop.f32.mrf.mxu0  ;;  %v2313_v44 = vsub.f32 %v7821_v28, %v2123_v33  ;;  %v2141_v62 = vpop.xlane.xlu1 %2140  ;;  %6248 = vpow2.f32 %v2381_v15  ;;  %v2211_v17 = vsel %vm2120_vm1, %v7998_v46, -inf }
 0x39b   : > { %v2217_v26 = vsel %vm2120_vm1, %v7989_v38, -inf  ;;  %v8006_v21 = vpop.f32.mrf.mxu1  ;;  %v2319_v28 = vsub.f32 %v7840_v37, %v2141_v62  ;;  %v2144_v33 = vpop.xlane.xlu0 %2143 }
 0x39c   : > { %v7991_v47 = vpop.f32.mrf.mxu0  ;;  %v2320_v50 = vsub.f32 %v7852_v45, %v2144_v33 }
 0x39d   : > { %v2226_v58 = vsel %vm2120_vm1, %v7991_v47, -inf  ;;  %v8018_v2 = vpop.f32.mrf.mxu1  ;;  %v2389_v37 = vmul.f32 1.442695, %v2319_v28 }
 0x39e   : > { %2194 = vmax.xlane.f32.xlu1 %v2193_v23  ;;  %2227 = vmax.xlane.f32.xlu0 %v2226_v58  ;;  %v8008_v53 = vpop.f32.mrf.mxu0  ;;  %v2314_v58 = vsub.f32 %v7834_v34, %v2126_v42  ;;  %v2377_v23 = vmul.f32 1.442695, %v2313_v44  ;;  %v2135_v32 = vpop.xlane.xlu1 %2134  ;;  %v2214_v44 = vsel %vm2120_vm1, %v8018_v2, -inf }
 0x39f   : > { %v2220_v9 = vsel %vm2120_vm1, %v8008_v53, -inf  ;;  %v2317_v15 = vsub.f32 %v7844_v40, %v2135_v32  ;;  %v2205_v40 = vsel %vm2120_vm1, %v8006_v21, -inf }
 0x3a0   : > { %v2379_v34 = vmul.f32 1.442695, %v2314_v58  ;;  %6250 = vpow2.f32 %v2377_v23  ;;  %v8035_v23 = vpop.f32.mrf.mxu1 }
 0x3a1   : > { %6252 = vpow2.f32 %v2383_v10  ;;  %v2385_v58 = vmul.f32 1.442695, %v2317_v15  ;;  %v2208_v10 = vsel %vm2120_vm1, %v8035_v23, -inf }
 0x3a2   : > { %2218 = vmax.xlane.f32.xlu1 %v2217_v26  ;;  %2197 = vmax.xlane.f32.xlu0 %v2196_v4  ;;  %v2138_v26 = vpop.xlane.xlu0 %2137  ;;  %6254 = vpow2.f32 %v2379_v34 }
 0x3a3   : > { %6256 = vpow2.f32 %v2389_v37  ;;  %v2318_v45 = vsub.f32 %v7857_v51, %v2138_v26 }
 0x3a5   : > { %v8012_v30 = vpop.f32.mrf.mxu0  ;;  %v2387_v28 = vmul.f32 1.442695, %v2318_v45 }
 0x3a6   : > { %2212 = vmax.xlane.f32.xlu1 %v2211_v17  ;;  %2221 = vmax.xlane.f32.xlu0 %v2220_v9  ;;  %v2235_v62 = vsel %vm2120_vm1, %v8012_v30, -inf  ;;  %v2391_v9 = vmul.f32 1.442695, %v2320_v50 }
 0x3a7   : > { %v8020_v42 = vpop.f32.mrf.mxu0  ;;  %v8041_v51 = vpop.eup %6248 }
 0x3a8   : > { %6258 = vpow2.f32 %v2391_v9  ;;  %v2229_v33 = vsel %vm2120_vm1, %v8020_v42, -inf  ;;  %v2511_v37 = vsel %vm2120_vm1, %v8041_v51, 0.0 }
 0x3a9   : > { %v8028_v4 = vpop.f32.mrf.mxu0  ;;  %6260 = vpow2.f32 %v2385_v58 }
 0x3aa   : > { %2215 = vmax.xlane.f32.xlu0 %v2214_v44  ;;  %2236 = vmax.xlane.f32.xlu1 %v2235_v62  ;;  %v2238_v32 = vsel %vm2120_vm1, %v8028_v4, -inf  ;;  %6262 = vpow2.f32 %v2387_v28 }
 0x3ab   : > { %v8043_v17 = vpop.f32.mrf.mxu0 }
 0x3ac   : > { %v2232_v50 = vsel %vm2120_vm1, %v8043_v17, -inf }
 0x3ad   : > { %v8045_v34 = vpop.eup %6250 }
 0x3ae   : > { %2206 = vmax.xlane.f32.xlu1 %v2205_v40  ;;  %2239 = vmax.xlane.f32.xlu0 %v2238_v32  ;;  %v8051_v15 = vpop.eup %6252  ;;  %v2505_v9 = vsel %vm2120_vm1, %v8045_v34, 0.0 }
 0x3af   : > { %v8053_v44 = vpop.eup %6254  ;;  %v2514_v58 = vsel %vm2120_vm1, %v8051_v15, 0.0 }
 0x3b0   : > { %v8057_v26 = vpop.eup %6256  ;;  %v2508_v28 = vsel %vm2120_vm1, %v8053_v44, 0.0 }
 0x3b1   : > { %v8055_v62 = vpop.f32.mrf.mxu1  ;;  %v2523_v32 = vsel %vm2120_vm1, %v8057_v26, 0.0 }
 0x3b2   : > { %2230 = vmax.xlane.f32.xlu1 %v2229_v33  ;;  %2209 = vmax.xlane.f32.xlu0 %v2208_v10 }
 0x3b3   : > { %v8063_v45 = vpop.f32.mrf.mxu1 }
 0x3b4   : > { %v2241_v0 = vsel %vm2120_vm1, %v8063_v45, -inf }
 0x3b5   : > { %v8065_v40 = vpop.eup %6258  ;;  %v8073_v10 = vpop.f32.mrf.mxu1 }
 0x3b6   : > { %2512 = vadd.xlane.f32.xlu1 %v2511_v37  ;;  %2233 = vmax.xlane.f32.xlu0 %v2232_v50  ;;  %v8071_v33 = vpop.eup %6260  ;;  %v2526_v50 = vsel %vm2120_vm1, %v8065_v40, 0.0  ;;  %v2250_v14 = vsel %vm2120_vm1, %v8073_v10, -inf }
 0x3b7   : > { %v2517_v37 = vsel %vm2120_vm1, %v8071_v33, 0.0  ;;  %v8083_v7 = vpop.f32.mrf.mxu1 }
 0x3b8   : > { %9241 = vst [vmem:[#allocation66_spill] sm:$0xff] %v8083_v7 }
 0x3b9   : > { %v8091_v49 = vpop.f32.mrf.mxu1 }
 0x3ba   : > { %2506 = vadd.xlane.f32.xlu1 %v2505_v9  ;;  %2515 = vadd.xlane.f32.xlu0 %v2514_v58  ;;  %v8079_v9 = vpop.eup %6262  ;;  %v8081_v58 = vpop.f32.mrf.mxu0  ;;  %v2259_v59 = vsel %vm2120_vm1, %v8091_v49, -inf }
 0x3bb   : > { %v8099_v61 = vpop.f32.mrf.mxu1 }
 0x3bc   : > { %v8089_v27 = vpop.f32.mrf.mxu0  ;;  %9242 = vst [vmem:[#allocation67_spill] sm:$0xff] %v8099_v61  ;;  %v2253_v35 = vsel %vm2120_vm1, %v8099_v61, -inf }
 0x3bd   : > { %v8107_v57 = vpop.f32.mrf.mxu1  ;;  %v2265_v43 = vsel %vm2120_vm1, %v8089_v27, -inf }
 0x3be   : > { %2524 = vadd.xlane.f32.xlu1 %v2523_v32  ;;  %2509 = vadd.xlane.f32.xlu0 %v2508_v28  ;;  %v2247_v32 = vsel %vm2120_vm1, %v8055_v62, -inf  ;;  %v2520_v28 = vsel %vm2120_vm1, %v8079_v9, 0.0  ;;  %9243 = vst [vmem:[#allocation68_spill] sm:$0xff] %v8107_v57  ;;  %v2262_v22 = vsel %vm2120_vm1, %v8107_v57, -inf }
 0x3bf   : > { %v8115_v55 = vpop.f32.mrf.mxu1 }
 0x3c0   : > { %9245 = vst [vmem:[#allocation70_spill] sm:$0xff] %v8115_v55  ;;  %v2256_v57 = vsel %vm2120_vm1, %v8115_v55, -inf }
 0x3c2   : > { %2518 = vadd.xlane.f32.xlu1 %v2517_v37  ;;  %2527 = vadd.xlane.f32.xlu0 %v2526_v50  ;;  %v2271_v37 = vsel %vm2120_vm1, %v8081_v58, -inf  ;;  %v8097_v50 = vpop.f32.mrf.mxu0 }
 0x3c6   : > { %2248 = vmax.xlane.f32.xlu1 %v2247_v32  ;;  %2521 = vadd.xlane.f32.xlu0 %v2520_v28  ;;  %v2274_v32 = vsel %vm2120_vm1, %v8097_v50, -inf  ;;  %v8105_v28 = vpop.f32.mrf.mxu0 }
 0x3ca   : > { %2251 = vmax.xlane.f32.xlu0 %v2250_v14  ;;  %2272 = vmax.xlane.f32.xlu1 %v2271_v37  ;;  %v2244_v14 = vsel %vm2120_vm1, %v8083_v7, -inf  ;;  %v8113_v37 = vpop.f32.mrf.mxu0 }
 0x3cb   : > { %9244 = vst [vmem:[#allocation69_spill] sm:$0xff] %v8113_v37 }
 0x3ce   : > { %2242 = vmax.xlane.f32.xlu1 %v2241_v0  ;;  %2275 = vmax.xlane.f32.xlu0 %v2274_v32  ;;  %v2268_v0 = vsel %vm2120_vm1, %v8105_v28, -inf  ;;  %v8121_v32 = vpop.f32.mrf.mxu0 }
 0x3cf   : > { %9246 = vst [vmem:[#allocation71_spill] sm:$0xff] %v8121_v32 }
 0x3d1   : > { %v8123_v48 = vpop.f32.mrf.mxu1 }
 0x3d2   : > { %2266 = vmax.xlane.f32.xlu1 %v2265_v43  ;;  %2245 = vmax.xlane.f32.xlu0 %v2244_v14  ;;  %9247 = vst [vmem:[#allocation72_spill] sm:$0xff] %v8123_v48  ;;  %v2283_v43 = vsel %vm2120_vm1, %v8113_v37, -inf  ;;  %v8129_v14 = vpop.f32.mrf.mxu0 }
 0x3d3   : > { %9248 = vst [vmem:[#allocation73_spill] sm:$0xff] %v8129_v14  ;;  %v8131_v20 = vpop.f32.mrf.mxu1  ;;  %v2286_v7 = vsel %vm2120_vm1, %v8129_v14, -inf }
 0x3d4   : > { %9249 = vst [vmem:[#allocation74_spill] sm:$0xff] %v8131_v20  ;;  %v8143_v37 = vpop.f32.mrf.mxu0 }
 0x3d5   : > { %9251 = vst [vmem:[#allocation76_spill] sm:$0xff] %v8143_v37  ;;  %v2280_v14 = vsel %vm2120_vm1, %v8143_v37, -inf }
 0x3d6   : > { %2260 = vmax.xlane.f32.xlu1 %v2259_v59  ;;  %2269 = vmax.xlane.f32.xlu0 %v2268_v0  ;;  %v8137_v59 = vpop.f32.mrf.mxu1  ;;  %v2277_v0 = vsel %vm2120_vm1, %v8121_v32, -inf }
 0x3d7   : > { %9250 = vst [vmem:[#allocation75_spill] sm:$0xff] %v8137_v59  ;;  %v2298_v55 = vsel %vm2120_vm1, %v8137_v59, -inf }
 0x3da   : > { %2263 = vmax.xlane.f32.xlu0 %v2262_v22  ;;  %2284 = vmax.xlane.f32.xlu1 %v2283_v43  ;;  %v8145_v22 = vpop.f32.mrf.mxu1  ;;  %v2295_v43 = vsel %vm2120_vm1, %v8123_v48, -inf }
 0x3db   : > { %9252 = vst [vmem:[#allocation77_spill] sm:$0xff] %v8145_v22 }
 0x3de   : > { %2254 = vmax.xlane.f32.xlu1 %v2253_v35  ;;  %2287 = vmax.xlane.f32.xlu0 %v2286_v7  ;;  %v8151_v35 = vpop.f32.mrf.mxu1  ;;  %v2289_v7 = vsel %vm2120_vm1, %v8131_v20, -inf }
 0x3df   : > { %9253 = vst [vmem:[#allocation78_spill] sm:$0xff] %v8151_v35 }
 0x3e0   : > { %v8157_v32 = vpop.f32.mrf.mxu1 }
 0x3e1   : > { %9254 = vst [vmem:[#allocation79_spill] sm:$0xff] %v8157_v32 }
 0x3e2   : > { %2278 = vmax.xlane.f32.xlu1 %v2277_v0  ;;  %2257 = vmax.xlane.f32.xlu0 %v2256_v57  ;;  %v2307_v57 = vsel %vm2120_vm1, %v8151_v35, -inf  ;;  %v2292_v0 = vsel %vm2120_vm1, %v8145_v22, -inf  ;;  %v8163_v37 = vpop.f32.mrf.mxu1 }
 0x3e3   : > { %9255 = vst [vmem:[#allocation80_spill] sm:$0xff] %v8163_v37 }
 0x3e4   : > { %v8169_v59 = vpop.f32.mrf.mxu1 }
 0x3e5   : > { %9256 = vst [vmem:[#allocation81_spill] sm:$0xff] %v8169_v59 }
 0x3e6   : > { %2296 = vmax.xlane.f32.xlu1 %v2295_v43  ;;  %2281 = vmax.xlane.f32.xlu0 %v2280_v14  ;;  %v2301_v14 = vsel %vm2120_vm1, %v8157_v32, -inf  ;;  %v2310_v43 = vsel %vm2120_vm1, %v8163_v37, -inf }
 0x3ea   : > { %2290 = vmax.xlane.f32.xlu1 %v2289_v7  ;;  %2299 = vmax.xlane.f32.xlu0 %v2298_v55  ;;  %v2304_v55 = vsel %vm2120_vm1, %v8169_v59, -inf }
 0x3ee   : > { %2308 = vmax.xlane.f32.xlu1 %v2307_v57  ;;  %2293 = vmax.xlane.f32.xlu0 %v2292_v0 }
 0x3f2   : > { %2302 = vmax.xlane.f32.xlu1 %v2301_v14  ;;  %2311 = vmax.xlane.f32.xlu0 %v2310_v43 }
 0x3f6   : > { %2305 = vmax.xlane.f32.xlu0 %v2304_v55 }
 0x3fb   : > { %v2153_v7 = vpop.xlane.xlu1 %2152 }
 0x3fc   : > { %v2323_v22 = vsub.f32 %v7885_v60, %v2153_v7 }
 0x3fe   : > { %v2397_v35 = vmul.f32 1.442695, %v2323_v22 }
 0x3ff   : > { %v2156_v57 = vpop.xlane.xlu0 %2155 }
 0x400   : > { %6264 = vpow2.f32 %v2397_v35  ;;  %v2324_v43 = vsub.f32 %v7893_v63, %v2156_v57 }
 0x402   : > { %v2399_v35 = vmul.f32 1.442695, %v2324_v43 }
 0x403   : > { %v2177_v0 = vpop.xlane.xlu1 %2176 }
 0x404   : > { %v2331_v32 = vsub.f32 %v7901_v3, %v2177_v0 }
 0x406   : > { %v2413_v20 = vmul.f32 1.442695, %v2331_v32 }
 0x407   : > { %v2147_v48 = vpop.xlane.xlu1 %2146  ;;  %v2180_v37 = vpop.xlane.xlu0 %2179 }
 0x408   : > { %6266 = vpow2.f32 %v2413_v20  ;;  %v2321_v14 = vsub.f32 %v7891_v56, %v2147_v48  ;;  %v2332_v7 = vsub.f32 %v7911_v8, %v2180_v37 }
 0x40a   : > { %v2393_v61 = vmul.f32 1.442695, %v2321_v14 }
 0x40b   : > { %v2171_v59 = vpop.xlane.xlu1 %2170  ;;  %v2150_v55 = vpop.xlane.xlu0 %2149 }
 0x40c   : > { %6268 = vpow2.f32 %v2393_v61  ;;  %v2329_v60 = vsub.f32 %v7907_v6, %v2171_v59  ;;  %v2322_v48 = vsub.f32 %v7905_v5, %v2150_v55  ;;  %v2415_v61 = vmul.f32 1.442695, %v2332_v7 }
 0x40d   : > { %v8178_v22 = vpop.eup %6264 }
 0x40e   : > { %v2409_v3 = vmul.f32 1.442695, %v2329_v60  ;;  %v2535_v32 = vsel %vm2120_vm1, %v8178_v22, 0.0  ;;  %v2395_v57 = vmul.f32 1.442695, %v2322_v48 }
 0x40f   : > { %v2165_v20 = vpop.xlane.xlu1 %2164  ;;  %v2174_v0 = vpop.xlane.xlu0 %2173  ;;  %2536 = vadd.xlane.f32.xlu1 %v2535_v32 }
 0x410   : > { %6270 = vpow2.f32 %v2409_v3  ;;  %v2327_v56 = vsub.f32 %v7919_v13, %v2165_v20  ;;  %v2330_v14 = vsub.f32 %v7929_v19, %v2174_v0 }
 0x411   : > { %6272 = vpow2.f32 %v2399_v35 }
 0x412   : > { %v2405_v63 = vmul.f32 1.442695, %v2327_v56  ;;  %v2411_v7 = vmul.f32 1.442695, %v2330_v14 }
 0x413   : > { %v2168_v6 = vpop.xlane.xlu0 %2167  ;;  %v2189_v59 = vpop.xlane.xlu1 %2188 }
 0x414   : > { %6274 = vpow2.f32 %v2405_v63  ;;  %v2335_v8 = vsub.f32 %v7941_v31, %v2189_v59  ;;  %v2328_v31 = vsub.f32 %v7937_v25, %v2168_v6 }
 0x415   : > { %v8186_v37 = vpop.eup %6266  ;;  %6276 = vpow2.f32 %v2415_v61 }
 0x416   : > { %v2421_v43 = vmul.f32 1.442695, %v2335_v8  ;;  %v2559_v5 = vsel %vm2120_vm1, %v8186_v37, 0.0  ;;  %6278 = vpow2.f32 %v2395_v57  ;;  %v2407_v61 = vmul.f32 1.442695, %v2328_v31 }
 0x417   : > { %v2159_v55 = vpop.xlane.xlu1 %2158  ;;  %v2192_v13 = vpop.xlane.xlu0 %2191  ;;  %2560 = vadd.xlane.f32.xlu0 %v2559_v5 }
 0x418   : > { %v2325_v60 = vsub.f32 %v7927_v18, %v2159_v55  ;;  %6280 = vpow2.f32 %v2421_v43  ;;  %v2336_v32 = vsub.f32 %v7951_v41, %v2192_v13 }
 0x419   : > { %v8192_v35 = vpop.eup %6268 }
 0x41a   : > { %v2401_v3 = vmul.f32 1.442695, %v2325_v60  ;;  %v2529_v19 = vsel %vm2120_vm1, %v8192_v35, 0.0  ;;  %v2423_v59 = vmul.f32 1.442695, %v2336_v32 }
 0x41b   : > { %v2183_v20 = vpop.xlane.xlu1 %2182  ;;  %v2162_v0 = vpop.xlane.xlu0 %2161  ;;  %2530 = vadd.xlane.f32.xlu1 %v2529_v19 }
 0x41c   : > { %6282 = vpow2.f32 %v2401_v3  ;;  %v2333_v48 = vsub.f32 %v7949_v39, %v2183_v20  ;;  %v2326_v25 = vsub.f32 %v7959_v52, %v2162_v0 }
 0x41d   : > { %v8199_v56 = vpop.eup %6270  ;;  %6284 = vpow2.f32 %v2411_v7 }
 0x41e   : > { %v8201_v18 = vpop.eup %6272  ;;  %v2417_v63 = vmul.f32 1.442695, %v2333_v48  ;;  %v2553_v6 = vsel %vm2120_vm1, %v8199_v56, 0.0  ;;  %v2403_v43 = vmul.f32 1.442695, %v2326_v25 }
 0x41f   : > { %v2201_v41 = vpop.xlane.xlu1 %2200  ;;  %v2186_v57 = vpop.xlane.xlu0 %2185  ;;  %2554 = vadd.xlane.f32.xlu0 %v2553_v6  ;;  %v2538_v39 = vsel %vm2120_vm1, %v8201_v18, 0.0 }
 0x420   : > { %6286 = vpow2.f32 %v2417_v63  ;;  %v2334_v5 = vsub.f32 %v7969_v11, %v2186_v57  ;;  %v2339_v11 = vsub.f32 %v7963_v54, %v2201_v41 }
 0x421   : > { %v8206_v8 = vpop.eup %6274  ;;  %6288 = vpow2.f32 %v2407_v61 }
 0x422   : > { %v8210_v14 = vpop.eup %6276  ;;  %v2547_v52 = vsel %vm2120_vm1, %v8206_v8, 0.0  ;;  %6290 = vpow2.f32 %v2423_v59  ;;  %v2419_v19 = vmul.f32 1.442695, %v2334_v5  ;;  %v2429_v6 = vmul.f32 1.442695, %v2339_v11 }
 0x423   : > { %v2204_v55 = vpop.xlane.xlu0 %2203  ;;  %v2225_v13 = vpop.xlane.xlu1 %2224  ;;  %2548 = vadd.xlane.f32.xlu1 %v2547_v52  ;;  %2539 = vadd.xlane.f32.xlu0 %v2538_v39  ;;  %v2562_v31 = vsel %vm2120_vm1, %v8210_v14, 0.0  ;;  %6292 = vpow2.f32 %v2403_v43 }
 0x424   : > { %v2347_v60 = vsub.f32 %v7981_v36, %v2225_v13  ;;  %v8216_v7 = vpop.eup %6278  ;;  %v2340_v63 = vsub.f32 %v7979_v24, %v2204_v55 }
 0x425   : > { %v8220_v3 = vpop.eup %6280  ;;  %v2532_v25 = vsel %vm2120_vm1, %v8216_v7, 0.0 }
 0x426   : > { %v2445_v32 = vmul.f32 1.442695, %v2347_v60  ;;  %v2571_v48 = vsel %vm2120_vm1, %v8220_v3, 0.0  ;;  %v2431_v43 = vmul.f32 1.442695, %v2340_v63 }
 0x427   : > { %v2195_v20 = vpop.xlane.xlu1 %2194  ;;  %v2228_v0 = vpop.xlane.xlu0 %2227  ;;  %2563 = vadd.xlane.f32.xlu0 %v2562_v31  ;;  %2572 = vadd.xlane.f32.xlu1 %v2571_v48 }
 0x428   : > { %v2337_v36 = vsub.f32 %v7971_v12, %v2195_v20  ;;  %6294 = vpow2.f32 %v2445_v32  ;;  %v2348_v52 = vsub.f32 %v7991_v47, %v2228_v0 }
 0x429   : > { %v8226_v61 = vpop.eup %6282  ;;  %6296 = vpow2.f32 %v2419_v19 }
 0x42a   : > { %v8231_v54 = vpop.eup %6284  ;;  %v2425_v59 = vmul.f32 1.442695, %v2337_v36  ;;  %v2541_v41 = vsel %vm2120_vm1, %v8226_v61, 0.0  ;;  %v2447_v20 = vmul.f32 1.442695, %v2348_v52 }
 0x42b   : > { %v2219_v57 = vpop.xlane.xlu1 %2218  ;;  %v2198_v39 = vpop.xlane.xlu0 %2197  ;;  %2533 = vadd.xlane.f32.xlu0 %v2532_v25  ;;  %2542 = vadd.xlane.f32.xlu1 %v2541_v41  ;;  %v2556_v5 = vsel %vm2120_vm1, %v8231_v54, 0.0 }
 0x42c   : > { %6298 = vpow2.f32 %v2425_v59  ;;  %v2345_v12 = vsub.f32 %v7989_v38, %v2219_v57  ;;  %v2338_v32 = vsub.f32 %v7987_v1, %v2198_v39 }
 0x42d   : > { %v8236_v24 = vpop.eup %6286  ;;  %6300 = vpow2.f32 %v2429_v6 }
 0x42e   : > { %v2441_v55 = vmul.f32 1.442695, %v2345_v12  ;;  %v2565_v13 = vsel %vm2120_vm1, %v8236_v24, 0.0  ;;  %v8243_v60 = vpop.eup %6288 }
 0x42f   : > { %v2213_v31 = vpop.xlane.xlu1 %2212  ;;  %v2222_v11 = vpop.xlane.xlu0 %2221  ;;  %2557 = vadd.xlane.f32.xlu0 %v2556_v5  ;;  %2566 = vadd.xlane.f32.xlu1 %v2565_v13  ;;  %v2550_v0 = vsel %vm2120_vm1, %v8243_v60, 0.0 }
 0x430   : > { %v8245_v38 = vpop.eup %6290  ;;  %6302 = vpow2.f32 %v2441_v55  ;;  %v2343_v19 = vsub.f32 %v7998_v46, %v2213_v31  ;;  %v2427_v46 = vmul.f32 1.442695, %v2338_v32  ;;  %v2346_v6 = vsub.f32 %v8008_v53, %v2222_v11 }
 0x431   : > { %6304 = vpow2.f32 %v2431_v43  ;;  %v8251_v48 = vpop.eup %6292  ;;  %v2574_v25 = vsel %vm2120_vm1, %v8245_v38, 0.0 }
 0x432   : > { %v2437_v47 = vmul.f32 1.442695, %v2343_v19  ;;  %v2544_v41 = vsel %vm2120_vm1, %v8251_v48, 0.0  ;;  %v2443_v52 = vmul.f32 1.442695, %v2346_v6 }
 0x433   : > { %v2216_v36 = vpop.xlane.xlu0 %2215  ;;  %v2237_v63 = vpop.xlane.xlu1 %2236  ;;  %2551 = vadd.xlane.f32.xlu0 %v2550_v0  ;;  %2575 = vadd.xlane.f32.xlu1 %v2574_v25 }
 0x434   : > { %6306 = vpow2.f32 %v2437_v47  ;;  %v2344_v1 = vsub.f32 %v8018_v2, %v2216_v36  ;;  %v2351_v2 = vsub.f32 %v8012_v30, %v2237_v63 }
 0x435   : > { %v8256_v59 = vpop.eup %6294  ;;  %6308 = vpow2.f32 %v2447_v20 }
 0x436   : > { %v8261_v57 = vpop.eup %6296  ;;  %v2607_v43 = vsel %vm2120_vm1, %v8256_v59, 0.0  ;;  %6310 = vpow2.f32 %v2427_v46  ;;  %v2439_v55 = vmul.f32 1.442695, %v2344_v1  ;;  %v2453_v0 = vmul.f32 1.442695, %v2351_v2 }
 0x437   : > { %v2207_v39 = vpop.xlane.xlu1 %2206  ;;  %v2240_v12 = vpop.xlane.xlu0 %2239  ;;  %2545 = vadd.xlane.f32.xlu0 %v2544_v41  ;;  %2608 = vadd.xlane.f32.xlu1 %v2607_v43  ;;  %v2568_v11 = vsel %vm2120_vm1, %v8261_v57, 0.0 }
 0x438   : > { %v2341_v5 = vsub.f32 %v8006_v21, %v2207_v39  ;;  %v2352_v43 = vsub.f32 %v8028_v4, %v2240_v12 }
 0x439   : > { %v8266_v53 = vpop.eup %6298 }
 0x43a   : > { %v2433_v13 = vmul.f32 1.442695, %v2341_v5  ;;  %v2577_v31 = vsel %vm2120_vm1, %v8266_v53, 0.0  ;;  %v8273_v19 = vpop.eup %6300 }
 0x43b   : > { %v2231_v32 = vpop.xlane.xlu1 %2230  ;;  %v2210_v20 = vpop.xlane.xlu0 %2209  ;;  %2569 = vadd.xlane.f32.xlu0 %v2568_v11  ;;  %2578 = vadd.xlane.f32.xlu1 %v2577_v31  ;;  %v2583_v46 = vsel %vm2120_vm1, %v8273_v19, 0.0  ;;  %v2455_v31 = vmul.f32 1.442695, %v2352_v43 }
 0x43c   : > { %6312 = vpow2.f32 %v2433_v13  ;;  %v2349_v21 = vsub.f32 %v8020_v42, %v2231_v32  ;;  %v2342_v47 = vsub.f32 %v8035_v23, %v2210_v20 }
 0x43d   : > { %v8277_v30 = vpop.eup %6302  ;;  %6314 = vpow2.f32 %v2443_v52 }
 0x43e   : > { %v8279_v36 = vpop.eup %6304  ;;  %6316 = vpow2.f32 %v2439_v55  ;;  %v2435_v63 = vmul.f32 1.442695, %v2342_v47  ;;  %v2601_v25 = vsel %vm2120_vm1, %v8277_v30, 0.0  ;;  %v2449_v42 = vmul.f32 1.442695, %v2349_v21 }
 0x43f   : > { %v2513_v6 = vpop.xlane.xlu1 %2512  ;;  %v2234_v1 = vpop.xlane.xlu0 %2233  ;;  %2584 = vadd.xlane.f32.xlu0 %v2583_v46  ;;  %2602 = vadd.xlane.f32.xlu1 %v2601_v25  ;;  %6318 = vpow2.f32 %v2453_v0  ;;  %v2586_v39 = vsel %vm2120_vm1, %v8279_v36, 0.0 }
 0x440   : > { %v2350_v23 = vsub.f32 %v8043_v17, %v2234_v1  ;;  %6320 = vpow2.f32 %v2435_v63 }
 0x441   : > { %v8286_v41 = vpop.eup %6306  ;;  %6322 = vpow2.f32 %v2449_v42 }
 0x442   : > { %v2451_v5 = vmul.f32 1.442695, %v2350_v23  ;;  %v2595_v52 = vsel %vm2120_vm1, %v8286_v41, 0.0  ;;  %v8293_v2 = vpop.eup %6308 }
 0x443   : > { %v2507_v55 = vpop.xlane.xlu1 %2506  ;;  %v2516_v13 = vpop.xlane.xlu0 %2515  ;;  %2587 = vadd.xlane.f32.xlu0 %v2586_v39  ;;  %2596 = vadd.xlane.f32.xlu1 %v2595_v52  ;;  %v2610_v4 = vsel %vm2120_vm1, %v8293_v2, 0.0 }
 0x444   : > { %6324 = vpow2.f32 %v2451_v5  ;;  %v8295_v17 = vpop.eup %6310 }
 0x445   : > { %6326 = vrcp.f32 %v2516_v13  ;;  %v2580_v47 = vsel %vm2120_vm1, %v8295_v17, 0.0 }
 0x446   : > { %6328 = vrcp.f32 %v2507_v55 }
 0x447   : > { %v2525_v12 = vpop.xlane.xlu1 %2524  ;;  %v2510_v11 = vpop.xlane.xlu0 %2509  ;;  %2611 = vadd.xlane.f32.xlu0 %v2610_v4  ;;  %6330 = vrcp.f32 %v2513_v6 }
 0x448   : > { %6332 = vrcp.f32 %v2510_v11 }
 0x449   : > { %v8299_v32 = vpop.eup %6312  ;;  %6334 = vpow2.f32 %v2455_v31 }
 0x44a   : > { %v8301_v20 = vpop.eup %6314  ;;  %v2589_v21 = vsel %vm2120_vm1, %v8299_v32, 0.0 }
 0x44b   : > { %v8307_v0 = vpop.eup %6316  ;;  %v2519_v63 = vpop.xlane.xlu1 %2518  ;;  %2590 = vadd.xlane.f32.xlu1 %v2589_v21  ;;  %2581 = vadd.xlane.f32.xlu0 %v2580_v47  ;;  %v2604_v1 = vsel %vm2120_vm1, %v8301_v20, 0.0 }
 0x44c   : > { %v2528_v25 = vpop.xlane.xlu0 %2527  ;;  %6336 = vrcp.f32 %v2519_v63  ;;  %v8309_v46 = vpop.eup %6318  ;;  %v2598_v6 = vsel %vm2120_vm1, %v8307_v0, 0.0 }
 0x44d   : > { %9257 = vst [vmem:[#allocation82_spill] sm:$0xff] %v8309_v46  ;;  %6338 = vrcp.f32 %v2528_v25  ;;  %v8315_v42 = vpop.eup %6320  ;;  %v2619_v31 = vsel %vm2120_vm1, %v8309_v46, 0.0 }
 0x44e   : > { %6340 = vrcp.f32 %v2525_v12  ;;  %v8318_v5 = vpop.eup %6322  ;;  %v2592_v13 = vsel %vm2120_vm1, %v8315_v42, 0.0 }
 0x44f   : > { %v2249_v23 = vpop.xlane.xlu1 %2248  ;;  %2599 = vadd.xlane.f32.xlu1 %v2598_v6  ;;  %2605 = vadd.xlane.f32.xlu0 %v2604_v1  ;;  %9258 = vst [vmem:[#allocation83_spill] sm:$0xff] %v8318_v5 }
 0x450   : > { %v2522_v39 = vpop.xlane.xlu0 %2521  ;;  %v2355_v43 = vsub.f32 %v8055_v62, %v2249_v23  ;;  %v2613_v23 = vsel %vm2120_vm1, %v8318_v5, 0.0 }
 0x451   : > { %6342 = vrcp.f32 %v2522_v39  ;;  %v8320_v52 = vpop.eup %6324 }
 0x452   : > { %9259 = vst [vmem:[#allocation84_spill] sm:$0xff] %v8320_v52  ;;  %v2461_v55 = vmul.f32 1.442695, %v2355_v43  ;;  %v6327_v4 = vpop.eup %6326  ;;  %v2616_v1 = vsel %vm2120_vm1, %v8320_v52, 0.0 }
 0x453   : > { %v2273_v11 = vpop.xlane.xlu1 %2272  ;;  %2593 = vadd.xlane.f32.xlu1 %v2592_v13  ;;  %2620 = vadd.xlane.f32.xlu0 %v2619_v31  ;;  %v6329_v21 = vpop.eup %6328  ;;  %v2764_v25 = vmul.f32 %v6327_v4, %v8051_v15 }
 0x454   : > { %v2252_v12 = vpop.xlane.xlu0 %2251  ;;  %6344 = vpow2.f32 %v2461_v55  ;;  %v2363_v62 = vsub.f32 %v8081_v58, %v2273_v11  ;;  %v6331_v47 = vpop.eup %6330  ;;  %v2761_v55 = vmul.f32 %v6329_v21, %v8045_v34 }
 0x455   : > { %v6333_v63 = vpop.eup %6332  ;;  %v2763_v31 = vmul.f32 %v6331_v47, %v8041_v51  ;;  %v2356_v4 = vsub.f32 %v8073_v10, %v2252_v12 }
 0x456   : > { %v2477_v6 = vmul.f32 1.442695, %v2363_v62  ;;  %v8332_v39 = vpop.eup %6334  ;;  %v2762_v58 = vmul.f32 %v6333_v63, %v8053_v44 }
 0x457   : > { %v2243_v43 = vpop.xlane.xlu1 %2242  ;;  %2617 = vadd.xlane.f32.xlu1 %v2616_v1  ;;  %2614 = vadd.xlane.f32.xlu0 %v2613_v23  ;;  %v2826_v5 = vpack.c.bf16 %v2764_v25, %v2763_v31  ;;  %v2622_v52 = vsel %vm2120_vm1, %v8332_v39, 0.0  ;;  %v2463_v10 = vmul.f32 1.442695, %v2356_v4 }
 0x458   : > { %v2276_v13 = vpop.xlane.xlu0 %2275  ;;  %v2353_v15 = vsub.f32 %v8063_v45, %v2243_v43  ;;  %6346 = vpow2.f32 %v2477_v6  ;;  %v2825_v11 = vpack.c.bf16 %v2762_v58, %v2761_v55 }
 0x459   : > { %v6337_v62 = vpop.eup %6336  ;;  %v2364_v12 = vsub.f32 %v8097_v50, %v2276_v13 }
 0x45a   : > { %v2457_v46 = vmul.f32 1.442695, %v2353_v15  ;;  %v6339_v1 = vpop.eup %6338  ;;  %5781 = vmatprep.mubr.msk.bf16.mxu1 %vm2120_vm1, %v2825_v11  ;;  %v2765_v63 = vmul.f32 %v6337_v62, %v8071_v33  ;;  %v9260_v33 = vld [vmem:[#allocation66_spill] sm:$0xff]  ;;  %v9262_v15 = vld [vmem:[#allocation69_spill] sm:$0xff] }
 0x45b   : > { %v2267_v34 = vpop.xlane.xlu1 %2266  ;;  %2623 = vadd.xlane.f32.xlu0 %v2622_v52  ;;  %v6341_v44 = vpop.eup %6340  ;;  %5782 = vmatmul.mubr.msk.bf16.vlgmr.msra.gmra.mxu1 %vm2120_vm1, %v2826_v5  ;;  %v2768_v52 = vmul.f32 %v6339_v1, %v8065_v40  ;;  %v2479_v43 = vmul.f32 1.442695, %v2364_v12  ;;  %v9261_v40 = vld [vmem:[#allocation48_spill] sm:$0xff]  ;;  %v9263_v11 = vld [vmem:[#allocation46_spill] sm:$0xff]  ;;  %v9265_v12 = vld [vmem:[#allocation47_spill] sm:$0xff] }
 0x45c   : > { %v2246_v21 = vpop.xlane.xlu0 %2245  ;;  %6348 = vpow2.f32 %v2457_v46  ;;  %v2361_v51 = vsub.f32 %v8089_v27, %v2267_v34  ;;  %5790 = vmatpush3.bf16.msra.mxu1 %v7796_v16  ;;  %v2767_v5 = vmul.f32 %v6341_v44, %v8057_v26 }
 0x45d   : > { %5791 = vmatprep.subr.bf16.mxu1 %v7823_v29 }
 0x45e   : > { %v6343_v45 = vpop.eup %6342  ;;  %v2473_v47 = vmul.f32 1.442695, %v2361_v51  ;;  %v2828_v26 = vpack.c.bf16 %v2768_v52, %v2767_v5  ;;  %v9266_v52 = vld [vmem:[#allocation71_spill] sm:$0xff] }
 0x45f   : > { %v2766_v25 = vmul.f32 %v6343_v45, %v8079_v9  ;;  %v2261_v46 = vpop.xlane.xlu1 %2260  ;;  %v2354_v9 = vsub.f32 %v9260_v33, %v2246_v21  ;;  %v9264_v21 = vld [vmem:[#allocation67_spill] sm:$0xff] }
 0x460   : > { %v2270_v6 = vpop.xlane.xlu0 %2269  ;;  %6350 = vpow2.f32 %v2473_v47  ;;  %v2359_v27 = vsub.f32 %v8091_v49, %v2261_v46  ;;  %5792 = vmatpush3.bf16.msra.mxu1 %v7823_v29 }
 0x461   : > { %v2362_v50 = vsub.f32 %v8105_v28, %v2270_v6  ;;  %v2827_v23 = vpack.c.bf16 %v2766_v25, %v2765_v63  ;;  %v8353_v16 = vpop.eup %6344  ;;  %6352 = vpow2.f32 %v2463_v10  ;;  %5793 = vmatprep.subr.bf16.mxu1 %v9261_v40  ;;  %v2459_v31 = vmul.f32 1.442695, %v2354_v9 }
 0x462   : > { %v2631_v49 = vsel %vm2120_vm1, %v8353_v16, 0.0  ;;  %v2469_v55 = vmul.f32 1.442695, %v2359_v27  ;;  %v9267_v27 = vld [vmem:[#allocation68_spill] sm:$0xff] }
 0x463   : > { %v2475_v13 = vmul.f32 1.442695, %v2362_v50  ;;  %5785 = vmatprep.mubr.msk.bf16.mxu1 %vm2120_vm1, %v2827_v23  ;;  %v2285_v58 = vpop.xlane.xlu1 %2284  ;;  %2632 = vadd.xlane.f32.xlu1 %v2631_v49 }
 0x464   : > { %v2264_v28 = vpop.xlane.xlu0 %2263  ;;  %5786 = vmatmul.mubr.msk.bf16.gmra.mxu1 %vm2120_vm1, %v2828_v26  ;;  %v2367_v4 = vsub.f32 %v9262_v15, %v2285_v58  ;;  %v9269_v26 = vld [vmem:[#allocation76_spill] sm:$0xff] }
 0x465   : > { %6354 = vpow2.f32 %v2475_v13  ;;  %5794 = vmatpush3.bf16.msra.mxu1 %v9261_v40  ;;  %v8363_v29 = vpop.eup %6346  ;;  %v2360_v50 = vsub.f32 %v9267_v27, %v2264_v28  ;;  %v9268_v13 = vld [vmem:[#allocation72_spill] sm:$0xff] }
 0x466   : > { %6356 = vpow2.f32 %v2479_v43  ;;  %5795 = vmatprep.subr.bf16.mxu1 %v9263_v11  ;;  %v2655_v34 = vsel %vm2120_vm1, %v8363_v29, 0.0  ;;  %v2485_v45 = vmul.f32 1.442695, %v2367_v4 }
 0x467   : > { %6358 = vpow2.f32 %v2469_v55  ;;  %v2255_v62 = vpop.xlane.xlu1 %2254  ;;  %2656 = vadd.xlane.f32.xlu0 %v2655_v34  ;;  %v9270_v55 = vld [vmem:[#allocation73_spill] sm:$0xff]  ;;  %v2471_v15 = vmul.f32 1.442695, %v2360_v50 }
 0x468   : > { %v2288_v1 = vpop.xlane.xlu0 %2287  ;;  %v2357_v44 = vsub.f32 %v9264_v21, %v2255_v62  ;;  %6360 = vpow2.f32 %v2459_v31 }
 0x469   : > { %v8370_v51 = vpop.eup %6348  ;;  %5796 = vmatpush3.bf16.msra.mxu1 %v9263_v11  ;;  %v2368_v58 = vsub.f32 %v9270_v55, %v2288_v1  ;;  %v9271_v1 = vld [vmem:[#allocation74_spill] sm:$0xff] }
 0x46a   : > { %v2465_v10 = vmul.f32 1.442695, %v2357_v44  ;;  %5821 = vmatprep.subr.bf16.mxu1 %v9265_v12  ;;  %v2625_v47 = vsel %vm2120_vm1, %v8370_v51, 0.0 }
 0x46b   : > { %2626 = vadd.xlane.f32.xlu1 %v2625_v47  ;;  %v2279_v63 = vpop.xlane.xlu1 %2278  ;;  %v2487_v47 = vmul.f32 1.442695, %v2368_v58 }
 0x46c   : > { %v2258_v25 = vpop.xlane.xlu0 %2257  ;;  %6362 = vpow2.f32 %v2465_v10  ;;  %v2365_v46 = vsub.f32 %v9266_v52, %v2279_v63  ;;  %v9272_v63 = vld [vmem:[#allocation70_spill] sm:$0xff] }
 0x46d   : > { %v8377_v6 = vpop.eup %6350  ;;  %6364 = vpow2.f32 %v2485_v45  ;;  %v2358_v52 = vsub.f32 %v9272_v63, %v2258_v25 }
 0x46e   : > { %v8379_v5 = vpop.eup %6352  ;;  %v2481_v23 = vmul.f32 1.442695, %v2365_v46  ;;  %v2649_v43 = vsel %vm2120_vm1, %v8377_v6, 0.0 }
 0x46f   : > { %v2297_v33 = vpop.xlane.xlu1 %2296  ;;  %2650 = vadd.xlane.f32.xlu0 %v2649_v43  ;;  %v2634_v28 = vsel %vm2120_vm1, %v8379_v5, 0.0  ;;  %v2467_v25 = vmul.f32 1.442695, %v2358_v52 }
 0x470   : > { %v2282_v9 = vpop.xlane.xlu0 %2281  ;;  %v2371_v40 = vsub.f32 %v9268_v13, %v2297_v33  ;;  %6366 = vpow2.f32 %v2481_v23 }
 0x471   : > { %v2366_v49 = vsub.f32 %v9269_v26, %v2282_v9  ;;  %v9273_v9 = vld [vmem:[#allocation78_spill] sm:$0xff]  ;;  %v9274_v26 = vld [vmem:[#allocation75_spill] sm:$0xff] }
 0x472   : > { %v8387_v31 = vpop.eup %6354  ;;  %v2493_v62 = vmul.f32 1.442695, %v2371_v40 }
 0x473   : > { %v2483_v4 = vmul.f32 1.442695, %v2366_v49  ;;  %v8391_v11 = vpop.eup %6356  ;;  %v2652_v34 = vsel %vm2120_vm1, %v8387_v31, 0.0  ;;  %v2291_v21 = vpop.xlane.xlu1 %2290  ;;  %2635 = vadd.xlane.f32.xlu0 %v2634_v28 }
 0x474   : > { %v2300_v44 = vpop.xlane.xlu0 %2299  ;;  %v8395_v45 = vpop.eup %6358  ;;  %2653 = vadd.xlane.f32.xlu1 %v2652_v34  ;;  %v2369_v10 = vsub.f32 %v9271_v1, %v2291_v21  ;;  %v2658_v46 = vsel %vm2120_vm1, %v8391_v11, 0.0 }
 0x475   : > { %6368 = vpow2.f32 %v2483_v4  ;;  %v8401_v27 = vpop.eup %6360  ;;  %v2643_v23 = vsel %vm2120_vm1, %v8395_v45, 0.0  ;;  %v2372_v49 = vsub.f32 %v9274_v26, %v2300_v44 }
 0x476   : > { %6370 = vpow2.f32 %v2471_v15  ;;  %v2489_v50 = vmul.f32 1.442695, %v2369_v10  ;;  %v2628_v58 = vsel %vm2120_vm1, %v8401_v27, 0.0  ;;  %v9277_v10 = vld [vmem:[#allocation77_spill] sm:$0xff] }
 0x477   : > { %6372 = vpow2.f32 %v2493_v62  ;;  %v2309_v43 = vpop.xlane.xlu1 %2308  ;;  %2659 = vadd.xlane.f32.xlu0 %v2658_v46  ;;  %v9276_v62 = vld [vmem:[#allocation79_spill] sm:$0xff]  ;;  %v2495_v1 = vmul.f32 1.442695, %v2372_v49 }
 0x478   : > { %v2294_v33 = vpop.xlane.xlu0 %2293  ;;  %2644 = vadd.xlane.f32.xlu1 %v2643_v23  ;;  %v2375_v13 = vsub.f32 %v9273_v9, %v2309_v43  ;;  %6374 = vpow2.f32 %v2487_v47  ;;  %v9278_v23 = vld [vmem:[#allocation80_spill] sm:$0xff] }
 0x479   : > { %v8406_v40 = vpop.eup %6362  ;;  %6376 = vpow2.f32 %v2489_v50  ;;  %v2370_v44 = vsub.f32 %v9277_v10, %v2294_v33 }
 0x47a   : > { %v2637_v55 = vsel %vm2120_vm1, %v8406_v40, 0.0  ;;  %v8413_v15 = vpop.eup %6364  ;;  %v2501_v4 = vmul.f32 1.442695, %v2375_v13  ;;  %6378 = vpow2.f32 %v2467_v25 }
 0x47b   : > { %9275 = vst [vmem:[#allocation66_spill] sm:$0xff] %v8413_v15  ;;  %v2303_v28 = vpop.xlane.xlu1 %2302  ;;  %2629 = vadd.xlane.f32.xlu0 %v2628_v58  ;;  %v2667_v47 = vsel %vm2120_vm1, %v8413_v15, 0.0  ;;  %v2491_v50 = vmul.f32 1.442695, %v2370_v44  ;;  %v9281_v58 = vld [vmem:[#allocation81_spill] sm:$0xff] }
 0x47c   : > { %2638 = vadd.xlane.f32.xlu1 %v2637_v55  ;;  %v2373_v34 = vsub.f32 %v9276_v62, %v2303_v28  ;;  %v2312_v21 = vpop.xlane.xlu0 %2311  ;;  %6380 = vpow2.f32 %v2501_v4 }
 0x47d   : > { %v8419_v63 = vpop.eup %6366  ;;  %6382 = vpow2.f32 %v2495_v1  ;;  %v2376_v43 = vsub.f32 %v9278_v23, %v2312_v21 }
 0x47e   : > { %v2497_v52 = vmul.f32 1.442695, %v2373_v34  ;;  %v2661_v9 = vsel %vm2120_vm1, %v8419_v63, 0.0 }
 0x47f   : > { %2668 = vadd.xlane.f32.xlu0 %v2667_v47  ;;  %v2503_v55 = vmul.f32 1.442695, %v2376_v43 }
 0x480   : > { %6384 = vpow2.f32 %v2497_v52  ;;  %v2306_v33 = vpop.xlane.xlu0 %2305 }
 0x481   : > { %6386 = vpow2.f32 %v2491_v50  ;;  %v2374_v4 = vsub.f32 %v9281_v58, %v2306_v33 }
 0x482   : > { %v8421_v46 = vpop.eup %6368  ;;  %6388 = vpow2.f32 %v2503_v55 }
 0x483   : > { %v8426_v13 = vpop.eup %6370  ;;  %2662 = vadd.xlane.f32.xlu0 %v2661_v9  ;;  %v2664_v25 = vsel %vm2120_vm1, %v8421_v46, 0.0  ;;  %v2499_v21 = vmul.f32 1.442695, %v2374_v4 }
 0x484   : > { %v8430_v26 = vpop.eup %6372  ;;  %2665 = vadd.xlane.f32.xlu1 %v2664_v25  ;;  %v2646_v28 = vsel %vm2120_vm1, %v8426_v13, 0.0 }
 0x485   : > { %9279 = vst [vmem:[#allocation48_spill] sm:$0xff] %v8430_v26  ;;  %v8432_v49 = vpop.eup %6374  ;;  %v2679_v62 = vsel %vm2120_vm1, %v8430_v26, 0.0  ;;  %6390 = vpow2.f32 %v2499_v21 }
 0x486   : > { %9280 = vst [vmem:[#allocation69_spill] sm:$0xff] %v8432_v49  ;;  %v8439_v34 = vpop.eup %6376  ;;  %v2670_v1 = vsel %vm2120_vm1, %v8432_v49, 0.0 }
 0x487   : > { %2647 = vadd.xlane.f32.xlu0 %v2646_v28  ;;  %9282 = vst [vmem:[#allocation46_spill] sm:$0xff] %v8439_v34  ;;  %v8443_v10 = vpop.eup %6378  ;;  %v2673_v44 = vsel %vm2120_vm1, %v8439_v34, 0.0 }
 0x488   : > { %2680 = vadd.xlane.f32.xlu1 %v2679_v62  ;;  %v2640_v52 = vsel %vm2120_vm1, %v8443_v10, 0.0 }
 0x489   : > { %v8447_v47 = vpop.eup %6380 }
 0x48a   : > { %9283 = vst [vmem:[#allocation67_spill] sm:$0xff] %v8447_v47  ;;  %v8451_v50 = vpop.eup %6382  ;;  %v2691_v23 = vsel %vm2120_vm1, %v8447_v47, 0.0 }
 0x48b   : > { %2671 = vadd.xlane.f32.xlu0 %v2670_v1  ;;  %9284 = vst [vmem:[#allocation47_spill] sm:$0xff] %v8451_v50  ;;  %v2682_v9 = vsel %vm2120_vm1, %v8451_v50, 0.0 }
 0x48c   : > { %2674 = vadd.xlane.f32.xlu1 %v2673_v44  ;;  %v9289_v44 = vld [vmem:[#allocation45_spill] sm:$0xff] }
 0x48d   : > { %v8455_v43 = vpop.eup %6384 }
 0x48e   : > { %9285 = vst [vmem:[#allocation71_spill] sm:$0xff] %v8455_v43  ;;  %v8459_v33 = vpop.eup %6386  ;;  %v2685_v25 = vsel %vm2120_vm1, %v8455_v43, 0.0 }
 0x48f   : > { %2641 = vadd.xlane.f32.xlu0 %v2640_v52  ;;  %9286 = vst [vmem:[#allocation68_spill] sm:$0xff] %v8459_v33  ;;  %v2676_v55 = vsel %vm2120_vm1, %v8459_v33, 0.0  ;;  %v8465_v58 = vpop.eup %6388 }
 0x490   : > { %2692 = vadd.xlane.f32.xlu1 %v2691_v23  ;;  %9287 = vst [vmem:[#allocation72_spill] sm:$0xff] %v8465_v58  ;;  %v2694_v4 = vsel %vm2120_vm1, %v8465_v58, 0.0 }
 0x492   : > { %v8469_v28 = vpop.eup %6390 }
 0x493   : > { %2683 = vadd.xlane.f32.xlu0 %v2682_v9  ;;  %9288 = vst [vmem:[#allocation76_spill] sm:$0xff] %v8469_v28  ;;  %v2688_v62 = vsel %vm2120_vm1, %v8469_v28, 0.0 }
 0x494   : > { %2686 = vadd.xlane.f32.xlu1 %v2685_v25 }
 0x497   : > { %2677 = vadd.xlane.f32.xlu0 %v2676_v55 }
 0x498   : > { %v2537_v21 = vpop.xlane.xlu1 %2536 }
 0x49b   : > { %2695 = vadd.xlane.f32.xlu0 %v2694_v4 }
 0x49f   : > { %2689 = vadd.xlane.f32.xlu0 %v2688_v62 }
 0x4a0   : > { %v2561_v1 = vpop.xlane.xlu0 %2560 }
 0x4a4   : > { %v2531_v52 = vpop.xlane.xlu1 %2530 }
 0x4a5   : > { %1395 = vrot.lane.b32.xlu1 %v9289_v44, %s6991_s21 }
 0x4a8   : > { %v2555_v23 = vpop.xlane.xlu0 %2554 }
 0x4ac   : > { %v2549_v9 = vpop.xlane.xlu1 %2548  ;;  %v2540_v25 = vpop.xlane.xlu0 %2539 }
 0x4ad   : > { %6392 = vrcp.f32 %v2540_v25 }
 0x4ae   : > { %6394 = vrcp.f32 %v2531_v52 }
 0x4af   : > { %6396 = vrcp.f32 %v2537_v21 }
 0x4b0   : > { %v2564_v55 = vpop.xlane.xlu0 %2563  ;;  %v2573_v47 = vpop.xlane.xlu1 %2572 }
 0x4b4   : > { %v2534_v43 = vpop.xlane.xlu0 %2533  ;;  %v2543_v4 = vpop.xlane.xlu1 %2542 }
 0x4b5   : > { %6398 = vrcp.f32 %v2534_v43  ;;  %1383 = vrot.lane.b32.xlu0 %v9289_v44, %s6990_s23 }
 0x4b6   : > { %6400 = vrcp.f32 %v2564_v55 }
 0x4b7   : > { %6402 = vrcp.f32 %v2555_v23 }
 0x4b8   : > { %6404 = vrcp.f32 %v2561_v1  ;;  %v2558_v62 = vpop.xlane.xlu0 %2557  ;;  %v2567_v28 = vpop.xlane.xlu1 %2566 }
 0x4b9   : > { %6406 = vrcp.f32 %v2558_v62 }
 0x4ba   : > { %v6393_v49 = vpop.eup %6392 }
 0x4bb   : > { %v6395_v25 = vpop.eup %6394  ;;  %v2772_v44 = vmul.f32 %v6393_v49, %v8201_v18 }
 0x4bc   : > { %v2552_v58 = vpop.xlane.xlu0 %2551  ;;  %v2576_v15 = vpop.xlane.xlu1 %2575  ;;  %v2769_v1 = vmul.f32 %v6395_v25, %v8192_v35 }
 0x4bd   : > { %6408 = vrcp.f32 %v2552_v58  ;;  %v6397_v52 = vpop.eup %6396 }
 0x4be   : > { %6410 = vrcp.f32 %v2543_v4  ;;  %v2771_v58 = vmul.f32 %v6397_v52, %v8178_v22 }
 0x4bf   : > { %6412 = vrcp.f32 %v2549_v9 }
 0x4c0   : > { %v2546_v21 = vpop.xlane.xlu0 %2545  ;;  %v2609_v26 = vpop.xlane.xlu1 %2608  ;;  %v2830_v18 = vpack.c.bf16 %v2772_v44, %v2771_v58 }
 0x4c1   : > { %6414 = vrcp.f32 %v2546_v21 }
 0x4c2   : > { %v6399_v43 = vpop.eup %6398  ;;  %6416 = vrcp.f32 %v2576_v15 }
 0x4c3   : > { %v6401_v23 = vpop.eup %6400  ;;  %6418 = vrcp.f32 %v2567_v28  ;;  %v2770_v55 = vmul.f32 %v6399_v43, %v8216_v7  ;;  %v9290_v28 = vld [vmem:[#allocation53_spill] sm:$0xff] }
 0x4c4   : > { %v6403_v62 = vpop.eup %6402  ;;  %6420 = vrcp.f32 %v2573_v47  ;;  %v2570_v4 = vpop.xlane.xlu0 %2569  ;;  %v2780_v50 = vmul.f32 %v6401_v23, %v8210_v14  ;;  %v9292_v43 = vld [vmem:[#allocation49_spill] sm:$0xff] }
 0x4c5   : > { %v6405_v9 = vpop.eup %6404  ;;  %v2579_v33 = vpop.xlane.xlu1 %2578  ;;  %6422 = vrcp.f32 %v2570_v4  ;;  %v2829_v34 = vpack.c.bf16 %v2770_v55, %v2769_v1  ;;  %v2777_v15 = vmul.f32 %v6403_v62, %v8199_v56 }
 0x4c6   : > { %v6407_v21 = vpop.eup %6406  ;;  %v2779_v7 = vmul.f32 %v6405_v9, %v8186_v37  ;;  %v9291_v37 = vld [vmem:[#allocation50_spill] sm:$0xff]  ;;  %6424 = vrcp.f32 %v2609_v26 }
 0x4c7   : > { %5797 = vmatprep.mubr.msk.bf16.mxu1 %vm2120_vm1, %v2829_v34  ;;  %v2778_v35 = vmul.f32 %v6407_v21, %v8231_v54 }
 0x4c8   : > { %5798 = vmatmul.mubr.msk.bf16.vlgmr.msra.gmra.mxu1 %vm2120_vm1, %v2830_v18  ;;  %v2585_v22 = vpop.xlane.xlu0 %2584  ;;  %v2834_v25 = vpack.c.bf16 %v2780_v50, %v2779_v7 }
 0x4c9   : > { %5822 = vmatpush3.bf16.msra.mxu1 %v9265_v12  ;;  %v2833_v49 = vpack.c.bf16 %v2778_v35, %v2777_v15  ;;  %v2603_v47 = vpop.xlane.xlu1 %2602  ;;  %v9293_v12 = vld [vmem:[#allocation52_spill] sm:$0xff]  ;;  %v9294_v15 = vld [vmem:[#allocation55_spill] sm:$0xff] }
 0x4ca   : > { %5823 = vmatprep.subr.bf16.mxu1 %v9290_v28  ;;  %v6409_v14 = vpop.eup %6408 }
 0x4cb   : > { %5813 = vmatprep.mubr.msk.bf16.mxu0 %vm2120_vm1, %v2833_v49  ;;  %v6411_v34 = vpop.eup %6410  ;;  %v2776_v44 = vmul.f32 %v6409_v14, %v8243_v60  ;;  %v9295_v60 = vld [vmem:[#allocation54_spill] sm:$0xff] }
 0x4cc   : > { %5814 = vmatmul.mubr.msk.bf16.vlgmr.msra.gmra.mxu0 %vm2120_vm1, %v2834_v25  ;;  %v2588_v56 = vpop.xlane.xlu0 %2587  ;;  %v6413_v54 = vpop.eup %6412  ;;  %v2773_v23 = vmul.f32 %v6411_v34, %v8226_v61  ;;  %v9297_v25 = vld [vmem:[#allocation51_spill] sm:$0xff] }
 0x4cd   : > { %5824 = vmatpush3.bf16.msra.mxu1 %v9290_v28  ;;  %5838 = vmatpush3.bf16.msra.mxu0 %v9291_v37  ;;  %v2597_v62 = vpop.xlane.xlu1 %2596  ;;  %v2775_v4 = vmul.f32 %v6413_v54, %v8206_v8  ;;  %6426 = vrcp.f32 %v2588_v56  ;;  %v9296_v28 = vld [vmem:[#allocation59_spill] sm:$0xff] }
 0x4ce   : > { %v6415_v52 = vpop.eup %6414  ;;  %5825 = vmatprep.subr.bf16.mxu1 %v9292_v43  ;;  %5839 = vmatprep.subr.bf16.mxu0 %v9293_v12  ;;  %6428 = vrcp.f32 %v2579_v33  ;;  %v9298_v33 = vld [vmem:[#allocation61_spill] sm:$0xff] }
 0x4cf   : > { %v6417_v50 = vpop.eup %6416  ;;  %v2774_v1 = vmul.f32 %v6415_v52, %v8251_v48  ;;  %v2832_v61 = vpack.c.bf16 %v2776_v44, %v2775_v4  ;;  %6430 = vrcp.f32 %v2585_v22 }
 0x4d0   : > { %v6419_v55 = vpop.eup %6418  ;;  %v2612_v58 = vpop.xlane.xlu0 %2611  ;;  %v2784_v48 = vmul.f32 %v6417_v50, %v8245_v38 }
 0x4d1   : > { %v6421_v9 = vpop.eup %6420  ;;  %5826 = vmatpush3.bf16.msra.mxu1 %v9292_v43  ;;  %5840 = vmatpush3.bf16.msra.mxu0 %v9293_v12  ;;  %v2831_v21 = vpack.c.bf16 %v2774_v1, %v2773_v23  ;;  %v2781_v8 = vmul.f32 %v6419_v55, %v8236_v24 }
 0x4d2   : > { %v6423_v18 = vpop.eup %6422  ;;  %5827 = vmatprep.subr.bf16.mxu1 %v9294_v15  ;;  %5841 = vmatprep.subr.bf16.mxu0 %v9295_v60  ;;  %v2783_v26 = vmul.f32 %v6421_v9, %v8220_v3 }
 0x4d3   : > { %5801 = vmatprep.mubr.msk.bf16.mxu1 %vm2120_vm1, %v2831_v21  ;;  %v2782_v35 = vmul.f32 %v6423_v18, %v8261_v57  ;;  %v6425_v34 = vpop.eup %6424 }
 0x4d4   : > { %v2591_v7 = vpop.xlane.xlu1 %2590  ;;  %5802 = vmatmul.mubr.msk.bf16.gmra.mxu1 %vm2120_vm1, %v2832_v61  ;;  %v2582_v49 = vpop.xlane.xlu0 %2581  ;;  %v2836_v24 = vpack.c.bf16 %v2784_v48, %v2783_v26  ;;  %v9299_v48 = vld [vmem:[#allocation57_spill] sm:$0xff]  ;;  %v9300_v26 = vld [vmem:[#allocation56_spill] sm:$0xff] }
 0x4d5   : > { %5828 = vmatpush3.bf16.msra.mxu1 %v9294_v15  ;;  %5842 = vmatpush3.bf16.msra.mxu0 %v9295_v60  ;;  %v2835_v38 = vpack.c.bf16 %v2782_v35, %v2781_v8  ;;  %6432 = vrcp.f32 %v2582_v49 }
 0x4d6   : > { %5843 = vmatprep.subr.bf16.mxu0 %v9296_v28  ;;  %5853 = vmatprep.subr.bf16.mxu1 %v9297_v25  ;;  %6434 = vrcp.f32 %v2612_v58 }
 0x4d7   : > { %5817 = vmatprep.mubr.msk.bf16.mxu0 %vm2120_vm1, %v2835_v38  ;;  %6436 = vrcp.f32 %v2603_v47  ;;  %v9302_v38 = vld [vmem:[#allocation84_spill] sm:$0xff] }
 0x4d8   : > { %v2600_v57 = vpop.xlane.xlu1 %2599  ;;  %5818 = vmatmul.mubr.msk.bf16.gmra.mxu0 %vm2120_vm1, %v2836_v24  ;;  %v2606_v3 = vpop.xlane.xlu0 %2605  ;;  %6438 = vrcp.f32 %v2591_v7 }
 0x4d9   : > { %5844 = vmatpush3.bf16.msra.mxu0 %v9296_v28  ;;  %6440 = vrcp.f32 %v2606_v3  ;;  %v9304_v3 = vld [vmem:[#allocation58_spill] sm:$0xff] }
 0x4da   : > { %5869 = vmatprep.subr.bf16.mxu0 %v9298_v33  ;;  %6442 = vrcp.f32 %v2600_v57  ;;  %v6427_v56 = vpop.eup %6426 }
 0x4db   : > { %6444 = vrcp.f32 %v2597_v62  ;;  %v6429_v47 = vpop.eup %6428  ;;  %v2788_v12 = vmul.f32 %v6427_v56, %v8279_v36 }
 0x4dc   : > { %v2594_v22 = vpop.xlane.xlu1 %2593  ;;  %v2621_v14 = vpop.xlane.xlu0 %2620  ;;  %v2785_v23 = vmul.f32 %v6429_v47, %v8266_v53  ;;  %v9307_v47 = vld [vmem:[#allocation60_spill] sm:$0xff] }
 0x4dd   : > { %6446 = vrcp.f32 %v2594_v22  ;;  %v6431_v52 = vpop.eup %6430  ;;  %v9306_v22 = vld [vmem:[#allocation82_spill] sm:$0xff] }
 0x4de   : > { %v2787_v62 = vmul.f32 %v6431_v52, %v8273_v19 }
 0x4e0   : > { %v2618_v54 = vpop.xlane.xlu1 %2617  ;;  %v2615_v37 = vpop.xlane.xlu0 %2614  ;;  %v2838_v18 = vpack.c.bf16 %v2788_v12, %v2787_v62 }
 0x4e1   : > { %6448 = vrcp.f32 %v2618_v54 }
 0x4e2   : > { %6450 = vrcp.f32 %v2615_v37  ;;  %v6433_v43 = vpop.eup %6432 }
 0x4e3   : > { %6452 = vrcp.f32 %v2621_v14  ;;  %v6435_v44 = vpop.eup %6434  ;;  %v2786_v1 = vmul.f32 %v6433_v43, %v8295_v17  ;;  %v2795_v17 = vmul.f32 %v6425_v34, %v8256_v59 }
 0x4e4   : > { %v2624_v50 = vpop.xlane.xlu0 %2623  ;;  %v6437_v55 = vpop.eup %6436  ;;  %v2796_v21 = vmul.f32 %v6435_v44, %v8293_v2 }
 0x4e5   : > { %6454 = vrcp.f32 %v2624_v50  ;;  %v6439_v58 = vpop.eup %6438  ;;  %v2837_v4 = vpack.c.bf16 %v2786_v1, %v2785_v23  ;;  %v2793_v36 = vmul.f32 %v6437_v55, %v8277_v30 }
 0x4e6   : > { %v6441_v9 = vpop.eup %6440  ;;  %v2842_v2 = vpack.c.bf16 %v2796_v21, %v2795_v17  ;;  %v2789_v8 = vmul.f32 %v6439_v58, %v8299_v32  ;;  %v9301_v32 = vld [vmem:[#allocation62_spill] sm:$0xff] }
 0x4e7   : > { %v6443_v15 = vpop.eup %6442  ;;  %5829 = vmatprep.mubr.msk.bf16.mxu1 %vm2120_vm1, %v2837_v4  ;;  %v2794_v60 = vmul.f32 %v6441_v9, %v8301_v20 }
 0x4e8   : > { %v6445_v53 = vpop.eup %6444  ;;  %5830 = vmatmul.mubr.msk.bf16.vlgmr.msra.gmra.mxu1 %vm2120_vm1, %v2838_v18  ;;  %v2792_v30 = vmul.f32 %v6443_v15, %v8307_v0 }
 0x4e9   : > { %5854 = vmatpush3.bf16.msra.mxu1 %v9297_v25  ;;  %v2841_v61 = vpack.c.bf16 %v2794_v60, %v2793_v36  ;;  %v2791_v20 = vmul.f32 %v6445_v53, %v8286_v41  ;;  %v9303_v25 = vld [vmem:[#allocation83_spill] sm:$0xff] }
 0x4ea   : > { %v6447_v19 = vpop.eup %6446  ;;  %5855 = vmatprep.subr.bf16.mxu1 %v9299_v48 }
 0x4eb   : > { %v2790_v35 = vmul.f32 %v6447_v19, %v8315_v42  ;;  %5845 = vmatprep.mubr.msk.bf16.mxu0 %vm2120_vm1, %v2841_v61  ;;  %v2840_v42 = vpack.c.bf16 %v2792_v30, %v2791_v20 }
 0x4ec   : > { %5846 = vmatmul.mubr.msk.bf16.vlgmr.msra.gmra.mxu0 %vm2120_vm1, %v2842_v2  ;;  %v2633_v54 = vpop.xlane.xlu1 %2632 }
 0x4ed   : > { %v2839_v59 = vpack.c.bf16 %v2790_v35, %v2789_v8  ;;  %5856 = vmatpush3.bf16.msra.mxu1 %v9299_v48  ;;  %5870 = vmatpush3.bf16.msra.mxu0 %v9298_v33  ;;  %v9305_v33 = vld [vmem:[#allocation64_spill] sm:$0xff] }
 0x4ee   : > { %v6449_v7 = vpop.eup %6448  ;;  %5857 = vmatprep.subr.bf16.mxu1 %v9300_v26  ;;  %5871 = vmatprep.subr.bf16.mxu0 %v9301_v32 }
 0x4ef   : > { %v6451_v49 = vpop.eup %6450  ;;  %v2798_v0 = vmul.f32 %v6449_v7, %v9302_v38  ;;  %5833 = vmatprep.mubr.msk.bf16.mxu1 %vm2120_vm1, %v2839_v59 }
 0x4f0   : > { %v6453_v28 = vpop.eup %6452  ;;  %v2797_v24 = vmul.f32 %v6451_v49, %v9303_v25  ;;  %5834 = vmatmul.mubr.msk.bf16.gmra.mxu1 %vm2120_vm1, %v2840_v42  ;;  %v2657_v56 = vpop.xlane.xlu0 %2656 }
 0x4f1   : > { %5858 = vmatpush3.bf16.msra.mxu1 %v9300_v26  ;;  %5872 = vmatpush3.bf16.msra.mxu0 %v9301_v32  ;;  %v2799_v14 = vmul.f32 %v6453_v28, %v9306_v22  ;;  %v9309_v26 = vld [vmem:[#allocation65_spill] sm:$0xff] }
 0x4f2   : > { %v6455_v41 = vpop.eup %6454  ;;  %v2843_v57 = vpack.c.bf16 %v2798_v0, %v2797_v24  ;;  %5859 = vmatprep.subr.bf16.mxu1 %v9304_v3  ;;  %5873 = vmatprep.subr.bf16.mxu0 %v9305_v33 }
 0x4f3   : > { %v2800_v34 = vmul.f32 %v6455_v41, %v8332_v39 }
 0x4f4   : > { %5849 = vmatprep.mubr.msk.bf16.mxu0 %vm2120_vm1, %v2843_v57  ;;  %v2627_v43 = vpop.xlane.xlu1 %2626 }
 0x4f5   : > { %v2844_v37 = vpack.c.bf16 %v2800_v34, %v2799_v14  ;;  %5860 = vmatpush3.bf16.msra.mxu1 %v9304_v3  ;;  %5874 = vmatpush3.bf16.msra.mxu0 %v9305_v33 }
 0x4f6   : > { %5885 = vmatprep.subr.bf16.mxu1 %v9307_v47 }
 0x4f7   : > { %5850 = vmatmul.mubr.msk.bf16.gmra.mxu0 %vm2120_vm1, %v2844_v37 }
 0x4f8   : > { %v2651_v52 = vpop.xlane.xlu0 %2650 }
 0x4f9   : > { %6456 = vrcp.f32 %v2651_v52 }
 0x4fc   : > { %v2636_v12 = vpop.xlane.xlu0 %2635 }
 0x4fd   : > { %v2654_v44 = vpop.xlane.xlu1 %2653 }
 0x4fe   : > { %6458 = vrcp.f32 %v2654_v44 }
 0x4ff   : > { %6460 = vrcp.f32 %v2636_v12 }
 0x500   : > { %v2660_v39 = vpop.xlane.xlu0 %2659  ;;  %6462 = vrcp.f32 %v2627_v43 }
 0x501   : > { %v2645_v50 = vpop.xlane.xlu1 %2644  ;;  %6464 = vrcp.f32 %v2633_v54 }
 0x504   : > { %v2630_v23 = vpop.xlane.xlu0 %2629 }
 0x505   : > { %6466 = vrcp.f32 %v2630_v23  ;;  %v2639_v62 = vpop.xlane.xlu1 %2638 }
 0x506   : > { %v6457_v55 = vpop.eup %6456 }
 0x507   : > { %v2809_v9 = vmul.f32 %v6457_v55, %v8377_v6 }
 0x508   : > { %v2669_v1 = vpop.xlane.xlu0 %2668 }
 0x50b   : > { %v6459_v58 = vpop.eup %6458 }
 0x50c   : > { %v2663_v4 = vpop.xlane.xlu0 %2662  ;;  %v2810_v21 = vmul.f32 %v6459_v58, %v8387_v31  ;;  %v6461_v36 = vpop.eup %6460 }
 0x50d   : > { %v2666_v18 = vpop.xlane.xlu1 %2665  ;;  %v6463_v60 = vpop.eup %6462  ;;  %v2804_v48 = vmul.f32 %v6461_v36, %v8379_v5 }
 0x50e   : > { %v2849_v15 = vpack.c.bf16 %v2810_v21, %v2809_v9  ;;  %v6465_v17 = vpop.eup %6464  ;;  %v2801_v2 = vmul.f32 %v6463_v60, %v8370_v51  ;;  %v9308_v51 = vld [vmem:[#allocation63_spill] sm:$0xff]  ;;  %v9312_v60 = vld [vmem:[#allocation68_spill] sm:$0xff] }
 0x50f   : > { %v2803_v6 = vmul.f32 %v6465_v17, %v8353_v16  ;;  %v9310_v21 = vld [vmem:[#allocation47_spill] sm:$0xff] }
 0x510   : > { %5877 = vmatprep.mubr.msk.bf16.mxu0 %vm2120_vm1, %v2849_v15  ;;  %v2648_v53 = vpop.xlane.xlu0 %2647 }
 0x511   : > { %v2681_v19 = vpop.xlane.xlu1 %2680  ;;  %v2846_v59 = vpack.c.bf16 %v2804_v48, %v2803_v6  ;;  %6468 = vrcp.f32 %v2648_v53 }
 0x512   : > { %v6467_v61 = vpop.eup %6466  ;;  %6470 = vrcp.f32 %v2639_v62 }
 0x513   : > { %v2802_v8 = vmul.f32 %v6467_v61, %v8401_v27  ;;  %6472 = vrcp.f32 %v2645_v50 }
 0x514   : > { %v2672_v35 = vpop.xlane.xlu0 %2671 }
 0x515   : > { %v2675_v31 = vpop.xlane.xlu1 %2674  ;;  %v2845_v30 = vpack.c.bf16 %v2802_v8, %v2801_v2  ;;  %v9314_v8 = vld [vmem:[#allocation69_spill] sm:$0xff] }
 0x517   : > { %5861 = vmatprep.mubr.msk.bf16.mxu1 %vm2120_vm1, %v2845_v30  ;;  %v9315_v30 = vld [vmem:[#allocation66_spill] sm:$0xff] }
 0x518   : > { %5862 = vmatmul.mubr.msk.bf16.vlgmr.msra.gmra.mxu1 %vm2120_vm1, %v2846_v59  ;;  %v2642_v20 = vpop.xlane.xlu0 %2641 }
 0x519   : > { %v2693_v7 = vpop.xlane.xlu1 %2692  ;;  %5886 = vmatpush3.bf16.msra.mxu1 %v9307_v47  ;;  %6474 = vrcp.f32 %v2642_v20 }
 0x51a   : > { %6476 = vrcp.f32 %v2660_v39  ;;  %5887 = vmatprep.subr.bf16.mxu1 %v9308_v51 }
 0x51b   : > { %6478 = vrcp.f32 %v2663_v4  ;;  %v8565_v16 = vpop.f32.mrf.mxu1 }
 0x51c   : > { %6480 = vrcp.f32 %v2666_v18  ;;  %v2684_v5 = vpop.xlane.xlu0 %2683 }
 0x51d   : > { %6482 = vrcp.f32 %v2657_v56  ;;  %v2687_v27 = vpop.xlane.xlu1 %2686  ;;  %5888 = vmatpush3.bf16.msra.mxu1 %v9308_v51  ;;  %v8568_v49 = vpop.f32.mrf.mxu1 }
 0x51e   : > { %6484 = vrcp.f32 %v2684_v5  ;;  %5889 = vmatprep.subr.bf16.mxu1 %v9309_v26  ;;  %v6469_v25 = vpop.eup %6468 }
 0x51f   : > { %6486 = vrcp.f32 %v2675_v31  ;;  %v8571_v32 = vpop.f32.mrf.mxu1  ;;  %v6471_v41 = vpop.eup %6470  ;;  %v2808_v34 = vmul.f32 %v6469_v25, %v8426_v13  ;;  %v9319_v25 = vld [vmem:[#allocation67_spill] sm:$0xff] }
 0x520   : > { %6488 = vrcp.f32 %v2681_v19  ;;  %v2678_v42 = vpop.xlane.xlu0 %2677  ;;  %v3474_v38 = vpack.c.bf16 %v8571_v32, %v8565_v16  ;;  %v6473_v33 = vpop.eup %6472  ;;  %v2805_v54 = vmul.f32 %v6471_v41, %v8406_v40  ;;  %v9313_v19 = vld [vmem:[#allocation48_spill] sm:$0xff] }
 0x521   : > { %v1396_v0 = vpop.permute.xlu1 %1395  ;;  %5890 = vmatpush3.bf16.msra.mxu1 %v9309_v26  ;;  %6490 = vrcp.f32 %v2678_v42  ;;  %v8576_v28 = vpop.f32.mrf.mxu1  ;;  %v2807_v12 = vmul.f32 %v6473_v33, %v8395_v45  ;;  %v9318_v42 = vld [vmem:[#allocation76_spill] sm:$0xff] }
 0x522   : > { %5891 = vmatprep.subr.bf16.mxu1 %v1396_v0  ;;  %6492 = vrcp.f32 %v2672_v35  ;;  %v3473_v24 = vpack.c.bf16 %v8576_v28, %v8568_v49 }
 0x523   : > { %6494 = vrcp.f32 %v2669_v1  ;;  %v2848_v23 = vpack.c.bf16 %v2808_v34, %v2807_v12 }
 0x524   : > { %v8580_v57 = vpop.f32.mrf.mxu1  ;;  %v2696_v3 = vpop.xlane.xlu0 %2695 }
 0x525   : > { %5892 = vmatpush3.bf16.msra.mxu1 %v1396_v0  ;;  %6496 = vrcp.f32 %v2696_v3 }
 0x526   : > { %v6475_v22 = vpop.eup %6474  ;;  %v8582_v14 = vpop.f32.mrf.mxu1  ;;  %6498 = vrcp.f32 %v2687_v27  ;;  %v9317_v27 = vld [vmem:[#allocation71_spill] sm:$0xff] }
 0x527   : > { %v6477_v56 = vpop.eup %6476  ;;  %v2806_v37 = vmul.f32 %v6475_v22, %v8443_v10  ;;  %6500 = vrcp.f32 %v2693_v7  ;;  %v9316_v7 = vld [vmem:[#allocation72_spill] sm:$0xff]  ;;  %v9320_v22 = vmov 0  }
 0x528   : > { %v6479_v47 = vpop.eup %6478  ;;  %v8587_v52 = vpop.f32.mrf.mxu1  ;;  %v2812_v40 = vmul.f32 %v6477_v56, %v8391_v11  ;;  %v9311_v11 = vld [vmem:[#allocation46_spill] sm:$0xff] }
 0x529   : > { %v2690_v43 = vpop.xlane.xlu0 %2689  ;;  %v6481_v44 = vpop.eup %6480  ;;  %v3476_v39 = vpack.c.bf16 %v8587_v52, %v8580_v57  ;;  %v2847_v50 = vpack.c.bf16 %v2806_v37, %v2805_v54  ;;  %v2813_v62 = vmul.f32 %v6479_v47, %v8419_v63 }
 0x52a   : > { %6502 = vrcp.f32 %v2690_v43  ;;  %v6483_v13 = vpop.eup %6482  ;;  %v2814_v45 = vmul.f32 %v6481_v44, %v8421_v46  ;;  %v8616_v34 = vpop.f32.mrf.mxu1 }
 0x52b   : > { %v6485_v1 = vpop.eup %6484  ;;  %5865 = vmatprep.mubr.msk.bf16.mxu1 %vm2120_vm1, %v2847_v50  ;;  %v2811_v4 = vmul.f32 %v6483_v13, %v8363_v29 }
 0x52c   : > { %v6487_v10 = vpop.eup %6486  ;;  %5866 = vmatmul.mubr.msk.bf16.gmra.mxu1 %vm2120_vm1, %v2848_v23  ;;  %v2820_v18 = vmul.f32 %v6485_v1, %v9310_v21  ;;  %v2851_v48 = vpack.c.bf16 %v2814_v45, %v2813_v62 }
 0x52d   : > { %v1384_v55 = vpop.permute.xlu0 %1383  ;;  %v6489_v58 = vpop.eup %6488  ;;  %v2850_v15 = vpack.c.bf16 %v2812_v40, %v2811_v4  ;;  %v2817_v36 = vmul.f32 %v6487_v10, %v9311_v11 }
 0x52e   : > { %5875 = vmatprep.subr.bf16.mxu0 %v1384_v55  ;;  %v6491_v9 = vpop.eup %6490  ;;  %v2819_v61 = vmul.f32 %v6489_v58, %v9313_v19 }
 0x52f   : > { %5876 = vmatpush3.bf16.msra.mxu0 %v1384_v55  ;;  %v2818_v53 = vmul.f32 %v6491_v9, %v9312_v60  ;;  %v6493_v17 = vpop.eup %6492 }
 0x530   : > { %v6495_v46 = vpop.eup %6494  ;;  %v2854_v2 = vpack.c.bf16 %v2820_v18, %v2819_v61  ;;  %v2816_v6 = vmul.f32 %v6493_v17, %v9314_v8 }
 0x531   : > { %v2853_v63 = vpack.c.bf16 %v2818_v53, %v2817_v36  ;;  %v2815_v59 = vmul.f32 %v6495_v46, %v9315_v30 }
 0x532   : > { %5878 = vmatmul.mubr.msk.bf16.vlgmr.msra.gmra.mxu0 %vm2120_vm1, %v2850_v15  ;;  %v6497_v29 = vpop.eup %6496 }
 0x533   : > { %5881 = vmatprep.mubr.msk.bf16.mxu0 %vm2120_vm1, %v2851_v48  ;;  %5893 = vmatprep.mubr.msk.bf16.mxu1 %vm2120_vm1, %v2853_v63  ;;  %v6499_v35 = vpop.eup %6498  ;;  %v2824_v51 = vmul.f32 %v6497_v29, %v9316_v7  ;;  %v2852_v5 = vpack.c.bf16 %v2816_v6, %v2815_v59 }
 0x534   : > { %5894 = vmatmul.mubr.msk.bf16.vlgmr.msra.gmra.mxu1 %vm2120_vm1, %v2854_v2  ;;  %v6501_v31 = vpop.eup %6500  ;;  %v2821_v26 = vmul.f32 %v6499_v35, %v9317_v27  ;;  %v6162_v27 = vld [vmem:[%s7387_s2 + $0x28] sm:$0xff]  }
 0x535   : > { %v2823_v41 = vmul.f32 %v6501_v31, %v9319_v25 }
 0x537   : > { %v6503_v20 = vpop.eup %6502  ;;  %v2856_v33 = vpack.c.bf16 %v2824_v51, %v2823_v41  ;;  %v6160_v51 = vld [vmem:[%s7387_s2 + $0x38] sm:$0xff]  }
 0x538   : > { %v2822_v0 = vmul.f32 %v6503_v20, %v9318_v42  ;;  %5901 = vmatprep.subr.bf16.mxu0 %v6160_v51 }
 0x539   : > { %5902 = vmatpush3.bf16.msra.mxu0 %v6160_v51 }
 0x53a   : > { %5882 = vmatmul.mubr.msk.bf16.gmra.mxu0 %vm2120_vm1, %v2852_v5  ;;  %v2855_v3 = vpack.c.bf16 %v2822_v0, %v2821_v26  ;;  %v6161_v5 = vld [vmem:[%s7387_s2 + $0x30] sm:$0xff]   ;;  %v6163_v0 = vld [vmem:[%s7387_s2 + $0x20] sm:$0xff]  }
 0x53b   : > { %5903 = vmatprep.subr.bf16.mxu0 %v6161_v5 }
 0x53c   : > { %5897 = vmatprep.mubr.msk.bf16.mxu1 %vm2120_vm1, %v2855_v3 }
 0x53d   : > { %5898 = vmatmul.mubr.msk.bf16.gmra.mxu1 %vm2120_vm1, %v2856_v33  ;;  %5904 = vmatpush3.bf16.msra.mxu0 %v6161_v5  ;;  %v6164_v33 = vld [vmem:[%s7387_s2 + $0x18] sm:$0xff]  }
 0x53e   : > { %4171 = vmatprep.mubr.bf16.mxu1 %v9320_v22  ;;  %5905 = vmatprep.subr.bf16.mxu0 %v6162_v27 }
 0x541   : > { %5906 = vmatpush3.bf16.msra.mxu0 %v6162_v27 }
 0x542   : > { %5907 = vmatprep.subr.bf16.mxu0 %v6163_v0 }
 0x545   : > { %5908 = vmatpush3.bf16.msra.mxu0 %v6163_v0 }
 0x546   : > { %5909 = vmatprep.subr.bf16.mxu0 %v6164_v33 }
 0x549   : > { %5910 = vmatpush3.bf16.msra.mxu0 %v6164_v33 }
 0x588   : > { %v5799_v56 = vpop.f32.mrf.mxu1 }
 0x58a   : > { %v2980_v54 = vpop.f32.mrf.mxu1 }
 0x58c   : > { %v5800_v37 = vpop.f32.mrf.mxu1  ;;  %v5815_v47 = vpop.f32.mrf.mxu0 }
 0x58d   : > { %v3478_v43 = vpack.c.bf16 %v5800_v37, %v5799_v56 }
 0x58e   : > { %v2983_v12 = vpop.f32.mrf.mxu1  ;;  %v3057_v44 = vpop.f32.mrf.mxu0 }
 0x58f   : > { %v3477_v50 = vpack.c.bf16 %v2983_v12, %v2980_v54  ;;  %3511 = vrot.lane.b32.xlu1 %v3478_v43, %s6991_s21  ;;  %v6165_v54 = vld [vmem:[%s7387_s2 + $0x10] sm:$0xff]   ;;  %v6166_v12 = vld [vmem:[%s7387_s2 + $0x8] sm:$0xff]  }
 0x590   : > { %v5816_v13 = vpop.f32.mrf.mxu0  ;;  %5911 = vmatprep.subr.bf16.mxu0 %v6165_v54 }
 0x591   : > { %v3482_v23 = vpack.c.bf16 %v5816_v13, %v5815_v47  ;;  %3509 = vrot.lane.b32.xlu0 %v3477_v50, %s6991_s21  ;;  %5912 = vmatpush3.bf16.msra.mxu0 %v6165_v54 }
 0x592   : > { %v3060_v1 = vpop.f32.mrf.mxu0  ;;  %5913 = vmatprep.subr.bf16.mxu0 %v6166_v12 }
 0x593   : > { %v3481_v40 = vpack.c.bf16 %v3060_v1, %v3057_v44  ;;  %3523 = vrot.lane.b32.xlu1 %v3482_v23, %s6990_s23  ;;  %v6167_v23 = vld [vmem:[%s7387_s2] sm:$0xff]  }
 0x594   : > { %v5803_v10 = vpop.f32.mrf.mxu1 }
 0x595   : > { %3521 = vrot.lane.b32.xlu0 %v3481_v40, %s6990_s23  ;;  %5914 = vmatpush3.bf16.msra.mxu0 %v6166_v12 }
 0x596   : > { %v2996_v55 = vpop.f32.mrf.mxu1  ;;  %5915 = vmatprep.subr.bf16.mxu0 %v6167_v23 }
 0x598   : > { %v5804_v62 = vpop.f32.mrf.mxu1  ;;  %v5819_v45 = vpop.f32.mrf.mxu0 }
 0x599   : > { %v3480_v58 = vpack.c.bf16 %v5804_v62, %v5803_v10  ;;  %5916 = vmatpush3.bf16.msra.mxu0 %v6167_v23 }
 0x59a   : > { %v2999_v4 = vpop.f32.mrf.mxu1  ;;  %v3073_v9 = vpop.f32.mrf.mxu0 }
 0x59b   : > { %v3479_v21 = vpack.c.bf16 %v2999_v4, %v2996_v55  ;;  %3515 = vrot.lane.b32.xlu1 %v3480_v58, %s6991_s21 }
 0x59c   : > { %v5820_v18 = vpop.f32.mrf.mxu0 }
 0x59d   : > { %v3484_v15 = vpack.c.bf16 %v5820_v18, %v5819_v45  ;;  %3513 = vrot.lane.b32.xlu0 %v3479_v21, %s6991_s21 }
 0x59e   : > { %v3076_v11 = vpop.f32.mrf.mxu0 }
 0x59f   : > { %v3483_v36 = vpack.c.bf16 %v3076_v11, %v3073_v9  ;;  %3527 = vrot.lane.b32.xlu1 %v3484_v15, %s6990_s23 }
 0x5a1   : > { %3525 = vrot.lane.b32.xlu0 %v3483_v36, %s6990_s23 }
 0x5a8   : > { %v5831_v60 = vpop.f32.mrf.mxu1 }
 0x5aa   : > { %v3134_v53 = vpop.f32.mrf.mxu1 }
 0x5ac   : > { %v5832_v17 = vpop.f32.mrf.mxu1  ;;  %v5847_v19 = vpop.f32.mrf.mxu0 }
 0x5ad   : > { %v3486_v61 = vpack.c.bf16 %v5832_v17, %v5831_v60 }
 0x5ae   : > { %v3137_v48 = vpop.f32.mrf.mxu1  ;;  %v3211_v63 = vpop.f32.mrf.mxu0 }
 0x5af   : > { %v3485_v46 = vpack.c.bf16 %v3137_v48, %v3134_v53  ;;  %3535 = vrot.lane.b32.xlu1 %v3486_v61, %s6989_s27 }
 0x5b0   : > { %v5835_v2 = vpop.f32.mrf.mxu1  ;;  %v5848_v29 = vpop.f32.mrf.mxu0 }
 0x5b1   : > { %v3490_v8 = vpack.c.bf16 %v5848_v29, %v5847_v19  ;;  %3533 = vrot.lane.b32.xlu0 %v3485_v46, %s6989_s27 }
 0x5b2   : > { %v3150_v6 = vpop.f32.mrf.mxu1  ;;  %v3214_v35 = vpop.f32.mrf.mxu0 }
 0x5b3   : > { %v3489_v31 = vpack.c.bf16 %v3214_v35, %v3211_v63  ;;  %3547 = vrot.lane.b32.xlu1 %v3490_v8, %s6988_s4 }
 0x5b4   : > { %v5836_v30 = vpop.f32.mrf.mxu1 }
 0x5b5   : > { %v3488_v59 = vpack.c.bf16 %v5836_v30, %v5835_v2  ;;  %3545 = vrot.lane.b32.xlu0 %v3489_v31, %s6988_s4 }
 0x5b6   : > { %v3153_v20 = vpop.f32.mrf.mxu1 }
 0x5b7   : > { %v3487_v7 = vpack.c.bf16 %v3153_v20, %v3150_v6  ;;  %3539 = vrot.lane.b32.xlu1 %v3488_v59, %s6989_s27  ;;  %v5851_v37 = vpop.f32.mrf.mxu0 }
 0x5b9   : > { %3537 = vrot.lane.b32.xlu0 %v3487_v7, %s6989_s27  ;;  %v3227_v47 = vpop.f32.mrf.mxu0 }
 0x5bb   : > { %v5852_v43 = vpop.f32.mrf.mxu0 }
 0x5bc   : > { %v3492_v19 = vpack.c.bf16 %v5852_v43, %v5851_v37 }
 0x5bd   : > { %v3230_v13 = vpop.f32.mrf.mxu0 }
 0x5be   : > { %v3491_v61 = vpack.c.bf16 %v3230_v13, %v3227_v47 }
 0x5d8   : > { %v5863_v26 = vpop.f32.mrf.mxu1 }
 0x5da   : > { %v3288_v42 = vpop.f32.mrf.mxu1 }
 0x5dc   : > { %v5864_v25 = vpop.f32.mrf.mxu1 }
 0x5dd   : > { %v3494_v41 = vpack.c.bf16 %v5864_v25, %v5863_v26 }
 0x5de   : > { %v3291_v3 = vpop.f32.mrf.mxu1 }
 0x5df   : > { %v3493_v56 = vpack.c.bf16 %v3291_v3, %v3288_v42  ;;  %3559 = vrot.lane.b32.xlu1 %v3494_v41, %s6986_s11 }
 0x5e1   : > { %3557 = vrot.lane.b32.xlu0 %v3493_v56, %s6986_s11 }
 0x5ec   : > { %v5867_v44 = vpop.f32.mrf.mxu1 }
 0x5ee   : > { %v3304_v50 = vpop.f32.mrf.mxu1 }
 0x5f0   : > { %v5868_v1 = vpop.f32.mrf.mxu1 }
 0x5f1   : > { %v3496_v46 = vpack.c.bf16 %v5868_v1, %v5867_v44 }
 0x5f2   : > { %v5879_v40 = vpop.f32.mrf.mxu0  ;;  %v3307_v10 = vpop.f32.mrf.mxu1 }
 0x5f3   : > { %v3495_v2 = vpack.c.bf16 %v3307_v10, %v3304_v50 }
 0x5f4   : > { %v3365_v55 = vpop.f32.mrf.mxu0  ;;  %v5895_v62 = vpop.f32.mrf.mxu1 }
 0x5f6   : > { %v5880_v45 = vpop.f32.mrf.mxu0  ;;  %v3442_v4 = vpop.f32.mrf.mxu1 }
 0x5f7   : > { %v3498_v58 = vpack.c.bf16 %v5880_v45, %v5879_v40 }
 0x5f8   : > { %v3368_v9 = vpop.f32.mrf.mxu0  ;;  %v5896_v18 = vpop.f32.mrf.mxu1 }
 0x5f9   : > { %v3497_v21 = vpack.c.bf16 %v3368_v9, %v3365_v55  ;;  %3571 = vrot.lane.b32.xlu1 %v3498_v58, %s6987_s17  ;;  %v3502_v15 = vpack.c.bf16 %v5896_v18, %v5895_v62  ;;  %v3475_v18 = vpack.c.bf16 %v8616_v34, %v8582_v14 }
 0x5fa   : > { %v5883_v11 = vpop.f32.mrf.mxu0  ;;  %v3445_v36 = vpop.f32.mrf.mxu1 }
 0x5fb   : > { %3569 = vrot.lane.b32.xlu0 %v3497_v21, %s6987_s17  ;;  %v3501_v60 = vpack.c.bf16 %v3445_v36, %v3442_v4 }
 0x5fc   : > { %v3381_v53 = vpop.f32.mrf.mxu0 }
 0x5fd   : > { %3583 = vrot.lane.b32.xlu1 %v3502_v15, %s6985_s10  ;;  %v5899_v17 = vpop.f32.mrf.mxu1 }
 0x5fe   : > { %v5884_v48 = vpop.f32.mrf.mxu0 }
 0x5ff   : > { %3581 = vrot.lane.b32.xlu0 %v3501_v60, %s6985_s10  ;;  %v3458_v63 = vpop.f32.mrf.mxu1  ;;  %v3500_v6 = vpack.c.bf16 %v5884_v48, %v5883_v11 }
 0x600   : > { %v3384_v29 = vpop.f32.mrf.mxu0 }
 0x601   : > { %3551 = vrot.lane.b32.xlu1 %v3492_v19, %s6988_s4  ;;  %v5900_v8 = vpop.f32.mrf.mxu1  ;;  %v3499_v35 = vpack.c.bf16 %v3384_v29, %v3381_v53  ;;  %v3512_v20 = vpop.permute.xlu1 %3511 }
 0x602   : > { %v3504_v30 = vpack.c.bf16 %v5900_v8, %v5899_v17  ;;  %v3594_v44 = vsel %vm1407_vm0, %v3474_v38, %v3512_v20  ;;  %v6536_v20 = vld [vmem:[#allocation2 + $0x30] sm:$0xff] }
 0x603   : > { %3549 = vrot.lane.b32.xlu0 %v3491_v61, %s6988_s4  ;;  %v3461_v31 = vpop.f32.mrf.mxu1  ;;  %v3510_v7 = vpop.permute.xlu0 %3509 }
 0x604   : > { %v3503_v59 = vpack.c.bf16 %v3461_v31, %v3458_v63  ;;  %v3591_v12 = vsel %vm1407_vm0, %v3473_v24, %v3510_v7 }
 0x605   : > { %3563 = vrot.lane.b32.xlu1 %v3496_v46, %s6986_s11  ;;  %v3524_v51 = vpop.permute.xlu1 %3523 }
 0x606   : > { %v3605_v23 = vsel %vm3601_vm2, %v3594_v44, %v3524_v51 }
 0x607   : > { %3561 = vrot.lane.b32.xlu0 %v3495_v2, %s6986_s11  ;;  %v3522_v5 = vpop.permute.xlu0 %3521 }
 0x608   : > { %v3603_v50 = vsel %vm3601_vm2, %v3591_v12, %v3522_v5 }
 0x609   : > { %3575 = vrot.lane.b32.xlu1 %v3500_v6, %s6987_s17  ;;  %v5299_v6 = vld [vmem:[%s832_s7] ss:$0 sm:$0xff] }
 0x60b   : > { %3573 = vrot.lane.b32.xlu0 %v3499_v35, %s6987_s17 }
 0x60d   : > { %3587 = vrot.lane.b32.xlu1 %v3504_v30, %s6985_s10  ;;  %v3516_v27 = vpop.permute.xlu1 %3515 }
 0x60e   : > { %v3600_v36 = vsel %vm1407_vm0, %v3476_v39, %v3516_v27  ;;  %v6537_v27 = vld [vmem:[#allocation2 + $0x18] sm:$0xff] }
 0x60f   : > { %3585 = vrot.lane.b32.xlu0 %v3503_v59, %s6985_s10  ;;  %v3514_v26 = vpop.permute.xlu0 %3513 }
 0x610   : > { %v3597_v11 = vsel %vm1407_vm0, %v3475_v18, %v3514_v26 }
 0x611   : > { %v3528_v42 = vpop.permute.xlu1 %3527 }
 0x612   : > { %v3609_v17 = vsel %vm3601_vm2, %v3600_v36, %v3528_v42 }
 0x613   : > { %v3526_v0 = vpop.permute.xlu0 %3525 }
 0x614   : > { %v3607_v60 = vsel %vm3601_vm2, %v3597_v11, %v3526_v0  ;;  %v6538_v0 = vld [vmem:[#allocation2] sm:$0xff] }
 0x621   : > { %v3536_v25 = vpop.permute.xlu1 %3535 }
 0x622   : > { %v3614_v40 = vsel %vm3610_vm3, %v3605_v23, %v3536_v25 }
 0x623   : > { %v3534_v41 = vpop.permute.xlu0 %3533 }
 0x624   : > { %v3612_v1 = vsel %vm3610_vm3, %v3603_v50, %v3534_v41  ;;  %v6539_v41 = vld [vmem:[#allocation2 + $0x10] sm:$0xff] }
 0x625   : > { %v3548_v3 = vpop.permute.xlu1 %3547 }
 0x626   : > { %v3622_v24 = vsel %vm2120_vm1, %v3614_v40, %v3548_v3  ;;  %v6542_v40 = vld [vmem:[#allocation2 + $0x20] sm:$0xff] }
 0x627   : > { %v3546_v33 = vpop.permute.xlu0 %3545 }
 0x628   : > { %v3620_v49 = vsel %vm2120_vm1, %v3612_v1, %v3546_v33 }
 0x629   : > { %v3540_v56 = vpop.permute.xlu1 %3539 }
 0x62a   : > { %v3618_v61 = vsel %vm3610_vm3, %v3609_v17, %v3540_v56 }
 0x62b   : > { %v3538_v54 = vpop.permute.xlu0 %3537 }
 0x62c   : > { %v3616_v19 = vsel %vm3610_vm3, %v3607_v60, %v3538_v54 }
 0x651   : > { %v3560_v37 = vpop.permute.xlu1 %3559 }
 0x652   : > { %v3631_v32 = vsel %vm3627_vm4, %v3622_v24, %v3560_v37 }
 0x653   : > { %v3558_v47 = vpop.permute.xlu0 %3557 }
 0x654   : > { %v3629_v16 = vsel %vm3627_vm4, %v3620_v49, %v3558_v47 }
 0x66b   : > { %v3572_v43 = vpop.permute.xlu1 %3571 }
 0x66c   : > { %v3640_v55 = vsel %vm3636_vm5, %v3631_v32, %v3572_v43  ;;  %v6540_v43 = vld [vmem:[#allocation2 + $0x8] sm:$0xff]  ;;  %v6170_v32 = vld [vmem:[%s7401_s13 + $0xe4] ss:$16 sps:$4 sm:$0xff]  }
 0x66d   : > { %v3570_v13 = vpop.permute.xlu0 %3569  ;;  %4139 = vmatprep.subr.bf16.mxu1 %v6170_v32  ;;  %v6216_v32 = vld [vmem:[%s7411_s20 + $0x78] sm:$0xff]  }
 0x66e   : > { %v3638_v38 = vsel %vm3636_vm5, %v3629_v16, %v3570_v13  ;;  %v6541_v13 = vld [vmem:[#allocation2 + $0x28] sm:$0xff] }
 0x66f   : > { %v3584_v28 = vpop.permute.xlu1 %3583  ;;  %v6168_v16 = vld [vmem:[%s7401_s13 + $0xe0] ss:$16 sps:$4 sm:$0xff]  }
 0x670   : > { %v3650_v45 = vsel %vm3645_vm6, %v3640_v55, %v3584_v28  ;;  %v6543_v28 = vld [vmem:[#allocation2 + $0x38] sm:$0xff]  ;;  %4140 = vmatpush1.bf16.msra.mxu1 %v6168_v16  ;;  %v6213_v16 = vld [vmem:[%s7401_s13 + $0x8] ss:$16 sps:$4 sm:$0xff]  }
 0x671   : > { %v3582_v10 = vpop.permute.xlu0 %3581 }
 0x672   : > { %v3647_v62 = vsel %vm3645_vm6, %v3638_v38, %v3582_v10  ;;  %v6171_v38 = vld [vmem:[%s7401_s13 + $0xe8] ss:$16 sps:$4 sm:$0xff]   ;;  %v6173_v10 = vld [vmem:[%s7401_s13 + $0xec] ss:$16 sps:$4 sm:$0xff]  }
 0x673   : > { %v3552_v58 = vpop.permute.xlu1 %3551  ;;  %5917 = vmatprep.mubr.bf16.mxu0 %v3647_v62  ;;  %4212 = vmatprep.subr.bf16.mxu0 %v6173_v10 }
 0x674   : > { %5918 = vmatmul.mubr.bf16.vlgmr.msra.gmra.mxu0 %v3650_v45  ;;  %v3626_v34 = vsel %vm2120_vm1, %v3618_v61, %v3552_v58 }
 0x675   : > { %v3550_v4 = vpop.permute.xlu0 %3549  ;;  %4213 = vmatpush1.bf16.msra.mxu0 %v6171_v38  ;;  %v6217_v38 = vld [vmem:[%s7411_s20 + $0xf8] sm:$0xff]  }
 0x676   : > { %v3624_v14 = vsel %vm2120_vm1, %v3616_v19, %v3550_v4 }
 0x677   : > { %v3564_v9 = vpop.permute.xlu1 %3563 }
 0x678   : > { %v3635_v57 = vsel %vm3627_vm4, %v3626_v34, %v3564_v9 }
 0x679   : > { %v3562_v21 = vpop.permute.xlu0 %3561 }
 0x67a   : > { %v3633_v48 = vsel %vm3627_vm4, %v3624_v14, %v3562_v21 }
 0x67b   : > { %v3576_v15 = vpop.permute.xlu1 %3575 }
 0x67c   : > { %v3644_v46 = vsel %vm3636_vm5, %v3635_v57, %v3576_v15  ;;  %v6179_v57 = vld [vmem:[%s7401_s13 + $0xcc] ss:$16 sps:$4 sm:$0xff]  }
 0x67d   : > { %v3574_v53 = vpop.permute.xlu0 %3573  ;;  %4214 = vmatprep.subr.bf16.mxu0 %v6179_v57 }
 0x67e   : > { %v3642_v52 = vsel %vm3636_vm5, %v3633_v48, %v3574_v53 }
 0x67f   : > { %v3588_v63 = vpop.permute.xlu1 %3587 }
 0x680   : > { %v3656_v29 = vsel %vm3645_vm6, %v3644_v46, %v3588_v63  ;;  %v6176_v63 = vld [vmem:[%s7401_s13 + $0xc4] ss:$16 sps:$4 sm:$0xff]   ;;  %v6174_v46 = vld [vmem:[%s7401_s13 + $0xc0] ss:$16 sps:$4 sm:$0xff]  }
 0x681   : > { %v3586_v39 = vpop.permute.xlu0 %3585  ;;  %4141 = vmatprep.subr.bf16.mxu1 %v6176_v63 }
 0x682   : > { %v3653_v2 = vsel %vm3645_vm6, %v3642_v52, %v3586_v39  ;;  %4142 = vmatpush1.bf16.msra.mxu1 %v6174_v46 }
 0x683   : > { %5921 = vmatprep.mubr.bf16.mxu0 %v3653_v2  ;;  %v6177_v2 = vld [vmem:[%s7401_s13 + $0xc8] ss:$16 sps:$4 sm:$0xff]  }
 0x684   : > { %5922 = vmatmul.mubr.bf16.gmra.mxu0 %v3656_v29 }
 0x685   : > { %4244 = vmatprep.mubr.bf16.mxu0 %v9320_v22  ;;  %4215 = vmatpush1.bf16.msra.mxu0 %v6177_v2 }
 0x734   : > { %v5919_v8 = vpop.f32.mrf.mxu0 }
 0x735   : > { %v3772_v59 = vadd.f32 %v5919_v8, %v5299_v6 }
 0x736   : > { %v3763_v35 = vpop.f32.mrf.mxu0 }
 0x737   : > { %v3764_v31 = vadd.f32 %v5299_v6, %v3763_v35  ;;  %v3796_v26 = vadd.f32 %v6537_v27, %v3772_v59  ;;  %v6185_v59 = vld [vmem:[%s7401_s13 + $0xac] ss:$16 sps:$4 sm:$0xff]  }
 0x738   : > { %v5920_v30 = vpop.f32.mrf.mxu0  ;;  %4216 = vmatprep.subr.bf16.mxu0 %v6185_v59 }
 0x739   : > { %v3794_v7 = vadd.f32 %v6536_v20, %v3764_v31  ;;  %v3775_v42 = vadd.f32 %v5920_v30, %v5299_v6  ;;  %v6182_v30 = vld [vmem:[%s7401_s13 + $0xa4] ss:$16 sps:$4 sm:$0xff]  }
 0x73a   : > { %v3766_v51 = vpop.f32.mrf.mxu0  ;;  %4143 = vmatprep.subr.bf16.mxu1 %v6182_v30 }
 0x73b   : > { %v3767_v5 = vadd.f32 %v5299_v6, %v3766_v51  ;;  %3804 = vadd.xlane.f32.xlu0 %v3794_v7  ;;  %v3797_v3 = vadd.f32 %v6539_v41, %v3775_v42  ;;  %v6183_v51 = vld [vmem:[%s7401_s13 + $0xa8] ss:$16 sps:$4 sm:$0xff]   ;;  %v6186_v41 = vld [vmem:[%s7401_s13 + $0x80] ss:$16 sps:$4 sm:$0xff]  }
 0x73c   : > { %4217 = vmatpush1.bf16.msra.mxu0 %v6183_v51 }
 0x73d   : > { %v3795_v25 = vadd.f32 %v6538_v0, %v3767_v5  ;;  %v6188_v0 = vld [vmem:[%s7401_s13 + $0x84] ss:$16 sps:$4 sm:$0xff]  }
 0x73f   : > { %3806 = vadd.xlane.f32.xlu1 %v3795_v25  ;;  %3808 = vadd.xlane.f32.xlu0 %v3796_v26 }
 0x743   : > { %3810 = vadd.xlane.f32.xlu0 %v3797_v3 }
 0x744   : > { %v5923_v33 = vpop.f32.mrf.mxu0 }
 0x745   : > { %v3788_v47 = vadd.f32 %v5923_v33, %v5299_v6 }
 0x746   : > { %v3779_v56 = vpop.f32.mrf.mxu0 }
 0x747   : > { %v3780_v54 = vadd.f32 %v5299_v6, %v3779_v56  ;;  %v3800_v23 = vadd.f32 %v6541_v13, %v3788_v47  ;;  %v6194_v56 = vld [vmem:[%s7401_s13 + $0x64] ss:$16 sps:$4 sm:$0xff]   ;;  %v6195_v47 = vld [vmem:[%s7401_s13 + $0x68] ss:$16 sps:$4 sm:$0xff]  }
 0x748   : > { %v5924_v37 = vpop.f32.mrf.mxu0  ;;  %v6206_v13 = vld [vmem:[%s7401_s13 + $0x24] ss:$16 sps:$4 sm:$0xff]  }
 0x749   : > { %v3798_v12 = vadd.f32 %v6540_v43, %v3780_v54  ;;  %v3791_v1 = vadd.f32 %v5924_v37, %v5299_v6  ;;  %v6197_v54 = vld [vmem:[%s7401_s13 + $0x6c] ss:$16 sps:$4 sm:$0xff]   ;;  %v6192_v37 = vld [vmem:[%s7401_s13 + $0x60] ss:$16 sps:$4 sm:$0xff]   ;;  %v6200_v43 = vld [vmem:[%s7401_s13 + $0x44] ss:$16 sps:$4 sm:$0xff]  }
 0x74a   : > { %v3782_v44 = vpop.f32.mrf.mxu0 }
 0x74b   : > { %v3783_v50 = vadd.f32 %v5299_v6, %v3782_v44  ;;  %3812 = vadd.xlane.f32.xlu1 %v3798_v12  ;;  %v3801_v24 = vadd.f32 %v6543_v28, %v3791_v1  ;;  %v6198_v44 = vld [vmem:[%s7401_s13 + $0x40] ss:$16 sps:$4 sm:$0xff]   ;;  %v6215_v28 = vld [vmem:[%s7401_s13 + $0xc] ss:$16 sps:$4 sm:$0xff]  }
 0x74c   : > { %v6204_v1 = vld [vmem:[%s7401_s13 + $0x20] ss:$16 sps:$4 sm:$0xff]  }
 0x74d   : > { %v3799_v49 = vadd.f32 %v6542_v40, %v3783_v50  ;;  %v6201_v50 = vld [vmem:[%s7401_s13 + $0x48] ss:$16 sps:$4 sm:$0xff]  }
 0x74e   : > { %v6207_v40 = vld [vmem:[%s7401_s13 + $0x28] ss:$16 sps:$4 sm:$0xff]  }
 0x74f   : > { %3814 = vadd.xlane.f32.xlu0 %v3799_v49  ;;  %3816 = vadd.xlane.f32.xlu1 %v3800_v23 }
 0x753   : > { %3818 = vadd.xlane.f32.xlu0 %v3801_v24 }
 0x7c4   : > { %v3805_v55 = vpop.xlane.xlu0 %3804 }
 0x7c5   : > { %v3821_v62 = vmul.f32 0.0078125, %v3805_v55 }
 0x7c7   : > { %v8703_v45 = vsub.f32 %v3794_v7, %v3821_v62  ;;  %v6180_v7 = vld [vmem:[%s7401_s13 + $0xa0] ss:$16 sps:$4 sm:$0xff]  }
 0x7c8   : > { %v3807_v58 = vpop.xlane.xlu1 %3806  ;;  %v3809_v4 = vpop.xlane.xlu0 %3808  ;;  %4144 = vmatpush1.bf16.msra.mxu1 %v6180_v7 }
 0x7c9   : > { %v3822_v9 = vmul.f32 0.0078125, %v3807_v58  ;;  %v3823_v21 = vmul.f32 0.0078125, %v3809_v4  ;;  %v3837_v18 = vmul.f32 %v8703_v45, %v8703_v45  ;;  %4145 = vmatprep.subr.bf16.mxu1 %v6188_v0 }
 0x7cb   : > { %v8707_v15 = vsub.f32 %v3795_v25, %v3822_v9  ;;  %v8709_v11 = vsub.f32 %v3796_v26, %v3823_v21  ;;  %3845 = vadd.xlane.f32.xlu1 %v3837_v18  ;;  %v6191_v25 = vld [vmem:[%s7401_s13 + $0x8c] ss:$16 sps:$4 sm:$0xff]  }
 0x7cc   : > { %v3811_v36 = vpop.xlane.xlu0 %3810  ;;  %4218 = vmatprep.subr.bf16.mxu0 %v6191_v25  ;;  %4146 = vmatpush1.bf16.msra.mxu1 %v6186_v41 }
 0x7cd   : > { %v3824_v60 = vmul.f32 0.0078125, %v3811_v36  ;;  %v3838_v53 = vmul.f32 %v8707_v15, %v8707_v15  ;;  %v3839_v17 = vmul.f32 %v8709_v11, %v8709_v11  ;;  %4147 = vmatprep.subr.bf16.mxu1 %v6194_v56 }
 0x7cf   : > { %v8715_v19 = vsub.f32 %v3797_v3, %v3824_v60  ;;  %3847 = vadd.xlane.f32.xlu0 %v3838_v53  ;;  %3849 = vadd.xlane.f32.xlu1 %v3839_v17  ;;  %v6189_v3 = vld [vmem:[%s7401_s13 + $0x88] ss:$16 sps:$4 sm:$0xff]  }
 0x7d0   : > { %4219 = vmatpush1.bf16.msra.mxu0 %v6189_v3  ;;  %4148 = vmatpush1.bf16.msra.mxu1 %v6192_v37  ;;  %v6219_v37 = vld [vmem:[%s7411_s20 + $0xb8] sm:$0xff]  }
 0x7d1   : > { %v3840_v61 = vmul.f32 %v8715_v19, %v8715_v19  ;;  %4220 = vmatprep.subr.bf16.mxu0 %v6197_v54  ;;  %4149 = vmatprep.subr.bf16.mxu1 %v6200_v43  ;;  %v6218_v54 = vld [vmem:[%s7411_s20 + $0x38] sm:$0xff]  }
 0x7d3   : > { %3851 = vadd.xlane.f32.xlu0 %v3840_v61 }
 0x7d4   : > { %v3813_v14 = vpop.xlane.xlu1 %3812  ;;  %4221 = vmatpush1.bf16.msra.mxu0 %v6195_v47  ;;  %4150 = vmatpush1.bf16.msra.mxu1 %v6198_v44  ;;  %v6221_v47 = vld [vmem:[%s7411_s20 + $0xf0] sm:$0xff]  }
 0x7d5   : > { %v3825_v34 = vmul.f32 0.0078125, %v3813_v14  ;;  %4151 = vmatprep.subr.bf16.mxu1 %v6206_v13  ;;  %v6222_v44 = vld [vmem:[%s7411_s20 + $0x30] sm:$0xff]   ;;  %v6224_v13 = vld [vmem:[%s7411_s20 + $0x68] sm:$0xff]  }
 0x7d7   : > { %v8719_v48 = vsub.f32 %v3798_v12, %v3825_v34  ;;  %v6203_v12 = vld [vmem:[%s7401_s13 + $0x4c] ss:$16 sps:$4 sm:$0xff]  }
 0x7d8   : > { %v3817_v52 = vpop.xlane.xlu1 %3816  ;;  %v3815_v39 = vpop.xlane.xlu0 %3814  ;;  %4222 = vmatprep.subr.bf16.mxu0 %v6203_v12  ;;  %4152 = vmatpush1.bf16.msra.mxu1 %v6204_v1 }
 0x7d9   : > { %v3827_v29 = vmul.f32 0.0078125, %v3817_v52  ;;  %v3826_v8 = vmul.f32 0.0078125, %v3815_v39  ;;  %v3841_v6 = vmul.f32 %v8719_v48, %v8719_v48  ;;  %4223 = vmatpush1.bf16.msra.mxu0 %v6201_v50  ;;  %v6223_v50 = vld [vmem:[%s7411_s20 + $0xb0] sm:$0xff]  }
 0x7db   : > { %v8727_v35 = vsub.f32 %v3800_v23, %v3827_v29  ;;  %v8729_v31 = vsub.f32 %v3799_v49, %v3826_v8  ;;  %3853 = vadd.xlane.f32.xlu1 %v3841_v6  ;;  %v6209_v23 = vld [vmem:[%s7401_s13 + $0x2c] ss:$16 sps:$4 sm:$0xff]   ;;  %v6212_v49 = vld [vmem:[%s7401_s13 + $0x4] ss:$16 sps:$4 sm:$0xff]  }
 0x7dc   : > { %v3819_v20 = vpop.xlane.xlu0 %3818  ;;  %4224 = vmatprep.subr.bf16.mxu0 %v6209_v23  ;;  %4153 = vmatprep.subr.bf16.mxu1 %v6212_v49  ;;  %v8768_v29 = vld [vmem:[%s693_s30] ss:$0 sm:$0xff] }
 0x7dd   : > { %v3828_v5 = vmul.f32 0.0078125, %v3819_v20  ;;  %v3843_v27 = vmul.f32 %v8727_v35, %v8727_v35  ;;  %v3842_v26 = vmul.f32 %v8729_v31, %v8729_v31  ;;  %4225 = vmatpush1.bf16.msra.mxu0 %v6207_v40  ;;  %v6225_v23 = vld [vmem:[%s7411_s20 + $0xe8] sm:$0xff]  }
 0x7de   : > { %4226 = vmatprep.subr.bf16.mxu0 %v6215_v28  ;;  %v6226_v28 = vld [vmem:[%s7411_s20 + $0x28] sm:$0xff]  }
 0x7df   : > { %v8739_v42 = vsub.f32 %v3801_v24, %v3828_v5  ;;  %3857 = vadd.xlane.f32.xlu1 %v3843_v27  ;;  %3855 = vadd.xlane.f32.xlu0 %v3842_v26  ;;  %v6210_v24 = vld [vmem:[%s7401_s13] ss:$16 sps:$4 sm:$0xff]   ;;  %v8774_v5 = vld [vmem:[%s701_s28] ss:$0 sm:$0xff] }
 0x7e0   : > { %4154 = vmatpush1.bf16.msra.mxu1 %v6210_v24  ;;  %v6227_v24 = vld [vmem:[%s7411_s20 + $0xa8] sm:$0xff]  }
 0x7e1   : > { %v3844_v33 = vmul.f32 %v8739_v42, %v8739_v42  ;;  %4227 = vmatpush1.bf16.msra.mxu0 %v6213_v16  ;;  %5541 = vmatprep.subr.bf16.mxu1 %v6216_v32  ;;  %v6228_v32 = vld [vmem:[%s7411_s20 + $0x60] sm:$0xff]  }
 0x7e2   : > { %5581 = vmatprep.subr.bf16.mxu0 %v6217_v38  ;;  %v6229_v38 = vld [vmem:[%s7411_s20 + $0xe0] sm:$0xff]  }
 0x7e3   : > { %3859 = vadd.xlane.f32.xlu0 %v3844_v33 }
 0x854   : > { %v3846_v10 = vpop.xlane.xlu1 %3845 }
 0x855   : > { %v3861_v55 = vmul.f32 0.0078125, %v3846_v10 }
 0x857   : > { %v3869_v62 = vadd.f32 1e-05, %v3861_v55 }
 0x858   : > { %v3850_v58 = vpop.xlane.xlu1 %3849  ;;  %v3848_v4 = vpop.xlane.xlu0 %3847 }
 0x859   : > { %6504 = vrsqrt.f32 %v3869_v62  ;;  %v3863_v9 = vmul.f32 0.0078125, %v3850_v58  ;;  %v3862_v21 = vmul.f32 0.0078125, %v3848_v4  ;;  %v6230_v4 = vld [vmem:[%s7411_s20 + $0x20] sm:$0xff]  }
 0x85b   : > { %v3870_v18 = vadd.f32 1e-05, %v3862_v21  ;;  %v3871_v36 = vadd.f32 1e-05, %v3863_v9  ;;  %v6231_v9 = vld [vmem:[%s7411_s20 + $0xa0] sm:$0xff]  }
 0x85c   : > { %v3852_v60 = vpop.xlane.xlu0 %3851 }
 0x85d   : > { %v3864_v53 = vmul.f32 0.0078125, %v3852_v60  ;;  %6506 = vrsqrt.f32 %v3870_v18  ;;  %v6233_v18 = vld [vmem:[%s7411_s20 + $0xd8] sm:$0xff]  }
 0x85e   : > { %6508 = vrsqrt.f32 %v3871_v36 }
 0x85f   : > { %v3872_v17 = vadd.f32 1e-05, %v3864_v53 }
 0x861   : > { %6510 = vrsqrt.f32 %v3872_v17 }
 0x864   : > { %v3854_v61 = vpop.xlane.xlu1 %3853 }
 0x865   : > { %v3865_v14 = vmul.f32 0.0078125, %v3854_v61 }
 0x866   : > { %v6505_v34 = vpop.eup %6504 }
 0x867   : > { %v3873_v63 = vadd.f32 1e-05, %v3865_v14  ;;  %v3885_v57 = vmul.f32 %v6505_v34, %v8703_v45  ;;  %v6235_v14 = vld [vmem:[%s7411_s20 + $0x98] sm:$0xff]  }
 0x868   : > { %v3858_v52 = vpop.xlane.xlu1 %3857  ;;  %v3856_v39 = vpop.xlane.xlu0 %3855 }
 0x869   : > { %6512 = vrsqrt.f32 %v3873_v63  ;;  %v3867_v46 = vmul.f32 0.0078125, %v3858_v52  ;;  %v3866_v2 = vmul.f32 0.0078125, %v3856_v39  ;;  %v3899_v7 = vmul.f32 %v8768_v29, %v3885_v57  ;;  %v6236_v52 = vld [vmem:[%s7411_s20 + $0x50] sm:$0xff]  }
 0x86a   : > { %v6507_v8 = vpop.eup %6506  ;;  %v6238_v39 = vld [vmem:[%s7411_s20 + $0x10] sm:$0xff]  }
 0x86b   : > { %v3874_v6 = vadd.f32 1e-05, %v3866_v2  ;;  %v3886_v30 = vmul.f32 %v6507_v8, %v8707_v15  ;;  %v3875_v59 = vadd.f32 1e-05, %v3867_v46  ;;  %v6509_v51 = vpop.eup %6508  ;;  %v8779_v25 = vadd.f32 %v8774_v5, %v3899_v7  ;;  %v6239_v46 = vld [vmem:[%s7411_s20 + $0x90] sm:$0xff]   ;;  %v6240_v2 = vld [vmem:[%s7411_s20 + $0x48] sm:$0xff]  }
 0x86c   : > { %v3860_v20 = vpop.xlane.xlu0 %3859  ;;  %v3887_v3 = vmul.f32 %v6509_v51, %v8709_v11  ;;  %v6242_v8 = vld [vmem:[%s7411_s20 + $0x8] sm:$0xff]   ;;  %v6247_v7 = vld [vmem:[%s7411_s20 + $0x80] sm:$0xff]  }
 0x86d   : > { %v3868_v45 = vmul.f32 0.0078125, %v3860_v20  ;;  %6514 = vrsqrt.f32 %v3874_v6  ;;  %v3900_v26 = vmul.f32 %v8768_v29, %v3886_v30  ;;  %v6243_v6 = vld [vmem:[%s7411_s20 + $0x88] sm:$0xff]   ;;  %v6244_v30 = vld [vmem:[%s7411_s20 + $0x40] sm:$0xff]  }
 0x86e   : > { %v6511_v27 = vpop.eup %6510  ;;  %6516 = vrsqrt.f32 %v3875_v59  ;;  %v3901_v43 = vmul.f32 %v8768_v29, %v3887_v3  ;;  %v6245_v59 = vld [vmem:[%s7411_s20 + $0xc0] sm:$0xff]  }
 0x86f   : > { %v3876_v0 = vadd.f32 1e-05, %v3868_v45  ;;  %v3888_v15 = vmul.f32 %v6511_v27, %v8715_v19  ;;  %v8782_v41 = vadd.f32 %v8774_v5, %v3900_v26  ;;  %v6220_v19 = vld [vmem:[%s7411_s20 + $0x70] sm:$0xff]   ;;  %v6246_v20 = vld [vmem:[%s7411_s20] sm:$0xff]  }
 0x870   : > { %v8803_v1 = vadd.f32 %v8774_v5, %v3901_v43  ;;  %v9322_v51 = vld [vmem:[#allocation44_spill] sm:$0xff] }
 0x871   : > { %6518 = vrsqrt.f32 %v3876_v0  ;;  %v3953_v33 = vpack.c.bf16 %v8782_v41, %v8779_v25  ;;  %v3902_v56 = vmul.f32 %v8768_v29, %v3888_v15  ;;  %v3973_v45 = vsub.s32 3, %v9322_v51 }
 0x872   : > { %v9323_v0 = vsub.s32 1, %v9322_v51 }
 0x873   : > { %4172 = vmatmul.mubr.bf16.vlgmr.msra.gmra.mxu1 %v3953_v33  ;;  %4245 = vmatmul.mubr.bf16.vlgmr.msra.gmra.mxu0 %v3953_v33  ;;  %v8796_v12 = vadd.f32 %v8774_v5, %v3902_v56  ;;  %v9324_v33 = vsub.s32 0, %v9322_v51 }
 0x874   : > { %4181 = vmatprep.mubr.bf16.mxu1 %v9320_v22  ;;  %4254 = vmatprep.mubr.bf16.mxu0 %v9320_v22 }
 0x875   : > { %5542 = vmatpush3.bf16.msra.mxu1 %v6218_v54  ;;  %5582 = vmatpush3.bf16.msra.mxu0 %v6219_v37  ;;  %v3954_v49 = vpack.c.bf16 %v8796_v12, %v8803_v1  ;;  %v9325_v54 = vsub.s32 2, %v9322_v51 }
 0x876   : > { %v6513_v11 = vpop.eup %6512  ;;  %5543 = vmatprep.subr.bf16.mxu1 %v6220_v19  ;;  %5583 = vmatprep.subr.bf16.mxu0 %v6221_v47 }
 0x877   : > { %v3889_v40 = vmul.f32 %v6513_v11, %v8719_v48 }
 0x879   : > { %5544 = vmatpush3.bf16.msra.mxu1 %v6222_v44  ;;  %5584 = vmatpush3.bf16.msra.mxu0 %v6223_v50  ;;  %v3903_v10 = vmul.f32 %v8768_v29, %v3889_v40 }
 0x87a   : > { %v6515_v16 = vpop.eup %6514  ;;  %5545 = vmatprep.subr.bf16.mxu1 %v6224_v13  ;;  %5585 = vmatprep.subr.bf16.mxu0 %v6225_v23 }
 0x87b   : > { %4182 = vmatmul.mubr.bf16.gmra.mxu1 %v3954_v49  ;;  %4255 = vmatmul.mubr.bf16.gmra.mxu0 %v3954_v49  ;;  %v3890_v48 = vmul.f32 %v6515_v16, %v8729_v31  ;;  %v6517_v55 = vpop.eup %6516  ;;  %v6232_v31 = vld [vmem:[%s7411_s20 + $0x58] sm:$0xff]   ;;  %v8823_v36 = vadd.f32 %v8774_v5, %v3903_v10 }
 0x87c   : > { %4191 = vmatprep.mubr.bf16.mxu1 %v9320_v22  ;;  %4264 = vmatprep.mubr.bf16.mxu0 %v9320_v22  ;;  %v3891_v53 = vmul.f32 %v6517_v55, %v8727_v35 }
 0x87d   : > { %v3904_v58 = vmul.f32 %v8768_v29, %v3890_v48  ;;  %5546 = vmatpush3.bf16.msra.mxu1 %v6226_v28  ;;  %5586 = vmatpush3.bf16.msra.mxu0 %v6227_v24 }
 0x87e   : > { %v6519_v62 = vpop.eup %6518  ;;  %5547 = vmatprep.subr.bf16.mxu1 %v6228_v32  ;;  %5587 = vmatprep.subr.bf16.mxu0 %v6229_v38  ;;  %v3905_v34 = vmul.f32 %v8768_v29, %v3891_v53 }
 0x87f   : > { %v3892_v21 = vmul.f32 %v6519_v62, %v8739_v42  ;;  %v8826_v60 = vadd.f32 %v8774_v5, %v3904_v58  ;;  %v6234_v42 = vld [vmem:[%s7411_s20 + $0x18] sm:$0xff]  }
 0x880   : > { %v8841_v63 = vadd.f32 %v8774_v5, %v3905_v34 }
 0x881   : > { %v3955_v17 = vpack.c.bf16 %v8826_v60, %v8823_v36  ;;  %v3906_v61 = vmul.f32 %v8768_v29, %v3892_v21  ;;  %5548 = vmatpush3.bf16.msra.mxu1 %v6230_v4  ;;  %5588 = vmatpush3.bf16.msra.mxu0 %v6231_v9  ;;  %v6241_v29 = vld [vmem:[%s7411_s20 + $0xc8] sm:$0xff]  }
 0x882   : > { %5549 = vmatprep.subr.bf16.mxu1 %v6232_v31  ;;  %5589 = vmatprep.subr.bf16.mxu0 %v6233_v18 }
 0x883   : > { %4192 = vmatmul.mubr.bf16.gmra.mxu1 %v3955_v17  ;;  %4265 = vmatmul.mubr.bf16.gmra.mxu0 %v3955_v17  ;;  %v8838_v35 = vadd.f32 %v8774_v5, %v3906_v61  ;;  %v3957_v5 = vld [vmem:[%s7408_s26] sm:$0xf] }
 0x884   : > { %4201 = vmatprep.mubr.bf16.mxu1 %v9320_v22  ;;  %4274 = vmatprep.mubr.bf16.mxu0 %v9320_v22  ;;  %v6237_v22 = vld [vmem:[%s7411_s20 + $0xd0] sm:$0xff]   ;;  %v8861_v15 = vrot.slane %v3957_v5, %v9323_v0  ;;  %v8863_v3 = vrot.slane %v3957_v5, %v3973_v45  ;;  %v8867_v56 = vrot.slane %v3957_v5, %v9324_v33 }
 0x885   : > { %5550 = vmatpush3.bf16.msra.mxu1 %v6234_v42  ;;  %5590 = vmatpush3.bf16.msra.mxu0 %v6235_v14  ;;  %v3956_v57 = vpack.c.bf16 %v8838_v35, %v8841_v63  ;;  %v8871_v37 = vrot.slane %v3957_v5, %v9325_v54 }
 0x886   : > { %5551 = vmatprep.subr.bf16.mxu1 %v6236_v52  ;;  %5591 = vmatprep.subr.bf16.mxu0 %v6237_v22 }
 0x889   : > { %5552 = vmatpush3.bf16.msra.mxu1 %v6238_v39  ;;  %5592 = vmatpush3.bf16.msra.mxu0 %v6239_v46 }
 0x88a   : > { %5553 = vmatprep.subr.bf16.mxu1 %v6240_v2  ;;  %5593 = vmatprep.subr.bf16.mxu0 %v6241_v29 }
 0x88b   : > { %4202 = vmatmul.mubr.bf16.gmra.mxu1 %v3956_v57  ;;  %4275 = vmatmul.mubr.bf16.gmra.mxu0 %v3956_v57 }
 0x88d   : > { %5554 = vmatpush3.bf16.msra.mxu1 %v6242_v8  ;;  %5594 = vmatpush3.bf16.msra.mxu0 %v6243_v6 }
 0x88e   : > { %5555 = vmatprep.subr.bf16.mxu1 %v6244_v30  ;;  %5595 = vmatprep.subr.bf16.mxu0 %v6245_v59 }
 0x891   : > { %5556 = vmatpush3.bf16.msra.mxu1 %v6246_v20  ;;  %5596 = vmatpush3.bf16.msra.mxu0 %v6247_v7 }
 0x933   : > { %v4173_v27 = vpop.f32.mrf.mxu1  ;;  %v4246_v26 = vpop.f32.mrf.mxu0 }
 0x934   : > { %v4174_v40 = vadd.f32 %v4173_v27, %v8867_v56  ;;  %v4247_v49 = vadd.f32 %v4246_v26, %v8871_v37 }
 0x935   : > { %v4175_v19 = vpop.f32.mrf.mxu1  ;;  %v4248_v47 = vpop.f32.mrf.mxu0 }
 0x936   : > { %v4176_v44 = vadd.f32 %v4175_v19, %v8861_v15  ;;  %v4249_v50 = vadd.f32 %v4248_v47, %v8863_v3  ;;  %v4285_v21 = vmax.f32 %v4174_v40, 0.0  ;;  %v4287_v31 = vmax.f32 %v4247_v49, 0.0 }
 0x937   : > { %v4177_v43 = vpop.f32.mrf.mxu1  ;;  %v4250_v11 = vpop.f32.mrf.mxu0 }
 0x938   : > { %v4178_v13 = vadd.f32 %v4177_v43, %v8867_v56  ;;  %v4251_v23 = vadd.f32 %v4250_v11, %v8871_v37  ;;  %v4286_v62 = vmax.f32 %v4176_v44, 0.0  ;;  %v4288_v58 = vmax.f32 %v4249_v50, 0.0 }
 0x939   : > { %v4179_v28 = vpop.f32.mrf.mxu1  ;;  %v4252_v24 = vpop.f32.mrf.mxu0 }
 0x93a   : > { %v4180_v16 = vadd.f32 %v4179_v28, %v8861_v15  ;;  %v4253_v32 = vadd.f32 %v4252_v24, %v8863_v3  ;;  %v4289_v38 = vmax.f32 %v4178_v13, 0.0  ;;  %v4291_v48 = vmax.f32 %v4251_v23, 0.0 }
 0x93b   : > { %v4183_v10 = vpop.f32.mrf.mxu1  ;;  %v4256_v55 = vpop.f32.mrf.mxu0 }
 0x93c   : > { %v4290_v4 = vmax.f32 %v4180_v16, 0.0  ;;  %v4292_v9 = vmax.f32 %v4253_v32, 0.0  ;;  %v4317_v42 = vpack.c.bf16 %v4289_v38, %v4285_v21  ;;  %v4319_v14 = vpack.c.bf16 %v4291_v48, %v4287_v31 }
 0x93d   : > { %v4185_v18 = vpop.f32.mrf.mxu1  ;;  %v4258_v53 = vpop.f32.mrf.mxu0  ;;  %v4184_v2 = vadd.f32 %v4183_v10, %v8867_v56  ;;  %v4257_v29 = vadd.f32 %v4256_v55, %v8871_v37 }
 0x93e   : > { %v4318_v17 = vpack.c.bf16 %v4290_v4, %v4286_v62  ;;  %v4320_v61 = vpack.c.bf16 %v4292_v9, %v4288_v58  ;;  %v4186_v34 = vadd.f32 %v4185_v18, %v8861_v15  ;;  %v4259_v22 = vadd.f32 %v4258_v53, %v8863_v3 }
 0x93f   : > { %v4187_v57 = vpop.f32.mrf.mxu1  ;;  %v4260_v52 = vpop.f32.mrf.mxu0  ;;  %v4293_v33 = vmax.f32 %v4184_v2, 0.0  ;;  %v4295_v54 = vmax.f32 %v4257_v29, 0.0 }
 0x940   : > { %v4188_v39 = vadd.f32 %v4187_v57, %v8867_v56  ;;  %v4261_v46 = vadd.f32 %v4260_v52, %v8871_v37  ;;  %4628 = vmatprep.mubr.bf16.mxu1 %v4318_v17  ;;  %4693 = vmatprep.mubr.bf16.mxu0 %v4320_v61  ;;  %v4294_v5 = vmax.f32 %v4186_v34, 0.0  ;;  %v4296_v27 = vmax.f32 %v4259_v22, 0.0 }
 0x941   : > { %v4189_v8 = vpop.f32.mrf.mxu1  ;;  %v4262_v6 = vpop.f32.mrf.mxu0  ;;  %4629 = vmatmul.mubr.bf16.vlgmr.msra.gmra.mxu1 %v4317_v42  ;;  %4694 = vmatmul.mubr.bf16.vlgmr.msra.gmra.mxu0 %v4319_v14 }
 0x942   : > { %v4190_v30 = vadd.f32 %v4189_v8, %v8861_v15  ;;  %v4263_v59 = vadd.f32 %v4262_v6, %v8863_v3  ;;  %v4297_v20 = vmax.f32 %v4188_v39, 0.0  ;;  %v4299_v7 = vmax.f32 %v4261_v46, 0.0 }
 0x943   : > { %v4193_v51 = vpop.f32.mrf.mxu1  ;;  %v4266_v45 = vpop.f32.mrf.mxu0 }
 0x944   : > { %v4298_v26 = vmax.f32 %v4190_v30, 0.0  ;;  %v4300_v0 = vmax.f32 %v4263_v59, 0.0  ;;  %v4321_v44 = vpack.c.bf16 %v4297_v20, %v4293_v33  ;;  %v4323_v50 = vpack.c.bf16 %v4299_v7, %v4295_v54 }
 0x945   : > { %v4195_v19 = vpop.f32.mrf.mxu1  ;;  %v4268_v47 = vpop.f32.mrf.mxu0  ;;  %v4194_v16 = vadd.f32 %v4193_v51, %v8867_v56  ;;  %v4267_v32 = vadd.f32 %v4266_v45, %v8871_v37 }
 0x946   : > { %v4322_v43 = vpack.c.bf16 %v4298_v26, %v4294_v5  ;;  %v4324_v11 = vpack.c.bf16 %v4300_v0, %v4296_v27  ;;  %v4196_v13 = vadd.f32 %v4195_v19, %v8861_v15  ;;  %v4269_v49 = vadd.f32 %v4268_v47, %v8863_v3 }
 0x947   : > { %v4197_v23 = vpop.f32.mrf.mxu1  ;;  %v4270_v40 = vpop.f32.mrf.mxu0  ;;  %v4301_v17 = vmax.f32 %v4194_v16, 0.0  ;;  %v4303_v61 = vmax.f32 %v4267_v32, 0.0 }
 0x948   : > { %v4198_v28 = vadd.f32 %v4197_v23, %v8867_v56  ;;  %v4271_v24 = vadd.f32 %v4270_v40, %v8871_v37  ;;  %4636 = vmatprep.mubr.bf16.mxu1 %v4322_v43  ;;  %4701 = vmatprep.mubr.bf16.mxu0 %v4324_v11  ;;  %v4302_v21 = vmax.f32 %v4196_v13, 0.0  ;;  %v4304_v31 = vmax.f32 %v4269_v49, 0.0 }
 0x949   : > { %v4199_v38 = vpop.f32.mrf.mxu1  ;;  %v4272_v48 = vpop.f32.mrf.mxu0  ;;  %4637 = vmatmul.mubr.bf16.gmra.mxu1 %v4321_v44  ;;  %4702 = vmatmul.mubr.bf16.gmra.mxu0 %v4323_v50 }
 0x94a   : > { %v4200_v10 = vadd.f32 %v4199_v38, %v8861_v15  ;;  %v4273_v55 = vadd.f32 %v4272_v48, %v8863_v3  ;;  %v4305_v62 = vmax.f32 %v4198_v28, 0.0  ;;  %v4307_v58 = vmax.f32 %v4271_v24, 0.0 }
 0x94b   : > { %v4203_v4 = vpop.f32.mrf.mxu1  ;;  %v4276_v9 = vpop.f32.mrf.mxu0 }
 0x94c   : > { %v4306_v18 = vmax.f32 %v4200_v10, 0.0  ;;  %v4308_v53 = vmax.f32 %v4273_v55, 0.0  ;;  %v4325_v52 = vpack.c.bf16 %v4305_v62, %v4301_v17  ;;  %v4327_v22 = vpack.c.bf16 %v4307_v58, %v4303_v61 }
 0x94d   : > { %v4205_v42 = vpop.f32.mrf.mxu1  ;;  %v4278_v14 = vpop.f32.mrf.mxu0  ;;  %v4204_v30 = vadd.f32 %v4203_v4, %v8867_v56  ;;  %v4277_v59 = vadd.f32 %v4276_v9, %v8871_v37 }
 0x94e   : > { %v4326_v34 = vpack.c.bf16 %v4306_v18, %v4302_v21  ;;  %v4328_v57 = vpack.c.bf16 %v4308_v53, %v4304_v31  ;;  %v4206_v39 = vadd.f32 %v4205_v42, %v8861_v15  ;;  %v4279_v29 = vadd.f32 %v4278_v14, %v8863_v3 }
 0x94f   : > { %v4207_v46 = vpop.f32.mrf.mxu1  ;;  %v4280_v2 = vpop.f32.mrf.mxu0  ;;  %v4309_v19 = vmax.f32 %v4204_v30, 0.0  ;;  %v4311_v47 = vmax.f32 %v4277_v59, 0.0 }
 0x950   : > { %v4208_v8 = vadd.f32 %v4207_v46, %v8867_v56  ;;  %v4281_v6 = vadd.f32 %v4280_v2, %v8871_v37  ;;  %4644 = vmatprep.mubr.bf16.mxu1 %v4326_v34  ;;  %4709 = vmatprep.mubr.bf16.mxu0 %v4328_v57  ;;  %v4310_v26 = vmax.f32 %v4206_v39, 0.0  ;;  %v4312_v0 = vmax.f32 %v4279_v29, 0.0 }
 0x951   : > { %v4209_v20 = vpop.f32.mrf.mxu1  ;;  %v4282_v7 = vpop.f32.mrf.mxu0  ;;  %4645 = vmatmul.mubr.bf16.gmra.mxu1 %v4325_v52  ;;  %4710 = vmatmul.mubr.bf16.gmra.mxu0 %v4327_v22 }
 0x952   : > { %v4210_v51 = vadd.f32 %v4209_v20, %v8861_v15  ;;  %v4283_v45 = vadd.f32 %v4282_v7, %v8863_v3  ;;  %v4313_v5 = vmax.f32 %v4208_v8, 0.0  ;;  %v4315_v27 = vmax.f32 %v4281_v6, 0.0  ;;  %v8910_v3 = vld [vmem:[%s838_s3] ss:$0 sm:$0xff] }
 0x954   : > { %v4314_v33 = vmax.f32 %v4210_v51, 0.0  ;;  %v4316_v54 = vmax.f32 %v4283_v45, 0.0  ;;  %v4329_v37 = vpack.c.bf16 %v4313_v5, %v4309_v19  ;;  %v4331_v11 = vpack.c.bf16 %v4315_v27, %v4311_v47 }
 0x956   : > { %v4330_v56 = vpack.c.bf16 %v4314_v33, %v4310_v26  ;;  %v4332_v43 = vpack.c.bf16 %v4316_v54, %v4312_v0 }
 0x958   : > { %4652 = vmatprep.mubr.bf16.mxu1 %v4330_v56  ;;  %4717 = vmatprep.mubr.bf16.mxu0 %v4332_v43 }
 0x959   : > { %4653 = vmatmul.mubr.bf16.gmra.mxu1 %v4329_v37  ;;  %4718 = vmatmul.mubr.bf16.gmra.mxu0 %v4331_v11 }
 0xa01   : > { %v5557_v15 = vpop.f32.mrf.mxu1  ;;  %v5597_v44 = vpop.f32.mrf.mxu0 }
 0xa03   : > { %v5558_v50 = vpop.f32.mrf.mxu1  ;;  %v5598_v13 = vpop.f32.mrf.mxu0 }
 0xa04   : > { %v5559_v23 = vadd.f32 %v5558_v50, %v5557_v15  ;;  %v5599_v24 = vadd.f32 %v5598_v13, %v5597_v44 }
 0xa05   : > { %v5560_v40 = vpop.f32.mrf.mxu1  ;;  %v5600_v49 = vpop.f32.mrf.mxu0 }
 0xa06   : > { %v4631_v28 = vadd.f32 %v5559_v23, %v8910_v3 }
 0xa07   : > { %v5561_v16 = vpop.f32.mrf.mxu1  ;;  %v5601_v32 = vpop.f32.mrf.mxu0 }
 0xa08   : > { %v4696_v38 = vadd.f32 %v5599_v24, %v4631_v28  ;;  %v5562_v48 = vadd.f32 %v5561_v16, %v5560_v40  ;;  %v5602_v58 = vadd.f32 %v5601_v32, %v5600_v49 }
 0xa09   : > { %v5563_v10 = vpop.f32.mrf.mxu1  ;;  %v5603_v55 = vpop.f32.mrf.mxu0 }
 0xa0a   : > { %v4634_v62 = vadd.f32 %v5562_v48, %v8910_v3  ;;  %v8915_v4 = vadd.f32 %v4696_v38, %v8779_v25 }
 0xa0b   : > { %v5564_v9 = vpop.f32.mrf.mxu1  ;;  %v5604_v21 = vpop.f32.mrf.mxu0 }
 0xa0c   : > { %v4699_v31 = vadd.f32 %v5602_v58, %v4634_v62  ;;  %v5565_v18 = vadd.f32 %v5564_v9, %v5563_v10  ;;  %4736 = vadd.xlane.f32.xlu1 %v8915_v4  ;;  %v5605_v42 = vadd.f32 %v5604_v21, %v5603_v55 }
 0xa0d   : > { %v5566_v53 = vpop.f32.mrf.mxu1  ;;  %v5606_v17 = vpop.f32.mrf.mxu0 }
 0xa0e   : > { %v4639_v61 = vadd.f32 %v5565_v18, %v8910_v3  ;;  %v4727_v14 = vadd.f32 %v4699_v31, %v8782_v41 }
 0xa0f   : > { %v5567_v34 = vpop.f32.mrf.mxu1  ;;  %v5607_v57 = vpop.f32.mrf.mxu0 }
 0xa10   : > { %v4704_v52 = vadd.f32 %v5605_v42, %v4639_v61  ;;  %v5568_v22 = vadd.f32 %v5567_v34, %v5566_v53  ;;  %4738 = vadd.xlane.f32.xlu0 %v4727_v14  ;;  %v5608_v2 = vadd.f32 %v5607_v57, %v5606_v17 }
 0xa11   : > { %v5569_v25 = vpop.f32.mrf.mxu1  ;;  %v5609_v39 = vpop.f32.mrf.mxu0 }
 0xa12   : > { %v4642_v46 = vadd.f32 %v5568_v22, %v8910_v3  ;;  %v4728_v29 = vadd.f32 %v4704_v52, %v8803_v1 }
 0xa13   : > { %v5570_v8 = vpop.f32.mrf.mxu1  ;;  %v5610_v6 = vpop.f32.mrf.mxu0 }
 0xa14   : > { %v4707_v30 = vadd.f32 %v5608_v2, %v4642_v46  ;;  %v5571_v59 = vadd.f32 %v5570_v8, %v5569_v25  ;;  %4740 = vadd.xlane.f32.xlu1 %v4728_v29  ;;  %v5611_v51 = vadd.f32 %v5610_v6, %v5609_v39 }
 0xa15   : > { %v5572_v20 = vpop.f32.mrf.mxu1  ;;  %v5612_v7 = vpop.f32.mrf.mxu0 }
 0xa16   : > { %v4647_v41 = vadd.f32 %v5571_v59, %v8910_v3  ;;  %v4729_v45 = vadd.f32 %v4707_v30, %v8796_v12 }
 0xa17   : > { %v5573_v5 = vpop.f32.mrf.mxu1  ;;  %v5613_v27 = vpop.f32.mrf.mxu0 }
 0xa18   : > { %v4712_v26 = vadd.f32 %v5611_v51, %v4647_v41  ;;  %v5574_v0 = vadd.f32 %v5573_v5, %v5572_v20  ;;  %4742 = vadd.xlane.f32.xlu0 %v4729_v45  ;;  %v5614_v19 = vadd.f32 %v5613_v27, %v5612_v7 }
 0xa19   : > { %v5575_v33 = vpop.f32.mrf.mxu1  ;;  %v5615_v54 = vpop.f32.mrf.mxu0 }
 0xa1a   : > { %v4650_v1 = vadd.f32 %v5574_v0, %v8910_v3  ;;  %v4730_v47 = vadd.f32 %v4712_v26, %v8823_v36 }
 0xa1b   : > { %v5576_v56 = vpop.f32.mrf.mxu1  ;;  %v5616_v43 = vpop.f32.mrf.mxu0 }
 0xa1c   : > { %v4715_v37 = vadd.f32 %v5614_v19, %v4650_v1  ;;  %v5577_v11 = vadd.f32 %v5576_v56, %v5575_v33  ;;  %4744 = vadd.xlane.f32.xlu1 %v4730_v47  ;;  %v5617_v50 = vadd.f32 %v5616_v43, %v5615_v54  ;;  %v5375_v43 = vld [vmem:[%s835_s15] ss:$0 sm:$0xff] }
 0xa1d   : > { %v5578_v15 = vpop.f32.mrf.mxu1  ;;  %v5618_v44 = vpop.f32.mrf.mxu0 }
 0xa1e   : > { %v4655_v12 = vadd.f32 %v5577_v11, %v8910_v3  ;;  %v4731_v13 = vadd.f32 %v4715_v37, %v8826_v60 }
 0xa1f   : > { %v5579_v23 = vpop.f32.mrf.mxu1  ;;  %v5619_v40 = vpop.f32.mrf.mxu0 }
 0xa20   : > { %v4720_v49 = vadd.f32 %v5617_v50, %v4655_v12  ;;  %v5580_v28 = vadd.f32 %v5579_v23, %v5578_v15  ;;  %4746 = vadd.xlane.f32.xlu0 %v4731_v13  ;;  %v5620_v36 = vadd.f32 %v5619_v40, %v5618_v44  ;;  %v5376_v15 = vld [vmem:[%s9328_s1] ss:$0 sm:$0xff] }
 0xa22   : > { %v4658_v24 = vadd.f32 %v5580_v28, %v8910_v3  ;;  %v4732_v16 = vadd.f32 %v4720_v49, %v8841_v63 }
 0xa24   : > { %v4723_v32 = vadd.f32 %v5620_v36, %v4658_v24  ;;  %4748 = vadd.xlane.f32.xlu1 %v4732_v16 }
 0xa26   : > { %v4733_v38 = vadd.f32 %v4723_v32, %v8838_v35 }
 0xa28   : > { %4750 = vadd.xlane.f32.xlu0 %v4733_v38 }
 0xa95   : > { %v4737_v48 = vpop.xlane.xlu1 %4736 }
 0xa96   : > { %v4752_v10 = vmul.f32 0.0078125, %v4737_v48 }
 0xa98   : > { %v4760_v55 = vsub.f32 %v8915_v4, %v4752_v10 }
 0xa99   : > { %v4739_v60 = vpop.xlane.xlu0 %4738 }
 0xa9a   : > { %v4753_v62 = vmul.f32 0.0078125, %v4739_v60  ;;  %v4768_v58 = vmul.f32 %v4760_v55, %v4760_v55 }
 0xa9c   : > { %v8932_v9 = vsub.f32 %v4727_v14, %v4753_v62  ;;  %4776 = vadd.xlane.f32.xlu1 %v4768_v58 }
 0xa9d   : > { %v4741_v21 = vpop.xlane.xlu1 %4740 }
 0xa9e   : > { %v4754_v3 = vmul.f32 0.0078125, %v4741_v21  ;;  %v4769_v63 = vmul.f32 %v8932_v9, %v8932_v9 }
 0xaa0   : > { %v8936_v31 = vsub.f32 %v4728_v29, %v4754_v3  ;;  %4778 = vadd.xlane.f32.xlu0 %v4769_v63 }
 0xaa1   : > { %v4743_v35 = vpop.xlane.xlu0 %4742 }
 0xaa2   : > { %v4755_v18 = vmul.f32 0.0078125, %v4743_v35  ;;  %v4770_v53 = vmul.f32 %v8936_v31, %v8936_v31 }
 0xaa4   : > { %v8940_v4 = vsub.f32 %v4729_v45, %v4755_v18  ;;  %4780 = vadd.xlane.f32.xlu1 %v4770_v53 }
 0xaa5   : > { %v4745_v17 = vpop.xlane.xlu1 %4744 }
 0xaa6   : > { %v4756_v61 = vmul.f32 0.0078125, %v4745_v17  ;;  %v4771_v42 = vmul.f32 %v8940_v4, %v8940_v4 }
 0xaa8   : > { %v8944_v14 = vsub.f32 %v4730_v47, %v4756_v61  ;;  %4782 = vadd.xlane.f32.xlu0 %v4771_v42 }
 0xaa9   : > { %v4747_v34 = vpop.xlane.xlu0 %4746 }
 0xaaa   : > { %v4757_v57 = vmul.f32 0.0078125, %v4747_v34  ;;  %v4772_v52 = vmul.f32 %v8944_v14, %v8944_v14 }
 0xaac   : > { %v8948_v22 = vsub.f32 %v4731_v13, %v4757_v57  ;;  %4784 = vadd.xlane.f32.xlu1 %v4772_v52 }
 0xaad   : > { %v4749_v25 = vpop.xlane.xlu1 %4748 }
 0xaae   : > { %v4758_v39 = vmul.f32 0.0078125, %v4749_v25  ;;  %v4773_v46 = vmul.f32 %v8948_v22, %v8948_v22 }
 0xab0   : > { %v8952_v2 = vsub.f32 %v4732_v16, %v4758_v39  ;;  %4786 = vadd.xlane.f32.xlu0 %v4773_v46 }
 0xab1   : > { %v4751_v29 = vpop.xlane.xlu0 %4750 }
 0xab2   : > { %v4759_v8 = vmul.f32 0.0078125, %v4751_v29  ;;  %v4774_v6 = vmul.f32 %v8952_v2, %v8952_v2 }
 0xab4   : > { %v8956_v30 = vsub.f32 %v4733_v38, %v4759_v8  ;;  %4788 = vadd.xlane.f32.xlu1 %v4774_v6 }
 0xab6   : > { %v4775_v59 = vmul.f32 %v8956_v30, %v8956_v30 }
 0xab8   : > { %4790 = vadd.xlane.f32.xlu0 %v4775_v59 }
 0xb25   : > { %v4777_v20 = vpop.xlane.xlu1 %4776 }
 0xb26   : > { %v4792_v7 = vmul.f32 0.0078125, %v4777_v20 }
 0xb28   : > { %v4800_v41 = vadd.f32 1e-05, %v4792_v7 }
 0xb29   : > { %v4779_v51 = vpop.xlane.xlu0 %4778 }
 0xb2a   : > { %6520 = vrsqrt.f32 %v4800_v41  ;;  %v4793_v45 = vmul.f32 0.0078125, %v4779_v51 }
 0xb2c   : > { %v4801_v5 = vadd.f32 1e-05, %v4793_v45 }
 0xb2d   : > { %v4781_v27 = vpop.xlane.xlu1 %4780 }
 0xb2e   : > { %6522 = vrsqrt.f32 %v4801_v5  ;;  %v4794_v26 = vmul.f32 0.0078125, %v4781_v27 }
 0xb30   : > { %v4802_v0 = vadd.f32 1e-05, %v4794_v26 }
 0xb31   : > { %v4783_v33 = vpop.xlane.xlu0 %4782 }
 0xb32   : > { %6524 = vrsqrt.f32 %v4802_v0  ;;  %v4795_v54 = vmul.f32 0.0078125, %v4783_v33 }
 0xb34   : > { %v4803_v1 = vadd.f32 1e-05, %v4795_v54 }
 0xb35   : > { %v4785_v19 = vpop.xlane.xlu1 %4784 }
 0xb36   : > { %6526 = vrsqrt.f32 %v4803_v1  ;;  %v4796_v47 = vmul.f32 0.0078125, %v4785_v19 }
 0xb37   : > { %v6521_v56 = vpop.eup %6520 }
 0xb38   : > { %v4816_v37 = vmul.f32 %v6521_v56, %v4760_v55  ;;  %v4804_v11 = vadd.f32 1e-05, %v4796_v47 }
 0xb39   : > { %v4787_v44 = vpop.xlane.xlu0 %4786 }
 0xb3a   : > { %v4830_v12 = vmul.f32 %v5375_v43, %v4816_v37  ;;  %6528 = vrsqrt.f32 %v4804_v11  ;;  %v4797_v50 = vmul.f32 0.0078125, %v4787_v44 }
 0xb3b   : > { %v6523_v13 = vpop.eup %6522 }
 0xb3c   : > { %v4844_v23 = vadd.f32 %v5376_v15, %v4830_v12  ;;  %v4817_v40 = vmul.f32 %v6523_v13, %v8932_v9  ;;  %v4805_v49 = vadd.f32 1e-05, %v4797_v50 }
 0xb3d   : > { %v4789_v28 = vpop.xlane.xlu1 %4788 }
 0xb3e   : > { %4852 = vst [vmem:[#allocation2 + $0x30] sm:$0xff] %v4844_v23  ;;  %v4831_v24 = vmul.f32 %v5375_v43, %v4817_v40  ;;  %6530 = vrsqrt.f32 %v4805_v49  ;;  %v4798_v36 = vmul.f32 0.0078125, %v4789_v28 }
 0xb3f   : > { %v6525_v16 = vpop.eup %6524 }
 0xb40   : > { %v4845_v32 = vadd.f32 %v5376_v15, %v4831_v24  ;;  %v4818_v38 = vmul.f32 %v6525_v16, %v8936_v31  ;;  %v4806_v48 = vadd.f32 1e-05, %v4798_v36 }
 0xb41   : > { %v4791_v10 = vpop.xlane.xlu0 %4790 }
 0xb42   : > { %4853 = vst [vmem:[#allocation2] sm:$0xff] %v4845_v32  ;;  %v4832_v55 = vmul.f32 %v5375_v43, %v4818_v38  ;;  %6532 = vrsqrt.f32 %v4806_v48  ;;  %v4799_v60 = vmul.f32 0.0078125, %v4791_v10 }
 0xb43   : > { %v6527_v62 = vpop.eup %6526 }
 0xb44   : > { %v4846_v58 = vadd.f32 %v5376_v15, %v4832_v55  ;;  %v4819_v9 = vmul.f32 %v6527_v62, %v8940_v4  ;;  %v4807_v21 = vadd.f32 1e-05, %v4799_v60 }
 0xb46   : > { %4854 = vst [vmem:[#allocation2 + $0x18] sm:$0xff] %v4846_v58  ;;  %v4833_v3 = vmul.f32 %v5375_v43, %v4819_v9  ;;  %6534 = vrsqrt.f32 %v4807_v21 }
 0xb47   : > { %v6529_v63 = vpop.eup %6528 }
 0xb48   : > { %v4847_v35 = vadd.f32 %v5376_v15, %v4833_v3  ;;  %v4820_v18 = vmul.f32 %v6529_v63, %v8944_v14 }
 0xb4a   : > { %4855 = vst [vmem:[#allocation2 + $0x10] sm:$0xff] %v4847_v35  ;;  %v4834_v31 = vmul.f32 %v5375_v43, %v4820_v18 }
 0xb4b   : > { %v6531_v53 = vpop.eup %6530 }
 0xb4c   : > { %v4848_v17 = vadd.f32 %v5376_v15, %v4834_v31  ;;  %v4821_v61 = vmul.f32 %v6531_v53, %v8948_v22 }
 0xb4e   : > { %4856 = vst [vmem:[#allocation2 + $0x8] sm:$0xff] %v4848_v17  ;;  %v4835_v42 = vmul.f32 %v5375_v43, %v4821_v61 }
 0xb4f   : > { %v6533_v34 = vpop.eup %6532 }
 0xb50   : > { %v4849_v57 = vadd.f32 %v5376_v15, %v4835_v42  ;;  %v4822_v4 = vmul.f32 %v6533_v34, %v8952_v2 }
 0xb52   : > { %4857 = vst [vmem:[#allocation2 + $0x20] sm:$0xff] %v4849_v57  ;;  %v4836_v52 = vmul.f32 %v5375_v43, %v4822_v4 }
 0xb53   : > { %v6535_v25 = vpop.eup %6534 }
 0xb54   : > { %v4850_v39 = vadd.f32 %v5376_v15, %v4836_v52  ;;  %v4823_v46 = vmul.f32 %v6535_v25, %v8956_v30 }
 0xb56   : > { %4858 = vst [vmem:[#allocation2 + $0x28] sm:$0xff] %v4850_v39  ;;  %v4837_v14 = vmul.f32 %v5375_v43, %v4823_v46  ;;  %4863 = sbr.rel (%p5377_p12) target bundleno = 2909 (0xb5d), region = 120 }
 0xb58   : > { %v4851_v29 = vadd.f32 %v5376_v15, %v4837_v14 }
 0xb5a   : > { %4859 = vst [vmem:[#allocation2 + $0x38] sm:$0xff] %v4851_v29 }
 0xb5b   : > { %4864 = vst [vmem:[%s7434_s24] sm:$0xff] %v4844_v23  ;;  %4865 = vst [vmem:[%s7434_s24 + $0x8] sm:$0xff] %v4845_v32 }
 0xb5c   : > { %4866 = vst [vmem:[%s7434_s24 + $0x10] sm:$0xff] %v4846_v58  ;;  %4867 = vst [vmem:[%s7434_s24 + $0x18] sm:$0xff] %v4847_v35 }
 0xb5d PF: > { %s9330_s22 = sld [smem:[#allocation33_spill]]  ;;  %s4882_s10 = sshll.u32 %s7434_s24, 4  ;;  %s8986_s10 = int_to_ptr.vmem [resolvable:$true] %s4882_s10 }
 0xb5e   : > { %s9332_s12 = sld [smem:[#allocation98_spill]]  ;;  %s4869_s11 = scalar_lea.sflag [#allocation5], %s7362_s14 }
 0xb5f   : > { %s6824_s17 = scalar_lea.vmem %s8986_s10, 512  ;;  %s6992_s4 = smov [#allocation20]  }
 0xb60   : > { %p6825_p6 = scmp.ne.s32.totalorder %s8986_s10, %s6824_s17  ;;  %s6828_s27 = sshll.u32 %s6992_s4, 4  ;;  %s6829_s27 = int_to_ptr.vmem [resolvable:$false] %s6828_s27 }
 0xb61   : > { %s6830_s23 = scalar_lea.vmem %s6829_s27, 1024  ;;  %p6831_p7 = scmp.lt.s32.totalorder %s8986_s10, %s6829_s27 }
 0xb62   : > { %p6826_p0 = pnand %p6825_p6, %p7262_p2  ;;  %p6832_p8 = scmp.lt.s32.totalorder %s6830_s23, %s6824_s17 }
 0xb63   : > { %s5388_s15 = sshll.u32 %s9330_s22, 9 }
 0xb64   : > { %s8983_s3 = scalar_lea.hbm %s9332_s12, %s5388_s15  ;;  %p6827_p1 = pneg %p6826_p0 }
 0xb65   : > { %p6833_p9 = por %p6832_p8, %p6831_p7 }
 0xb67   : > { %p6834_p11 = pnand %p6833_p9, %p6827_p1 }
 0xb69   : > { %6837 = shalt.err (!%p6834_p11)
}
 0xb6a   : > { %s6838_s24 = scalar_lea.hbm %s8983_s3, 512  ;;  %s6842_s5 = scalar_lea.hbm %s9332_s12, 1024 }
 0xb6b   : > { %p6839_p10 = scmp.ne.s32.totalorder %s8983_s3, %s6838_s24  ;;  %p6843_p13 = scmp.lt.s32.totalorder %s8983_s3, %s9332_s12 }
 0xb6c   : > { %p6844_p12 = scmp.lt.s32.totalorder %s6842_s5, %s6838_s24 }
 0xb6d   : > { %p6840_p5 = pnand %p6839_p10, %p7262_p2 }
 0xb6e   : > { %p6845_p6 = por %p6844_p12, %p6843_p13 }
 0xb6f   : > { %p6841_p4 = pneg %p6840_p5 }
 0xb71   : > { %p6846_p0 = pnand %p6845_p6, %p6841_p4 }
 0xb73   : > { %6849 = shalt.err (!%p6846_p0)
}
 0xb74   : > { %s6993_s28 = smov 128   ;;  %s6994_s13 = smov 8  }
 0xb75   : > { %5983 = dma.vmem_to_hbm [thread:$0]  (%p7262_p2), %s8986_s10, 512, %s8983_s3, %s4869_s11, %s6993_s28, %s6993_s28, %s6994_s13  }
 0xb76 PF: > { %s9333_s26 = sld [smem:[#allocation35_spill]] }
 0xb77   : > { %s9334_s20 = sld [smem:[#allocation30_spill]] }
 0xb7c   : > { %p6021_p1 = scmp.ge.s32.totalorder %s9333_s26, 2 }
 0xb7d   : > { %s4897_s1 = sand.u32 1, %s9334_s20  }
 0xb7e   : > { %p6017_p7 = pnand %p6021_p1, %p7270_p3  ;;  %s4898_s8 = scalar_lea.sflag [#allocation5], %s4897_s1 }
 0xb80   : > { %p6018_p8 = pneg %p6017_p7 }
 0xb82   : > { %6919 = dma.done.wait (%p6018_p8), %s4898_s8, 512  }
 0xb83   : > { %6921 = vsyncadd (%p6018_p8), %s4898_s8, 4294966784  ;;  %s44_s18 = sadd.s32 1, %s9333_s26   ;;  %s9336_s25 = sld [smem:[#allocation28_spill]] }
 0xb84   : > { %p41_p9 = scmp.ge.s32.totalorder %s44_s18, 14   ;;  %s9337_s26 = sld [smem:[#allocation29_spill]] }
 0xb85   : > { %s9338_s27 = sld [smem:[#allocation39_spill]]  ;;  %s9344_s28 = smov %s6940_s29 }
 0xb86   : > { %s9339_s14 = sld [smem:[#allocation31_spill]] }
 0xb87   : > { %s9340_s30 = sld [smem:[#allocation40_spill]] }
 0xb88   : > { %s9341_s15 = sld [smem:[#allocation34_spill]] }
 0xb89   : > { %s9342_s22 = sld [smem:[#allocation37_spill]] }
 0xb8a   : > { %s9343_s17 = sld [smem:[#allocation38_spill]] }
 0xb8b   :  { %43 = sbr.rel (!%p41_p9) target bundleno = 34 (0x22), region = 243 }
 0xb8c   : > { %s9345_s29 = smov %s9339_s14  ;;  %s9346_s14 = smov %s6956_s16 }
 0xb8f   : > { %s9347_s16 = smov %s9342_s22 }
 0xb90   :  { %4903 = vsyncpa [#allocation4], 1 }
 0xb91   :  { %4905 = vsyncpa [#allocation4 + $0x1], 1 }
 0xb92   :  { %4906 = vsyncpa [#allocation7], 1 }
 0xb93   :  { %4908 = vsyncpa [#allocation7 + $0x1], 1 }
 0xb94   :  { %4909 = vsyncpa [#allocation10], 1 }
 0xb95   :  { %4911 = vsyncpa [#allocation10 + $0x1], 1 }
 0xb96   :  { %4912 = vsyncpa [#allocation13], 1 }
 0xb97   :  { %4914 = vsyncpa [#allocation13 + $0x1], 1 }
 0xb98   :  { %4915 = vsyncpa [#allocation16], 1 }
 0xb99   :  { %4917 = vsyncpa [#allocation16 + $0x1], 1 }
 0xb9a   :  { %4918 = vsyncpa [#allocation19], 1 }
 0xb9b   :  { %4920 = vsyncpa [#allocation19 + $0x1], 1 }
 0xb9c   :  { %4921 = vsyncpa [#allocation5], 1 }
 0xb9d   :  { %4923 = vsyncpa [#allocation5 + $0x1], 1 }

</bundles_post_ra>
